<compile_context>
chip_gen: v7x
topology: tpu7x:2x2x1
jax: 0.10.0
libtpu: 0.0.40
codegen_flags: <defaults>
</compile_context>

<pallas_src>
import jax
import jax.numpy as jnp
from jax import lax
from jax.experimental import pallas as pl
from jax.experimental.pallas import tpu as pltpu


def _stage_kernel(ee_lo, eo_lo, oe, oo, ee_hi, eo_hi, w_ref, b_ref, o_ref):
    """One (batch, row-block) step of stride-2 3x3 conv + folded BN + ReLU.

    Inputs are six stride-2 "phase" views of the zero-padded activation,
    flattened to (rows * pitch, Cin) with pitch = Wo + 1, so every tap of the
    3x3 kernel is either a phase block itself or that block shifted by one
    flat position (the shifted element that wraps past the block end only
    feeds the junk output column, so it is don't-care).  The 9 taps are 9 MXU
    matmuls accumulated in f32; BN shift + ReLU run on the f32 accumulator and
    the result is stored lane-exact in bf16 (no padded junk channels).
    """
    def shift1(v):
        # result[p] = v[p + 1]; the wrapped final row is don't-care.
        return jnp.concatenate([v[1:], v[:1]], axis=0)

    x00 = ee_lo[...]
    x01 = eo_lo[...]
    x10 = oe[...]
    x11 = oo[...]
    x20 = ee_hi[...]
    x21 = eo_hi[...]
    taps = (
        x00, x01, shift1(x00),      # ky = 0 : kx = 0, 1, 2
        x10, x11, shift1(x10),      # ky = 1
        x20, x21, shift1(x20),      # ky = 2
    )
    acc = jnp.dot(taps[0], w_ref[0], preferred_element_type=jnp.float32)
    for t in range(1, 9):
        acc += jnp.dot(taps[t], w_ref[t], preferred_element_type=jnp.float32)
    o_ref[...] = jnp.maximum(acc + b_ref[...], 0.0).astype(o_ref.dtype)


def conv_bn_relu_stage(x_nhwc, w, scale, shift, *, row_block=8):
    """Stride-2 3x3 conv (pad=1) + folded BatchNorm + ReLU, fused in Pallas.

    x_nhwc: (N, H, W, Cin) activation (used as bf16).
    w:      (3, 3, Cin, Cout) conv weight (HWIO).
    scale/shift: folded eval-mode BatchNorm affine, shape (Cout,).
    Returns (N, Ho, Wo, Cout) in bfloat16.

    row_block=8 keeps the streamed VMEM footprint v7x-safe; on v5e/v6e
    (128 MiB VMEM) it can be raised to amortize per-grid-step overhead.
    """
    N, H, W, Cin = x_nhwc.shape
    Cout = w.shape[-1]
    Ho = (H + 1) // 2
    Wo = (W + 1) // 2
    Cp = Wo + 1                      # row pitch: one junk column absorbs kx+1

    # --- glue: stride-2 phase (space-to-depth) decomposition, all bf16 ------
    xb = x_nhwc.astype(jnp.bfloat16)
    xp = jnp.pad(xb, ((0, 0), (1, 1), (1, 1), (0, 0)))
    pee = xp[:, 0:2 * Ho + 1:2, 0:2 * Wo + 1:2, :]   # (N, Ho+1, Wo+1, Cin)
    peo = xp[:, 0:2 * Ho + 1:2, 1:2 * Wo:2, :]       # (N, Ho+1, Wo,   Cin)
    poe = xp[:, 1:2 * Ho:2, 0:2 * Wo + 1:2, :]       # (N, Ho,   Wo+1, Cin)
    poo = xp[:, 1:2 * Ho:2, 1:2 * Wo:2, :]           # (N, Ho,   Wo,   Cin)

    # --- row-block tiling (block flat dim must be 8-aligned or full) --------
    if Ho <= row_block:
        Rb, nb = Ho, 1
    else:
        Rb = max(8, (row_block // 8) * 8)            # Rb * Cp multiple of 8
        nb = -(-Ho // Rb)
    Ho_pad = Rb * nb

    def prep(p, rows):
        pad_r = rows - p.shape[1]
        pad_c = Cp - p.shape[2]
        return jnp.pad(p, ((0, 0), (0, pad_r), (0, pad_c), (0, 0)))

    pee = prep(pee, Ho_pad + 1)
    peo = prep(peo, Ho_pad + 1)
    poe = prep(poe, Ho_pad)
    poo = prep(poo, Ho_pad)

    def flat(p):                      # (N, R, Cp, Cin) -> (N, R*Cp, Cin)
        return p.reshape(N, p.shape[1] * Cp, Cin)

    ee_lo = flat(pee[:, 0:Ho_pad])        # tap rows r     (ky = 0)
    ee_hi = flat(pee[:, 1:Ho_pad + 1])    # tap rows r + 1 (ky = 2)
    eo_lo = flat(peo[:, 0:Ho_pad])
    eo_hi = flat(peo[:, 1:Ho_pad + 1])
    oe = flat(poe)                        # ky = 1
    oo = flat(poo)

    # --- params: fold BN scale into W in f32, cast bf16, per-tap layout -----
    w2 = (w * scale.reshape(1, 1, 1, Cout)).reshape(9, Cin, Cout)
    w2 = w2.astype(jnp.bfloat16)
    b2 = shift.reshape(1, Cout).astype(jnp.float32)

    Mblk = Rb * Cp
    Mtot = Ho_pad * Cp

    phase_spec = pl.BlockSpec((None, Mblk, Cin), lambda n, i: (n, i, 0))
    flops = 2 * 9 * N * Mtot * Cin * Cout
    bytes_accessed = (6 * N * Mtot * Cin + N * Mtot * Cout
                      + 9 * Cin * Cout) * 2 + 4 * Cout

    out = pl.pallas_call(
        _stage_kernel,
        out_shape=jax.ShapeDtypeStruct((N, Mtot, Cout), jnp.bfloat16),
        grid_spec=pltpu.PrefetchScalarGridSpec(
            num_scalar_prefetch=0,
            grid=(N, nb),
            in_specs=[phase_spec] * 6 + [
                pl.BlockSpec((9, Cin, Cout), lambda n, i: (0, 0, 0)),  # weights
                pl.BlockSpec((1, Cout), lambda n, i: (0, 0)),          # BN shift
            ],
            out_specs=pl.BlockSpec((None, Mblk, Cout), lambda n, i: (n, i, 0)),
        ),
        compiler_params=pltpu.CompilerParams(
            dimension_semantics=("parallel", "parallel"),
            vmem_limit_bytes=32 * 1024 * 1024),
        cost_estimate=pl.CostEstimate(flops=flops, transcendentals=0,
                                      bytes_accessed=bytes_accessed),
    )(ee_lo, eo_lo, oe, oo, ee_hi, eo_hi, w2, b2)

    # drop the junk output column / padded rows, restore NHWC
    return out.reshape(N, Ho_pad, Cp, Cout)[:, :Ho, :Wo, :]


def init_paramount_params(key, in_channels, stage_channels):
    """Deterministic synthetic backbone params (conv weight + folded BN)."""
    params = []
    c_prev = in_channels
    eps = 1e-5
    for c in stage_channels:
        key, k1, k2, k3 = jax.random.split(key, 4)
        w = jax.random.normal(k1, (3, 3, c_prev, c), jnp.float32) * 0.1
        gamma = 1.0 + 0.1 * jax.random.normal(k2, (c,), jnp.float32)
        beta = 0.1 * jax.random.normal(k3, (c,), jnp.float32)
        running_mean = jnp.zeros((c,), jnp.float32)
        running_var = jnp.ones((c,), jnp.float32)
        scale = gamma / jnp.sqrt(running_var + eps)
        shift = beta - running_mean * scale
        params.append((w, scale, shift))
        c_prev = c
    return params


def paramount_forward(x_nchw, params):
    """Mirror of Paramount.forward: run 5 stages, collect every stage output.

    Activations stay bf16/NHWC across the stage loop; the returned feature
    list is NCHW float32 to match the PyTorch module's interface.  (Returning
    bf16 would halve the final feature writeback if the consumer accepts it.)
    """
    x = jnp.transpose(x_nchw, (0, 2, 3, 1))          # NCHW -> NHWC
    feats_nhwc = []
    for (w, scale, shift) in params:                 # total_stage_num == 5
        x = conv_bn_relu_stage(x, w, scale, shift)
        feats_nhwc.append(x)
    return [jnp.transpose(f, (0, 3, 1, 2)).astype(jnp.float32)
            for f in feats_nhwc]


def _reference_forward(x_nchw, params):
    """XLA conv reference with the same bf16-operand / f32-accumulate numerics."""
    x = jnp.transpose(x_nchw, (0, 2, 3, 1))
    feats = []
    for (w, scale, shift) in params:
        xb = x.astype(jnp.bfloat16).astype(jnp.float32)
        wb = (w * scale.reshape(1, 1, 1, -1)).astype(jnp.bfloat16)
        y = lax.conv_general_dilated(
            xb, wb.astype(jnp.float32), window_strides=(2, 2),
            padding=((1, 1), (1, 1)),
            dimension_numbers=("NHWC", "HWIO", "NHWC"))
        y = jnp.maximum(y + shift.reshape(1, 1, 1, -1), 0.0)
        x = y.astype(jnp.bfloat16)
        feats.append(y)
    return [jnp.transpose(f, (0, 3, 1, 2)) for f in feats]


if __name__ == "__main__":
    key = jax.random.PRNGKey(0)
    k_x, k_p = jax.random.split(key)

    # Small shapes: batch=2, in_channels=4, spatial=16x16.
    x = jax.random.normal(k_x, (2, 4, 16, 16), jnp.float32)
    stage_channels = [8, 16, 32, 32, 64]      # synthetic nx_infos channels
    params = init_paramount_params(k_p, in_channels=4,
                                   stage_channels=stage_channels)

    forward = jax.jit(paramount_forward)      # fuse glue ops, cut dispatch cost
    feats = forward(x, params)
    feats = [jax.block_until_ready(f) for f in feats]

    expected_spatial = [8, 4, 2, 1, 1]
    for f, c, s in zip(feats, stage_channels, expected_spatial):
        assert f.shape == (2, c, s, s), f.shape
        assert bool(jnp.all(jnp.isfinite(f)))

    # Numerics: compare against the XLA convolution reference (both sides use
    # bf16 operands with f32 accumulation, so differences are ~bf16 rounding).
    refs = _reference_forward(x, params)
    for f, r in zip(feats, refs):
        assert bool(jnp.allclose(f, r, rtol=2e-2, atol=2e-2)), \
            float(jnp.max(jnp.abs(f - r)))

    print("KERNEL_OK")
</pallas_src>

<mosaic_0001>
module attributes {stable_mosaic.version = 11 : i64} {
  func.func @_stage_kernel(%arg0: i32, %arg1: i32, %arg2: memref<1x72x4xbf16, #tpu.memory_space<vmem>>, %arg3: memref<1x72x4xbf16, #tpu.memory_space<vmem>>, %arg4: memref<1x72x4xbf16, #tpu.memory_space<vmem>>, %arg5: memref<1x72x4xbf16, #tpu.memory_space<vmem>>, %arg6: memref<1x72x4xbf16, #tpu.memory_space<vmem>>, %arg7: memref<1x72x4xbf16, #tpu.memory_space<vmem>>, %arg8: memref<9x4x8xbf16, #tpu.memory_space<vmem>>, %arg9: memref<1x8xf32, #tpu.memory_space<vmem>>, %arg10: memref<1x72x8xbf16, #tpu.memory_space<vmem>>) attributes {dimension_semantics = [#tpu.dimension_semantics<parallel>, #tpu.dimension_semantics<parallel>], iteration_bounds = array<i64: 2, 1>, scalar_prefetch = 0 : i64, scratch_operands = 0 : i64, tpu.core_type = #tpu.core_type<tc>, window_params = [{transform_indices = @transform_0, window_bounds = array<i64: 1, 72, 4>}, {transform_indices = @transform_1, window_bounds = array<i64: 1, 72, 4>}, {transform_indices = @transform_2, window_bounds = array<i64: 1, 72, 4>}, {transform_indices = @transform_3, window_bounds = array<i64: 1, 72, 4>}, {transform_indices = @transform_4, window_bounds = array<i64: 1, 72, 4>}, {transform_indices = @transform_5, window_bounds = array<i64: 1, 72, 4>}, {pipeline_mode = #tpu.pipeline_mode<synchronous>, transform_indices = @transform_6, window_bounds = array<i64: 9, 4, 8>}, {pipeline_mode = #tpu.pipeline_mode<synchronous>, transform_indices = @transform_7, window_bounds = array<i64: 1, 8>}, {transform_indices = @transform_8, window_bounds = array<i64: 1, 72, 8>}]} {
    %c0 = arith.constant 0 : index
    %c0_0 = arith.constant 0 : index
    %c0_1 = arith.constant 0 : index
    %0 = vector.load %arg2[%c0, %c0_0, %c0_1] : memref<1x72x4xbf16, #tpu.memory_space<vmem>>, vector<1x72x4xbf16>
    %1 = vector.shape_cast %0 : vector<1x72x4xbf16> to vector<72x4xbf16>
    %c0_2 = arith.constant 0 : index
    %c0_3 = arith.constant 0 : index
    %c0_4 = arith.constant 0 : index
    %2 = vector.load %arg3[%c0_2, %c0_3, %c0_4] : memref<1x72x4xbf16, #tpu.memory_space<vmem>>, vector<1x72x4xbf16>
    %3 = vector.shape_cast %2 : vector<1x72x4xbf16> to vector<72x4xbf16>
    %c0_5 = arith.constant 0 : index
    %c0_6 = arith.constant 0 : index
    %c0_7 = arith.constant 0 : index
    %4 = vector.load %arg4[%c0_5, %c0_6, %c0_7] : memref<1x72x4xbf16, #tpu.memory_space<vmem>>, vector<1x72x4xbf16>
    %5 = vector.shape_cast %4 : vector<1x72x4xbf16> to vector<72x4xbf16>
    %c0_8 = arith.constant 0 : index
    %c0_9 = arith.constant 0 : index
    %c0_10 = arith.constant 0 : index
    %6 = vector.load %arg5[%c0_8, %c0_9, %c0_10] : memref<1x72x4xbf16, #tpu.memory_space<vmem>>, vector<1x72x4xbf16>
    %7 = vector.shape_cast %6 : vector<1x72x4xbf16> to vector<72x4xbf16>
    %c0_11 = arith.constant 0 : index
    %c0_12 = arith.constant 0 : index
    %c0_13 = arith.constant 0 : index
    %8 = vector.load %arg6[%c0_11, %c0_12, %c0_13] : memref<1x72x4xbf16, #tpu.memory_space<vmem>>, vector<1x72x4xbf16>
    %9 = vector.shape_cast %8 : vector<1x72x4xbf16> to vector<72x4xbf16>
    %c0_14 = arith.constant 0 : index
    %c0_15 = arith.constant 0 : index
    %c0_16 = arith.constant 0 : index
    %10 = vector.load %arg7[%c0_14, %c0_15, %c0_16] : memref<1x72x4xbf16, #tpu.memory_space<vmem>>, vector<1x72x4xbf16>
    %11 = vector.shape_cast %10 : vector<1x72x4xbf16> to vector<72x4xbf16>
    %12 = vector.extract_strided_slice %1 {offsets = [1, 0], sizes = [71, 4], strides = [1, 1]} : vector<72x4xbf16> to vector<71x4xbf16>
    %13 = vector.extract_strided_slice %1 {offsets = [0, 0], sizes = [1, 4], strides = [1, 1]} : vector<72x4xbf16> to vector<1x4xbf16>
    %14 = tpu.concatenate %12, %13 in 0 : vector<71x4xbf16>, vector<1x4xbf16> -> vector<72x4xbf16>
    %15 = vector.extract_strided_slice %5 {offsets = [1, 0], sizes = [71, 4], strides = [1, 1]} : vector<72x4xbf16> to vector<71x4xbf16>
    %16 = vector.extract_strided_slice %5 {offsets = [0, 0], sizes = [1, 4], strides = [1, 1]} : vector<72x4xbf16> to vector<1x4xbf16>
    %17 = tpu.concatenate %15, %16 in 0 : vector<71x4xbf16>, vector<1x4xbf16> -> vector<72x4xbf16>
    %18 = vector.extract_strided_slice %9 {offsets = [1, 0], sizes = [71, 4], strides = [1, 1]} : vector<72x4xbf16> to vector<71x4xbf16>
    %19 = vector.extract_strided_slice %9 {offsets = [0, 0], sizes = [1, 4], strides = [1, 1]} : vector<72x4xbf16> to vector<1x4xbf16>
    %20 = tpu.concatenate %18, %19 in 0 : vector<71x4xbf16>, vector<1x4xbf16> -> vector<72x4xbf16>
    %c0_17 = arith.constant 0 : index
    %c0_18 = arith.constant 0 : index
    %c0_19 = arith.constant 0 : index
    %21 = vector.load %arg8[%c0_17, %c0_18, %c0_19] : memref<9x4x8xbf16, #tpu.memory_space<vmem>>, vector<1x4x8xbf16>
    %22 = vector.shape_cast %21 : vector<1x4x8xbf16> to vector<4x8xbf16>
    %cst = arith.constant dense<0.000000e+00> : vector<72x8xf32>
    %23 = tpu.matmul %1, %22, %cst {dimension_numbers = #tpu.dot_dimension_numbers<[1], [0], [0], [1], [0, 0, 1, 1], [], []>} : vector<72x4xbf16>, vector<4x8xbf16>, vector<72x8xf32> -> vector<72x8xf32>
    %c1 = arith.constant 1 : index
    %c0_20 = arith.constant 0 : index
    %c0_21 = arith.constant 0 : index
    %24 = vector.load %arg8[%c1, %c0_20, %c0_21] : memref<9x4x8xbf16, #tpu.memory_space<vmem>>, vector<1x4x8xbf16>
    %25 = vector.shape_cast %24 : vector<1x4x8xbf16> to vector<4x8xbf16>
    %cst_22 = arith.constant dense<0.000000e+00> : vector<72x8xf32>
    %26 = tpu.matmul %3, %25, %cst_22 {dimension_numbers = #tpu.dot_dimension_numbers<[1], [0], [0], [1], [0, 0, 1, 1], [], []>} : vector<72x4xbf16>, vector<4x8xbf16>, vector<72x8xf32> -> vector<72x8xf32>
    %27 = arith.addf %23, %26 : vector<72x8xf32>
    %c2 = arith.constant 2 : index
    %c0_23 = arith.constant 0 : index
    %c0_24 = arith.constant 0 : index
    %28 = vector.load %arg8[%c2, %c0_23, %c0_24] : memref<9x4x8xbf16, #tpu.memory_space<vmem>>, vector<1x4x8xbf16>
    %29 = vector.shape_cast %28 : vector<1x4x8xbf16> to vector<4x8xbf16>
    %cst_25 = arith.constant dense<0.000000e+00> : vector<72x8xf32>
    %30 = tpu.matmul %14, %29, %cst_25 {dimension_numbers = #tpu.dot_dimension_numbers<[1], [0], [0], [1], [0, 0, 1, 1], [], []>} : vector<72x4xbf16>, vector<4x8xbf16>, vector<72x8xf32> -> vector<72x8xf32>
    %31 = arith.addf %27, %30 : vector<72x8xf32>
    %c3 = arith.constant 3 : index
    %c0_26 = arith.constant 0 : index
    %c0_27 = arith.constant 0 : index
    %32 = vector.load %arg8[%c3, %c0_26, %c0_27] : memref<9x4x8xbf16, #tpu.memory_space<vmem>>, vector<1x4x8xbf16>
    %33 = vector.shape_cast %32 : vector<1x4x8xbf16> to vector<4x8xbf16>
    %cst_28 = arith.constant dense<0.000000e+00> : vector<72x8xf32>
    %34 = tpu.matmul %5, %33, %cst_28 {dimension_numbers = #tpu.dot_dimension_numbers<[1], [0], [0], [1], [0, 0, 1, 1], [], []>} : vector<72x4xbf16>, vector<4x8xbf16>, vector<72x8xf32> -> vector<72x8xf32>
    %35 = arith.addf %31, %34 : vector<72x8xf32>
    %c4 = arith.constant 4 : index
    %c0_29 = arith.constant 0 : index
    %c0_30 = arith.constant 0 : index
    %36 = vector.load %arg8[%c4, %c0_29, %c0_30] : memref<9x4x8xbf16, #tpu.memory_space<vmem>>, vector<1x4x8xbf16>
    %37 = vector.shape_cast %36 : vector<1x4x8xbf16> to vector<4x8xbf16>
    %cst_31 = arith.constant dense<0.000000e+00> : vector<72x8xf32>
    %38 = tpu.matmul %7, %37, %cst_31 {dimension_numbers = #tpu.dot_dimension_numbers<[1], [0], [0], [1], [0, 0, 1, 1], [], []>} : vector<72x4xbf16>, vector<4x8xbf16>, vector<72x8xf32> -> vector<72x8xf32>
    %39 = arith.addf %35, %38 : vector<72x8xf32>
    %c5 = arith.constant 5 : index
    %c0_32 = arith.constant 0 : index
    %c0_33 = arith.constant 0 : index
    %40 = vector.load %arg8[%c5, %c0_32, %c0_33] : memref<9x4x8xbf16, #tpu.memory_space<vmem>>, vector<1x4x8xbf16>
    %41 = vector.shape_cast %40 : vector<1x4x8xbf16> to vector<4x8xbf16>
    %cst_34 = arith.constant dense<0.000000e+00> : vector<72x8xf32>
    %42 = tpu.matmul %17, %41, %cst_34 {dimension_numbers = #tpu.dot_dimension_numbers<[1], [0], [0], [1], [0, 0, 1, 1], [], []>} : vector<72x4xbf16>, vector<4x8xbf16>, vector<72x8xf32> -> vector<72x8xf32>
    %43 = arith.addf %39, %42 : vector<72x8xf32>
    %c6 = arith.constant 6 : index
    %c0_35 = arith.constant 0 : index
    %c0_36 = arith.constant 0 : index
    %44 = vector.load %arg8[%c6, %c0_35, %c0_36] : memref<9x4x8xbf16, #tpu.memory_space<vmem>>, vector<1x4x8xbf16>
    %45 = vector.shape_cast %44 : vector<1x4x8xbf16> to vector<4x8xbf16>
    %cst_37 = arith.constant dense<0.000000e+00> : vector<72x8xf32>
    %46 = tpu.matmul %9, %45, %cst_37 {dimension_numbers = #tpu.dot_dimension_numbers<[1], [0], [0], [1], [0, 0, 1, 1], [], []>} : vector<72x4xbf16>, vector<4x8xbf16>, vector<72x8xf32> -> vector<72x8xf32>
    %47 = arith.addf %43, %46 : vector<72x8xf32>
    %c7 = arith.constant 7 : index
    %c0_38 = arith.constant 0 : index
    %c0_39 = arith.constant 0 : index
    %48 = vector.load %arg8[%c7, %c0_38, %c0_39] : memref<9x4x8xbf16, #tpu.memory_space<vmem>>, vector<1x4x8xbf16>
    %49 = vector.shape_cast %48 : vector<1x4x8xbf16> to vector<4x8xbf16>
    %cst_40 = arith.constant dense<0.000000e+00> : vector<72x8xf32>
    %50 = tpu.matmul %11, %49, %cst_40 {dimension_numbers = #tpu.dot_dimension_numbers<[1], [0], [0], [1], [0, 0, 1, 1], [], []>} : vector<72x4xbf16>, vector<4x8xbf16>, vector<72x8xf32> -> vector<72x8xf32>
    %51 = arith.addf %47, %50 : vector<72x8xf32>
    %c8 = arith.constant 8 : index
    %c0_41 = arith.constant 0 : index
    %c0_42 = arith.constant 0 : index
    %52 = vector.load %arg8[%c8, %c0_41, %c0_42] : memref<9x4x8xbf16, #tpu.memory_space<vmem>>, vector<1x4x8xbf16>
    %53 = vector.shape_cast %52 : vector<1x4x8xbf16> to vector<4x8xbf16>
    %cst_43 = arith.constant dense<0.000000e+00> : vector<72x8xf32>
    %54 = tpu.matmul %20, %53, %cst_43 {dimension_numbers = #tpu.dot_dimension_numbers<[1], [0], [0], [1], [0, 0, 1, 1], [], []>} : vector<72x4xbf16>, vector<4x8xbf16>, vector<72x8xf32> -> vector<72x8xf32>
    %55 = arith.addf %51, %54 : vector<72x8xf32>
    %c0_44 = arith.constant 0 : index
    %c0_45 = arith.constant 0 : index
    %56 = vector.load %arg9[%c0_44, %c0_45] : memref<1x8xf32, #tpu.memory_space<vmem>>, vector<1x8xf32>
    %57 = vector.broadcast %56 : vector<1x8xf32> to vector<72x8xf32>
    %58 = arith.addf %55, %57 : vector<72x8xf32>
    %cst_46 = arith.constant 0.000000e+00 : f32
    %59 = vector.broadcast %cst_46 : f32 to vector<72x8xf32>
    %60 = arith.maximumf %58, %59 : vector<72x8xf32>
    %61 = arith.truncf %60 : vector<72x8xf32> to vector<72x8xbf16>
    %c0_47 = arith.constant 0 : index
    %c0_48 = arith.constant 0 : index
    %c0_49 = arith.constant 0 : index
    %62 = vector.load %arg10[%c0_47, %c0_48, %c0_49] : memref<1x72x8xbf16, #tpu.memory_space<vmem>>, vector<1x72x8xbf16>
    %63 = vector.shape_cast %62 : vector<1x72x8xbf16> to vector<72x8xbf16>
    %64 = vector.shape_cast %61 : vector<72x8xbf16> to vector<1x72x8xbf16>
    tpu.vector_store %arg10[%c0_47, %c0_48, %c0_49], %64 {strides = array<i32>} : memref<1x72x8xbf16, #tpu.memory_space<vmem>>, vector<1x72x8xbf16>,
    return
  }
  func.func @transform_0(%arg0: i32, %arg1: i32) -> (i32, i32, i32) {
    %c0_i32 = arith.constant 0 : i32
    %c0_i32_0 = arith.constant 0 : i32
    return %arg0, %arg1, %c0_i32 : i32, i32, i32
  }
  func.func @transform_1(%arg0: i32, %arg1: i32) -> (i32, i32, i32) {
    %c0_i32 = arith.constant 0 : i32
    %c0_i32_0 = arith.constant 0 : i32
    return %arg0, %arg1, %c0_i32 : i32, i32, i32
  }
  func.func @transform_2(%arg0: i32, %arg1: i32) -> (i32, i32, i32) {
    %c0_i32 = arith.constant 0 : i32
    %c0_i32_0 = arith.constant 0 : i32
    return %arg0, %arg1, %c0_i32 : i32, i32, i32
  }
  func.func @transform_3(%arg0: i32, %arg1: i32) -> (i32, i32, i32) {
    %c0_i32 = arith.constant 0 : i32
    %c0_i32_0 = arith.constant 0 : i32
    return %arg0, %arg1, %c0_i32 : i32, i32, i32
  }
  func.func @transform_4(%arg0: i32, %arg1: i32) -> (i32, i32, i32) {
    %c0_i32 = arith.constant 0 : i32
    %c0_i32_0 = arith.constant 0 : i32
    return %arg0, %arg1, %c0_i32 : i32, i32, i32
  }
  func.func @transform_5(%arg0: i32, %arg1: i32) -> (i32, i32, i32) {
    %c0_i32 = arith.constant 0 : i32
    %c0_i32_0 = arith.constant 0 : i32
    return %arg0, %arg1, %c0_i32 : i32, i32, i32
  }
  func.func @transform_6(%arg0: i32, %arg1: i32) -> (i32, i32, i32) {
    %c0_i32 = arith.constant 0 : i32
    %c0_i32_0 = arith.constant 0 : i32
    %c0_i32_1 = arith.constant 0 : i32
    %c0_i32_2 = arith.constant 0 : i32
    return %c0_i32, %c0_i32_0, %c0_i32_1 : i32, i32, i32
  }
  func.func @transform_7(%arg0: i32, %arg1: i32) -> (i32, i32) {
    %c0_i32 = arith.constant 0 : i32
    %c0_i32_0 = arith.constant 0 : i32
    %c0_i32_1 = arith.constant 0 : i32
    return %c0_i32, %c0_i32_0 : i32, i32
  }
  func.func @transform_8(%arg0: i32, %arg1: i32) -> (i32, i32, i32) {
    %c0_i32 = arith.constant 0 : i32
    %c0_i32_0 = arith.constant 0 : i32
    return %arg0, %arg1, %c0_i32 : i32, i32, i32
  }
}

module attributes {stable_mosaic.version = 11 : i64} {
  func.func @_stage_kernel(%arg0: i32, %arg1: i32, %arg2: memref<1x20x8xbf16, #tpu.memory_space<vmem>>, %arg3: memref<1x20x8xbf16, #tpu.memory_space<vmem>>, %arg4: memref<1x20x8xbf16, #tpu.memory_space<vmem>>, %arg5: memref<1x20x8xbf16, #tpu.memory_space<vmem>>, %arg6: memref<1x20x8xbf16, #tpu.memory_space<vmem>>, %arg7: memref<1x20x8xbf16, #tpu.memory_space<vmem>>, %arg8: memref<9x8x16xbf16, #tpu.memory_space<vmem>>, %arg9: memref<1x16xf32, #tpu.memory_space<vmem>>, %arg10: memref<1x20x16xbf16, #tpu.memory_space<vmem>>) attributes {dimension_semantics = [#tpu.dimension_semantics<parallel>, #tpu.dimension_semantics<parallel>], iteration_bounds = array<i64: 2, 1>, scalar_prefetch = 0 : i64, scratch_operands = 0 : i64, tpu.core_type = #tpu.core_type<tc>, window_params = [{transform_indices = @transform_0, window_bounds = array<i64: 1, 20, 8>}, {transform_indices = @transform_1, window_bounds = array<i64: 1, 20, 8>}, {transform_indices = @transform_2, window_bounds = array<i64: 1, 20, 8>}, {transform_indices = @transform_3, window_bounds = array<i64: 1, 20, 8>}, {transform_indices = @transform_4, window_bounds = array<i64: 1, 20, 8>}, {transform_indices = @transform_5, window_bounds = array<i64: 1, 20, 8>}, {pipeline_mode = #tpu.pipeline_mode<synchronous>, transform_indices = @transform_6, window_bounds = array<i64: 9, 8, 16>}, {pipeline_mode = #tpu.pipeline_mode<synchronous>, transform_indices = @transform_7, window_bounds = array<i64: 1, 16>}, {transform_indices = @transform_8, window_bounds = array<i64: 1, 20, 16>}]} {
    %c0 = arith.constant 0 : index
    %c0_0 = arith.constant 0 : index
    %c0_1 = arith.constant 0 : index
    %0 = vector.load %arg2[%c0, %c0_0, %c0_1] : memref<1x20x8xbf16, #tpu.memory_space<vmem>>, vector<1x20x8xbf16>
    %1 = vector.shape_cast %0 : vector<1x20x8xbf16> to vector<20x8xbf16>
    %c0_2 = arith.constant 0 : index
    %c0_3 = arith.constant 0 : index
    %c0_4 = arith.constant 0 : index
    %2 = vector.load %arg3[%c0_2, %c0_3, %c0_4] : memref<1x20x8xbf16, #tpu.memory_space<vmem>>, vector<1x20x8xbf16>
    %3 = vector.shape_cast %2 : vector<1x20x8xbf16> to vector<20x8xbf16>
    %c0_5 = arith.constant 0 : index
    %c0_6 = arith.constant 0 : index
    %c0_7 = arith.constant 0 : index
    %4 = vector.load %arg4[%c0_5, %c0_6, %c0_7] : memref<1x20x8xbf16, #tpu.memory_space<vmem>>, vector<1x20x8xbf16>
    %5 = vector.shape_cast %4 : vector<1x20x8xbf16> to vector<20x8xbf16>
    %c0_8 = arith.constant 0 : index
    %c0_9 = arith.constant 0 : index
    %c0_10 = arith.constant 0 : index
    %6 = vector.load %arg5[%c0_8, %c0_9, %c0_10] : memref<1x20x8xbf16, #tpu.memory_space<vmem>>, vector<1x20x8xbf16>
    %7 = vector.shape_cast %6 : vector<1x20x8xbf16> to vector<20x8xbf16>
    %c0_11 = arith.constant 0 : index
    %c0_12 = arith.constant 0 : index
    %c0_13 = arith.constant 0 : index
    %8 = vector.load %arg6[%c0_11, %c0_12, %c0_13] : memref<1x20x8xbf16, #tpu.memory_space<vmem>>, vector<1x20x8xbf16>
    %9 = vector.shape_cast %8 : vector<1x20x8xbf16> to vector<20x8xbf16>
    %c0_14 = arith.constant 0 : index
    %c0_15 = arith.constant 0 : index
    %c0_16 = arith.constant 0 : index
    %10 = vector.load %arg7[%c0_14, %c0_15, %c0_16] : memref<1x20x8xbf16, #tpu.memory_space<vmem>>, vector<1x20x8xbf16>
    %11 = vector.shape_cast %10 : vector<1x20x8xbf16> to vector<20x8xbf16>
    %12 = vector.extract_strided_slice %1 {offsets = [1, 0], sizes = [19, 8], strides = [1, 1]} : vector<20x8xbf16> to vector<19x8xbf16>
    %13 = vector.extract_strided_slice %1 {offsets = [0, 0], sizes = [1, 8], strides = [1, 1]} : vector<20x8xbf16> to vector<1x8xbf16>
    %14 = tpu.concatenate %12, %13 in 0 : vector<19x8xbf16>, vector<1x8xbf16> -> vector<20x8xbf16>
    %15 = vector.extract_strided_slice %5 {offsets = [1, 0], sizes = [19, 8], strides = [1, 1]} : vector<20x8xbf16> to vector<19x8xbf16>
    %16 = vector.extract_strided_slice %5 {offsets = [0, 0], sizes = [1, 8], strides = [1, 1]} : vector<20x8xbf16> to vector<1x8xbf16>
    %17 = tpu.concatenate %15, %16 in 0 : vector<19x8xbf16>, vector<1x8xbf16> -> vector<20x8xbf16>
    %18 = vector.extract_strided_slice %9 {offsets = [1, 0], sizes = [19, 8], strides = [1, 1]} : vector<20x8xbf16> to vector<19x8xbf16>
    %19 = vector.extract_strided_slice %9 {offsets = [0, 0], sizes = [1, 8], strides = [1, 1]} : vector<20x8xbf16> to vector<1x8xbf16>
    %20 = tpu.concatenate %18, %19 in 0 : vector<19x8xbf16>, vector<1x8xbf16> -> vector<20x8xbf16>
    %c0_17 = arith.constant 0 : index
    %c0_18 = arith.constant 0 : index
    %c0_19 = arith.constant 0 : index
    %21 = vector.load %arg8[%c0_17, %c0_18, %c0_19] : memref<9x8x16xbf16, #tpu.memory_space<vmem>>, vector<1x8x16xbf16>
    %22 = vector.shape_cast %21 : vector<1x8x16xbf16> to vector<8x16xbf16>
    %cst = arith.constant dense<0.000000e+00> : vector<20x16xf32>
    %23 = tpu.matmul %1, %22, %cst {dimension_numbers = #tpu.dot_dimension_numbers<[1], [0], [0], [1], [0, 0, 1, 1], [], []>} : vector<20x8xbf16>, vector<8x16xbf16>, vector<20x16xf32> -> vector<20x16xf32>
    %c1 = arith.constant 1 : index
    %c0_20 = arith.constant 0 : index
    %c0_21 = arith.constant 0 : index
    %24 = vector.load %arg8[%c1, %c0_20, %c0_21] : memref<9x8x16xbf16, #tpu.memory_space<vmem>>, vector<1x8x16xbf16>
    %25 = vector.shape_cast %24 : vector<1x8x16xbf16> to vector<8x16xbf16>
    %cst_22 = arith.constant dense<0.000000e+00> : vector<20x16xf32>
    %26 = tpu.matmul %3, %25, %cst_22 {dimension_numbers = #tpu.dot_dimension_numbers<[1], [0], [0], [1], [0, 0, 1, 1], [], []>} : vector<20x8xbf16>, vector<8x16xbf16>, vector<20x16xf32> -> vector<20x16xf32>
    %27 = arith.addf %23, %26 : vector<20x16xf32>
    %c2 = arith.constant 2 : index
    %c0_23 = arith.constant 0 : index
    %c0_24 = arith.constant 0 : index
    %28 = vector.load %arg8[%c2, %c0_23, %c0_24] : memref<9x8x16xbf16, #tpu.memory_space<vmem>>, vector<1x8x16xbf16>
    %29 = vector.shape_cast %28 : vector<1x8x16xbf16> to vector<8x16xbf16>
    %cst_25 = arith.constant dense<0.000000e+00> : vector<20x16xf32>
    %30 = tpu.matmul %14, %29, %cst_25 {dimension_numbers = #tpu.dot_dimension_numbers<[1], [0], [0], [1], [0, 0, 1, 1], [], []>} : vector<20x8xbf16>, vector<8x16xbf16>, vector<20x16xf32> -> vector<20x16xf32>
    %31 = arith.addf %27, %30 : vector<20x16xf32>
    %c3 = arith.constant 3 : index
    %c0_26 = arith.constant 0 : index
    %c0_27 = arith.constant 0 : index
    %32 = vector.load %arg8[%c3, %c0_26, %c0_27] : memref<9x8x16xbf16, #tpu.memory_space<vmem>>, vector<1x8x16xbf16>
    %33 = vector.shape_cast %32 : vector<1x8x16xbf16> to vector<8x16xbf16>
    %cst_28 = arith.constant dense<0.000000e+00> : vector<20x16xf32>
    %34 = tpu.matmul %5, %33, %cst_28 {dimension_numbers = #tpu.dot_dimension_numbers<[1], [0], [0], [1], [0, 0, 1, 1], [], []>} : vector<20x8xbf16>, vector<8x16xbf16>, vector<20x16xf32> -> vector<20x16xf32>
    %35 = arith.addf %31, %34 : vector<20x16xf32>
    %c4 = arith.constant 4 : index
    %c0_29 = arith.constant 0 : index
    %c0_30 = arith.constant 0 : index
    %36 = vector.load %arg8[%c4, %c0_29, %c0_30] : memref<9x8x16xbf16, #tpu.memory_space<vmem>>, vector<1x8x16xbf16>
    %37 = vector.shape_cast %36 : vector<1x8x16xbf16> to vector<8x16xbf16>
    %cst_31 = arith.constant dense<0.000000e+00> : vector<20x16xf32>
    %38 = tpu.matmul %7, %37, %cst_31 {dimension_numbers = #tpu.dot_dimension_numbers<[1], [0], [0], [1], [0, 0, 1, 1], [], []>} : vector<20x8xbf16>, vector<8x16xbf16>, vector<20x16xf32> -> vector<20x16xf32>
    %39 = arith.addf %35, %38 : vector<20x16xf32>
    %c5 = arith.constant 5 : index
    %c0_32 = arith.constant 0 : index
    %c0_33 = arith.constant 0 : index
    %40 = vector.load %arg8[%c5, %c0_32, %c0_33] : memref<9x8x16xbf16, #tpu.memory_space<vmem>>, vector<1x8x16xbf16>
    %41 = vector.shape_cast %40 : vector<1x8x16xbf16> to vector<8x16xbf16>
    %cst_34 = arith.constant dense<0.000000e+00> : vector<20x16xf32>
    %42 = tpu.matmul %17, %41, %cst_34 {dimension_numbers = #tpu.dot_dimension_numbers<[1], [0], [0], [1], [0, 0, 1, 1], [], []>} : vector<20x8xbf16>, vector<8x16xbf16>, vector<20x16xf32> -> vector<20x16xf32>
    %43 = arith.addf %39, %42 : vector<20x16xf32>
    %c6 = arith.constant 6 : index
    %c0_35 = arith.constant 0 : index
    %c0_36 = arith.constant 0 : index
    %44 = vector.load %arg8[%c6, %c0_35, %c0_36] : memref<9x8x16xbf16, #tpu.memory_space<vmem>>, vector<1x8x16xbf16>
    %45 = vector.shape_cast %44 : vector<1x8x16xbf16> to vector<8x16xbf16>
    %cst_37 = arith.constant dense<0.000000e+00> : vector<20x16xf32>
    %46 = tpu.matmul %9, %45, %cst_37 {dimension_numbers = #tpu.dot_dimension_numbers<[1], [0], [0], [1], [0, 0, 1, 1], [], []>} : vector<20x8xbf16>, vector<8x16xbf16>, vector<20x16xf32> -> vector<20x16xf32>
    %47 = arith.addf %43, %46 : vector<20x16xf32>
    %c7 = arith.constant 7 : index
    %c0_38 = arith.constant 0 : index
    %c0_39 = arith.constant 0 : index
    %48 = vector.load %arg8[%c7, %c0_38, %c0_39] : memref<9x8x16xbf16, #tpu.memory_space<vmem>>, vector<1x8x16xbf16>
    %49 = vector.shape_cast %48 : vector<1x8x16xbf16> to vector<8x16xbf16>
    %cst_40 = arith.constant dense<0.000000e+00> : vector<20x16xf32>
    %50 = tpu.matmul %11, %49, %cst_40 {dimension_numbers = #tpu.dot_dimension_numbers<[1], [0], [0], [1], [0, 0, 1, 1], [], []>} : vector<20x8xbf16>, vector<8x16xbf16>, vector<20x16xf32> -> vector<20x16xf32>
    %51 = arith.addf %47, %50 : vector<20x16xf32>
    %c8 = arith.constant 8 : index
    %c0_41 = arith.constant 0 : index
    %c0_42 = arith.constant 0 : index
    %52 = vector.load %arg8[%c8, %c0_41, %c0_42] : memref<9x8x16xbf16, #tpu.memory_space<vmem>>, vector<1x8x16xbf16>
    %53 = vector.shape_cast %52 : vector<1x8x16xbf16> to vector<8x16xbf16>
    %cst_43 = arith.constant dense<0.000000e+00> : vector<20x16xf32>
    %54 = tpu.matmul %20, %53, %cst_43 {dimension_numbers = #tpu.dot_dimension_numbers<[1], [0], [0], [1], [0, 0, 1, 1], [], []>} : vector<20x8xbf16>, vector<8x16xbf16>, vector<20x16xf32> -> vector<20x16xf32>
    %55 = arith.addf %51, %54 : vector<20x16xf32>
    %c0_44 = arith.constant 0 : index
    %c0_45 = arith.constant 0 : index
    %56 = vector.load %arg9[%c0_44, %c0_45] : memref<1x16xf32, #tpu.memory_space<vmem>>, vector<1x16xf32>
    %57 = vector.broadcast %56 : vector<1x16xf32> to vector<20x16xf32>
    %58 = arith.addf %55, %57 : vector<20x16xf32>
    %cst_46 = arith.constant 0.000000e+00 : f32
    %59 = vector.broadcast %cst_46 : f32 to vector<20x16xf32>
    %60 = arith.maximumf %58, %59 : vector<20x16xf32>
    %61 = arith.truncf %60 : vector<20x16xf32> to vector<20x16xbf16>
    %c0_47 = arith.constant 0 : index
    %c0_48 = arith.constant 0 : index
    %c0_49 = arith.constant 0 : index
    %62 = vector.load %arg10[%c0_47, %c0_48, %c0_49] : memref<1x20x16xbf16, #tpu.memory_space<vmem>>, vector<1x20x16xbf16>
    %63 = vector.shape_cast %62 : vector<1x20x16xbf16> to vector<20x16xbf16>
    %64 = vector.shape_cast %61 : vector<20x16xbf16> to vector<1x20x16xbf16>
    tpu.vector_store %arg10[%c0_47, %c0_48, %c0_49], %64 {strides = array<i32>} : memref<1x20x16xbf16, #tpu.memory_space<vmem>>, vector<1x20x16xbf16>,
    return
  }
  func.func @transform_0(%arg0: i32, %arg1: i32) -> (i32, i32, i32) {
    %c0_i32 = arith.constant 0 : i32
    %c0_i32_0 = arith.constant 0 : i32
    return %arg0, %arg1, %c0_i32 : i32, i32, i32
  }
  func.func @transform_1(%arg0: i32, %arg1: i32) -> (i32, i32, i32) {
    %c0_i32 = arith.constant 0 : i32
    %c0_i32_0 = arith.constant 0 : i32
    return %arg0, %arg1, %c0_i32 : i32, i32, i32
  }
  func.func @transform_2(%arg0: i32, %arg1: i32) -> (i32, i32, i32) {
    %c0_i32 = arith.constant 0 : i32
    %c0_i32_0 = arith.constant 0 : i32
    return %arg0, %arg1, %c0_i32 : i32, i32, i32
  }
  func.func @transform_3(%arg0: i32, %arg1: i32) -> (i32, i32, i32) {
    %c0_i32 = arith.constant 0 : i32
    %c0_i32_0 = arith.constant 0 : i32
    return %arg0, %arg1, %c0_i32 : i32, i32, i32
  }
  func.func @transform_4(%arg0: i32, %arg1: i32) -> (i32, i32, i32) {
    %c0_i32 = arith.constant 0 : i32
    %c0_i32_0 = arith.constant 0 : i32
    return %arg0, %arg1, %c0_i32 : i32, i32, i32
  }
  func.func @transform_5(%arg0: i32, %arg1: i32) -> (i32, i32, i32) {
    %c0_i32 = arith.constant 0 : i32
    %c0_i32_0 = arith.constant 0 : i32
    return %arg0, %arg1, %c0_i32 : i32, i32, i32
  }
  func.func @transform_6(%arg0: i32, %arg1: i32) -> (i32, i32, i32) {
    %c0_i32 = arith.constant 0 : i32
    %c0_i32_0 = arith.constant 0 : i32
    %c0_i32_1 = arith.constant 0 : i32
    %c0_i32_2 = arith.constant 0 : i32
    return %c0_i32, %c0_i32_0, %c0_i32_1 : i32, i32, i32
  }
  func.func @transform_7(%arg0: i32, %arg1: i32) -> (i32, i32) {
    %c0_i32 = arith.constant 0 : i32
    %c0_i32_0 = arith.constant 0 : i32
    %c0_i32_1 = arith.constant 0 : i32
    return %c0_i32, %c0_i32_0 : i32, i32
  }
  func.func @transform_8(%arg0: i32, %arg1: i32) -> (i32, i32, i32) {
    %c0_i32 = arith.constant 0 : i32
    %c0_i32_0 = arith.constant 0 : i32
    return %arg0, %arg1, %c0_i32 : i32, i32, i32
  }
}

module attributes {stable_mosaic.version = 11 : i64} {
  func.func @_stage_kernel(%arg0: i32, %arg1: i32, %arg2: memref<1x6x16xbf16, #tpu.memory_space<vmem>>, %arg3: memref<1x6x16xbf16, #tpu.memory_space<vmem>>, %arg4: memref<1x6x16xbf16, #tpu.memory_space<vmem>>, %arg5: memref<1x6x16xbf16, #tpu.memory_space<vmem>>, %arg6: memref<1x6x16xbf16, #tpu.memory_space<vmem>>, %arg7: memref<1x6x16xbf16, #tpu.memory_space<vmem>>, %arg8: memref<9x16x32xbf16, #tpu.memory_space<vmem>>, %arg9: memref<1x32xf32, #tpu.memory_space<vmem>>, %arg10: memref<1x6x32xbf16, #tpu.memory_space<vmem>>) attributes {dimension_semantics = [#tpu.dimension_semantics<parallel>, #tpu.dimension_semantics<parallel>], iteration_bounds = array<i64: 2, 1>, scalar_prefetch = 0 : i64, scratch_operands = 0 : i64, tpu.core_type = #tpu.core_type<tc>, window_params = [{transform_indices = @transform_0, window_bounds = array<i64: 1, 6, 16>}, {transform_indices = @transform_1, window_bounds = array<i64: 1, 6, 16>}, {transform_indices = @transform_2, window_bounds = array<i64: 1, 6, 16>}, {transform_indices = @transform_3, window_bounds = array<i64: 1, 6, 16>}, {transform_indices = @transform_4, window_bounds = array<i64: 1, 6, 16>}, {transform_indices = @transform_5, window_bounds = array<i64: 1, 6, 16>}, {pipeline_mode = #tpu.pipeline_mode<synchronous>, transform_indices = @transform_6, window_bounds = array<i64: 9, 16, 32>}, {pipeline_mode = #tpu.pipeline_mode<synchronous>, transform_indices = @transform_7, window_bounds = array<i64: 1, 32>}, {transform_indices = @transform_8, window_bounds = array<i64: 1, 6, 32>}]} {
    %c0 = arith.constant 0 : index
    %c0_0 = arith.constant 0 : index
    %c0_1 = arith.constant 0 : index
    %0 = vector.load %arg2[%c0, %c0_0, %c0_1] : memref<1x6x16xbf16, #tpu.memory_space<vmem>>, vector<1x6x16xbf16>
    %1 = vector.shape_cast %0 : vector<1x6x16xbf16> to vector<6x16xbf16>
    %c0_2 = arith.constant 0 : index
    %c0_3 = arith.constant 0 : index
    %c0_4 = arith.constant 0 : index
    %2 = vector.load %arg3[%c0_2, %c0_3, %c0_4] : memref<1x6x16xbf16, #tpu.memory_space<vmem>>, vector<1x6x16xbf16>
    %3 = vector.shape_cast %2 : vector<1x6x16xbf16> to vector<6x16xbf16>
    %c0_5 = arith.constant 0 : index
    %c0_6 = arith.constant 0 : index
    %c0_7 = arith.constant 0 : index
    %4 = vector.load %arg4[%c0_5, %c0_6, %c0_7] : memref<1x6x16xbf16, #tpu.memory_space<vmem>>, vector<1x6x16xbf16>
    %5 = vector.shape_cast %4 : vector<1x6x16xbf16> to vector<6x16xbf16>
    %c0_8 = arith.constant 0 : index
    %c0_9 = arith.constant 0 : index
    %c0_10 = arith.constant 0 : index
    %6 = vector.load %arg5[%c0_8, %c0_9, %c0_10] : memref<1x6x16xbf16, #tpu.memory_space<vmem>>, vector<1x6x16xbf16>
    %7 = vector.shape_cast %6 : vector<1x6x16xbf16> to vector<6x16xbf16>
    %c0_11 = arith.constant 0 : index
    %c0_12 = arith.constant 0 : index
    %c0_13 = arith.constant 0 : index
    %8 = vector.load %arg6[%c0_11, %c0_12, %c0_13] : memref<1x6x16xbf16, #tpu.memory_space<vmem>>, vector<1x6x16xbf16>
    %9 = vector.shape_cast %8 : vector<1x6x16xbf16> to vector<6x16xbf16>
    %c0_14 = arith.constant 0 : index
    %c0_15 = arith.constant 0 : index
    %c0_16 = arith.constant 0 : index
    %10 = vector.load %arg7[%c0_14, %c0_15, %c0_16] : memref<1x6x16xbf16, #tpu.memory_space<vmem>>, vector<1x6x16xbf16>
    %11 = vector.shape_cast %10 : vector<1x6x16xbf16> to vector<6x16xbf16>
    %12 = vector.extract_strided_slice %1 {offsets = [1, 0], sizes = [5, 16], strides = [1, 1]} : vector<6x16xbf16> to vector<5x16xbf16>
    %13 = vector.extract_strided_slice %1 {offsets = [0, 0], sizes = [1, 16], strides = [1, 1]} : vector<6x16xbf16> to vector<1x16xbf16>
    %14 = tpu.concatenate %12, %13 in 0 : vector<5x16xbf16>, vector<1x16xbf16> -> vector<6x16xbf16>
    %15 = vector.extract_strided_slice %5 {offsets = [1, 0], sizes = [5, 16], strides = [1, 1]} : vector<6x16xbf16> to vector<5x16xbf16>
    %16 = vector.extract_strided_slice %5 {offsets = [0, 0], sizes = [1, 16], strides = [1, 1]} : vector<6x16xbf16> to vector<1x16xbf16>
    %17 = tpu.concatenate %15, %16 in 0 : vector<5x16xbf16>, vector<1x16xbf16> -> vector<6x16xbf16>
    %18 = vector.extract_strided_slice %9 {offsets = [1, 0], sizes = [5, 16], strides = [1, 1]} : vector<6x16xbf16> to vector<5x16xbf16>
    %19 = vector.extract_strided_slice %9 {offsets = [0, 0], sizes = [1, 16], strides = [1, 1]} : vector<6x16xbf16> to vector<1x16xbf16>
    %20 = tpu.concatenate %18, %19 in 0 : vector<5x16xbf16>, vector<1x16xbf16> -> vector<6x16xbf16>
    %c0_17 = arith.constant 0 : index
    %c0_18 = arith.constant 0 : index
    %c0_19 = arith.constant 0 : index
    %21 = vector.load %arg8[%c0_17, %c0_18, %c0_19] : memref<9x16x32xbf16, #tpu.memory_space<vmem>>, vector<1x16x32xbf16>
    %22 = vector.shape_cast %21 : vector<1x16x32xbf16> to vector<16x32xbf16>
    %cst = arith.constant dense<0.000000e+00> : vector<6x32xf32>
    %23 = tpu.matmul %1, %22, %cst {dimension_numbers = #tpu.dot_dimension_numbers<[1], [0], [0], [1], [0, 0, 1, 1], [], []>} : vector<6x16xbf16>, vector<16x32xbf16>, vector<6x32xf32> -> vector<6x32xf32>
    %c1 = arith.constant 1 : index
    %c0_20 = arith.constant 0 : index
    %c0_21 = arith.constant 0 : index
    %24 = vector.load %arg8[%c1, %c0_20, %c0_21] : memref<9x16x32xbf16, #tpu.memory_space<vmem>>, vector<1x16x32xbf16>
    %25 = vector.shape_cast %24 : vector<1x16x32xbf16> to vector<16x32xbf16>
    %cst_22 = arith.constant dense<0.000000e+00> : vector<6x32xf32>
    %26 = tpu.matmul %3, %25, %cst_22 {dimension_numbers = #tpu.dot_dimension_numbers<[1], [0], [0], [1], [0, 0, 1, 1], [], []>} : vector<6x16xbf16>, vector<16x32xbf16>, vector<6x32xf32> -> vector<6x32xf32>
    %27 = arith.addf %23, %26 : vector<6x32xf32>
    %c2 = arith.constant 2 : index
    %c0_23 = arith.constant 0 : index
    %c0_24 = arith.constant 0 : index
    %28 = vector.load %arg8[%c2, %c0_23, %c0_24] : memref<9x16x32xbf16, #tpu.memory_space<vmem>>, vector<1x16x32xbf16>
    %29 = vector.shape_cast %28 : vector<1x16x32xbf16> to vector<16x32xbf16>
    %cst_25 = arith.constant dense<0.000000e+00> : vector<6x32xf32>
    %30 = tpu.matmul %14, %29, %cst_25 {dimension_numbers = #tpu.dot_dimension_numbers<[1], [0], [0], [1], [0, 0, 1, 1], [], []>} : vector<6x16xbf16>, vector<16x32xbf16>, vector<6x32xf32> -> vector<6x32xf32>
    %31 = arith.addf %27, %30 : vector<6x32xf32>
    %c3 = arith.constant 3 : index
    %c0_26 = arith.constant 0 : index
    %c0_27 = arith.constant 0 : index
    %32 = vector.load %arg8[%c3, %c0_26, %c0_27] : memref<9x16x32xbf16, #tpu.memory_space<vmem>>, vector<1x16x32xbf16>
    %33 = vector.shape_cast %32 : vector<1x16x32xbf16> to vector<16x32xbf16>
    %cst_28 = arith.constant dense<0.000000e+00> : vector<6x32xf32>
    %34 = tpu.matmul %5, %33, %cst_28 {dimension_numbers = #tpu.dot_dimension_numbers<[1], [0], [0], [1], [0, 0, 1, 1], [], []>} : vector<6x16xbf16>, vector<16x32xbf16>, vector<6x32xf32> -> vector<6x32xf32>
    %35 = arith.addf %31, %34 : vector<6x32xf32>
    %c4 = arith.constant 4 : index
    %c0_29 = arith.constant 0 : index
    %c0_30 = arith.constant 0 : index
    %36 = vector.load %arg8[%c4, %c0_29, %c0_30] : memref<9x16x32xbf16, #tpu.memory_space<vmem>>, vector<1x16x32xbf16>
    %37 = vector.shape_cast %36 : vector<1x16x32xbf16> to vector<16x32xbf16>
    %cst_31 = arith.constant dense<0.000000e+00> : vector<6x32xf32>
    %38 = tpu.matmul %7, %37, %cst_31 {dimension_numbers = #tpu.dot_dimension_numbers<[1], [0], [0], [1], [0, 0, 1, 1], [], []>} : vector<6x16xbf16>, vector<16x32xbf16>, vector<6x32xf32> -> vector<6x32xf32>
    %39 = arith.addf %35, %38 : vector<6x32xf32>
    %c5 = arith.constant 5 : index
    %c0_32 = arith.constant 0 : index
    %c0_33 = arith.constant 0 : index
    %40 = vector.load %arg8[%c5, %c0_32, %c0_33] : memref<9x16x32xbf16, #tpu.memory_space<vmem>>, vector<1x16x32xbf16>
    %41 = vector.shape_cast %40 : vector<1x16x32xbf16> to vector<16x32xbf16>
    %cst_34 = arith.constant dense<0.000000e+00> : vector<6x32xf32>
    %42 = tpu.matmul %17, %41, %cst_34 {dimension_numbers = #tpu.dot_dimension_numbers<[1], [0], [0], [1], [0, 0, 1, 1], [], []>} : vector<6x16xbf16>, vector<16x32xbf16>, vector<6x32xf32> -> vector<6x32xf32>
    %43 = arith.addf %39, %42 : vector<6x32xf32>
    %c6 = arith.constant 6 : index
    %c0_35 = arith.constant 0 : index
    %c0_36 = arith.constant 0 : index
    %44 = vector.load %arg8[%c6, %c0_35, %c0_36] : memref<9x16x32xbf16, #tpu.memory_space<vmem>>, vector<1x16x32xbf16>
    %45 = vector.shape_cast %44 : vector<1x16x32xbf16> to vector<16x32xbf16>
    %cst_37 = arith.constant dense<0.000000e+00> : vector<6x32xf32>
    %46 = tpu.matmul %9, %45, %cst_37 {dimension_numbers = #tpu.dot_dimension_numbers<[1], [0], [0], [1], [0, 0, 1, 1], [], []>} : vector<6x16xbf16>, vector<16x32xbf16>, vector<6x32xf32> -> vector<6x32xf32>
    %47 = arith.addf %43, %46 : vector<6x32xf32>
    %c7 = arith.constant 7 : index
    %c0_38 = arith.constant 0 : index
    %c0_39 = arith.constant 0 : index
    %48 = vector.load %arg8[%c7, %c0_38, %c0_39] : memref<9x16x32xbf16, #tpu.memory_space<vmem>>, vector<1x16x32xbf16>
    %49 = vector.shape_cast %48 : vector<1x16x32xbf16> to vector<16x32xbf16>
    %cst_40 = arith.constant dense<0.000000e+00> : vector<6x32xf32>
    %50 = tpu.matmul %11, %49, %cst_40 {dimension_numbers = #tpu.dot_dimension_numbers<[1], [0], [0], [1], [0, 0, 1, 1], [], []>} : vector<6x16xbf16>, vector<16x32xbf16>, vector<6x32xf32> -> vector<6x32xf32>
    %51 = arith.addf %47, %50 : vector<6x32xf32>
    %c8 = arith.constant 8 : index
    %c0_41 = arith.constant 0 : index
    %c0_42 = arith.constant 0 : index
    %52 = vector.load %arg8[%c8, %c0_41, %c0_42] : memref<9x16x32xbf16, #tpu.memory_space<vmem>>, vector<1x16x32xbf16>
    %53 = vector.shape_cast %52 : vector<1x16x32xbf16> to vector<16x32xbf16>
    %cst_43 = arith.constant dense<0.000000e+00> : vector<6x32xf32>
    %54 = tpu.matmul %20, %53, %cst_43 {dimension_numbers = #tpu.dot_dimension_numbers<[1], [0], [0], [1], [0, 0, 1, 1], [], []>} : vector<6x16xbf16>, vector<16x32xbf16>, vector<6x32xf32> -> vector<6x32xf32>
    %55 = arith.addf %51, %54 : vector<6x32xf32>
    %c0_44 = arith.constant 0 : index
    %c0_45 = arith.constant 0 : index
    %56 = vector.load %arg9[%c0_44, %c0_45] : memref<1x32xf32, #tpu.memory_space<vmem>>, vector<1x32xf32>
    %57 = vector.broadcast %56 : vector<1x32xf32> to vector<6x32xf32>
    %58 = arith.addf %55, %57 : vector<6x32xf32>
    %cst_46 = arith.constant 0.000000e+00 : f32
    %59 = vector.broadcast %cst_46 : f32 to vector<6x32xf32>
    %60 = arith.maximumf %58, %59 : vector<6x32xf32>
    %61 = arith.truncf %60 : vector<6x32xf32> to vector<6x32xbf16>
    %c0_47 = arith.constant 0 : index
    %c0_48 = arith.constant 0 : index
    %c0_49 = arith.constant 0 : index
    %62 = vector.load %arg10[%c0_47, %c0_48, %c0_49] : memref<1x6x32xbf16, #tpu.memory_space<vmem>>, vector<1x6x32xbf16>
    %63 = vector.shape_cast %62 : vector<1x6x32xbf16> to vector<6x32xbf16>
    %64 = vector.shape_cast %61 : vector<6x32xbf16> to vector<1x6x32xbf16>
    tpu.vector_store %arg10[%c0_47, %c0_48, %c0_49], %64 {strides = array<i32>} : memref<1x6x32xbf16, #tpu.memory_space<vmem>>, vector<1x6x32xbf16>,
    return
  }
  func.func @transform_0(%arg0: i32, %arg1: i32) -> (i32, i32, i32) {
    %c0_i32 = arith.constant 0 : i32
    %c0_i32_0 = arith.constant 0 : i32
    return %arg0, %arg1, %c0_i32 : i32, i32, i32
  }
  func.func @transform_1(%arg0: i32, %arg1: i32) -> (i32, i32, i32) {
    %c0_i32 = arith.constant 0 : i32
    %c0_i32_0 = arith.constant 0 : i32
    return %arg0, %arg1, %c0_i32 : i32, i32, i32
  }
  func.func @transform_2(%arg0: i32, %arg1: i32) -> (i32, i32, i32) {
    %c0_i32 = arith.constant 0 : i32
    %c0_i32_0 = arith.constant 0 : i32
    return %arg0, %arg1, %c0_i32 : i32, i32, i32
  }
  func.func @transform_3(%arg0: i32, %arg1: i32) -> (i32, i32, i32) {
    %c0_i32 = arith.constant 0 : i32
    %c0_i32_0 = arith.constant 0 : i32
    return %arg0, %arg1, %c0_i32 : i32, i32, i32
  }
  func.func @transform_4(%arg0: i32, %arg1: i32) -> (i32, i32, i32) {
    %c0_i32 = arith.constant 0 : i32
    %c0_i32_0 = arith.constant 0 : i32
    return %arg0, %arg1, %c0_i32 : i32, i32, i32
  }
  func.func @transform_5(%arg0: i32, %arg1: i32) -> (i32, i32, i32) {
    %c0_i32 = arith.constant 0 : i32
    %c0_i32_0 = arith.constant 0 : i32
    return %arg0, %arg1, %c0_i32 : i32, i32, i32
  }
  func.func @transform_6(%arg0: i32, %arg1: i32) -> (i32, i32, i32) {
    %c0_i32 = arith.constant 0 : i32
    %c0_i32_0 = arith.constant 0 : i32
    %c0_i32_1 = arith.constant 0 : i32
    %c0_i32_2 = arith.constant 0 : i32
    return %c0_i32, %c0_i32_0, %c0_i32_1 : i32, i32, i32
  }
  func.func @transform_7(%arg0: i32, %arg1: i32) -> (i32, i32) {
    %c0_i32 = arith.constant 0 : i32
    %c0_i32_0 = arith.constant 0 : i32
    %c0_i32_1 = arith.constant 0 : i32
    return %c0_i32, %c0_i32_0 : i32, i32
  }
  func.func @transform_8(%arg0: i32, %arg1: i32) -> (i32, i32, i32) {
    %c0_i32 = arith.constant 0 : i32
    %c0_i32_0 = arith.constant 0 : i32
    return %arg0, %arg1, %c0_i32 : i32, i32, i32
  }
}

module attributes {stable_mosaic.version = 11 : i64} {
  func.func @_stage_kernel(%arg0: i32, %arg1: i32, %arg2: memref<1x2x32xbf16, #tpu.memory_space<vmem>>, %arg3: memref<1x2x32xbf16, #tpu.memory_space<vmem>>, %arg4: memref<1x2x32xbf16, #tpu.memory_space<vmem>>, %arg5: memref<1x2x32xbf16, #tpu.memory_space<vmem>>, %arg6: memref<1x2x32xbf16, #tpu.memory_space<vmem>>, %arg7: memref<1x2x32xbf16, #tpu.memory_space<vmem>>, %arg8: memref<9x32x32xbf16, #tpu.memory_space<vmem>>, %arg9: memref<1x32xf32, #tpu.memory_space<vmem>>, %arg10: memref<1x2x32xbf16, #tpu.memory_space<vmem>>) attributes {dimension_semantics = [#tpu.dimension_semantics<parallel>, #tpu.dimension_semantics<parallel>], iteration_bounds = array<i64: 2, 1>, scalar_prefetch = 0 : i64, scratch_operands = 0 : i64, tpu.core_type = #tpu.core_type<tc>, window_params = [{transform_indices = @transform_0, window_bounds = array<i64: 1, 2, 32>}, {transform_indices = @transform_1, window_bounds = array<i64: 1, 2, 32>}, {transform_indices = @transform_2, window_bounds = array<i64: 1, 2, 32>}, {transform_indices = @transform_3, window_bounds = array<i64: 1, 2, 32>}, {transform_indices = @transform_4, window_bounds = array<i64: 1, 2, 32>}, {transform_indices = @transform_5, window_bounds = array<i64: 1, 2, 32>}, {pipeline_mode = #tpu.pipeline_mode<synchronous>, transform_indices = @transform_6, window_bounds = array<i64: 9, 32, 32>}, {pipeline_mode = #tpu.pipeline_mode<synchronous>, transform_indices = @transform_7, window_bounds = array<i64: 1, 32>}, {transform_indices = @transform_8, window_bounds = array<i64: 1, 2, 32>}]} {
    %c0 = arith.constant 0 : index
    %c0_0 = arith.constant 0 : index
    %c0_1 = arith.constant 0 : index
    %0 = vector.load %arg2[%c0, %c0_0, %c0_1] : memref<1x2x32xbf16, #tpu.memory_space<vmem>>, vector<1x2x32xbf16>
    %1 = vector.shape_cast %0 : vector<1x2x32xbf16> to vector<2x32xbf16>
    %c0_2 = arith.constant 0 : index
    %c0_3 = arith.constant 0 : index
    %c0_4 = arith.constant 0 : index
    %2 = vector.load %arg3[%c0_2, %c0_3, %c0_4] : memref<1x2x32xbf16, #tpu.memory_space<vmem>>, vector<1x2x32xbf16>
    %3 = vector.shape_cast %2 : vector<1x2x32xbf16> to vector<2x32xbf16>
    %c0_5 = arith.constant 0 : index
    %c0_6 = arith.constant 0 : index
    %c0_7 = arith.constant 0 : index
    %4 = vector.load %arg4[%c0_5, %c0_6, %c0_7] : memref<1x2x32xbf16, #tpu.memory_space<vmem>>, vector<1x2x32xbf16>
    %5 = vector.shape_cast %4 : vector<1x2x32xbf16> to vector<2x32xbf16>
    %c0_8 = arith.constant 0 : index
    %c0_9 = arith.constant 0 : index
    %c0_10 = arith.constant 0 : index
    %6 = vector.load %arg5[%c0_8, %c0_9, %c0_10] : memref<1x2x32xbf16, #tpu.memory_space<vmem>>, vector<1x2x32xbf16>
    %7 = vector.shape_cast %6 : vector<1x2x32xbf16> to vector<2x32xbf16>
    %c0_11 = arith.constant 0 : index
    %c0_12 = arith.constant 0 : index
    %c0_13 = arith.constant 0 : index
    %8 = vector.load %arg6[%c0_11, %c0_12, %c0_13] : memref<1x2x32xbf16, #tpu.memory_space<vmem>>, vector<1x2x32xbf16>
    %9 = vector.shape_cast %8 : vector<1x2x32xbf16> to vector<2x32xbf16>
    %c0_14 = arith.constant 0 : index
    %c0_15 = arith.constant 0 : index
    %c0_16 = arith.constant 0 : index
    %10 = vector.load %arg7[%c0_14, %c0_15, %c0_16] : memref<1x2x32xbf16, #tpu.memory_space<vmem>>, vector<1x2x32xbf16>
    %11 = vector.shape_cast %10 : vector<1x2x32xbf16> to vector<2x32xbf16>
    %12 = vector.extract_strided_slice %1 {offsets = [1, 0], sizes = [1, 32], strides = [1, 1]} : vector<2x32xbf16> to vector<1x32xbf16>
    %13 = vector.extract_strided_slice %1 {offsets = [0, 0], sizes = [1, 32], strides = [1, 1]} : vector<2x32xbf16> to vector<1x32xbf16>
    %14 = tpu.concatenate %12, %13 in 0 : vector<1x32xbf16>, vector<1x32xbf16> -> vector<2x32xbf16>
    %15 = vector.extract_strided_slice %5 {offsets = [1, 0], sizes = [1, 32], strides = [1, 1]} : vector<2x32xbf16> to vector<1x32xbf16>
    %16 = vector.extract_strided_slice %5 {offsets = [0, 0], sizes = [1, 32], strides = [1, 1]} : vector<2x32xbf16> to vector<1x32xbf16>
    %17 = tpu.concatenate %15, %16 in 0 : vector<1x32xbf16>, vector<1x32xbf16> -> vector<2x32xbf16>
    %18 = vector.extract_strided_slice %9 {offsets = [1, 0], sizes = [1, 32], strides = [1, 1]} : vector<2x32xbf16> to vector<1x32xbf16>
    %19 = vector.extract_strided_slice %9 {offsets = [0, 0], sizes = [1, 32], strides = [1, 1]} : vector<2x32xbf16> to vector<1x32xbf16>
    %20 = tpu.concatenate %18, %19 in 0 : vector<1x32xbf16>, vector<1x32xbf16> -> vector<2x32xbf16>
    %c0_17 = arith.constant 0 : index
    %c0_18 = arith.constant 0 : index
    %c0_19 = arith.constant 0 : index
    %21 = vector.load %arg8[%c0_17, %c0_18, %c0_19] : memref<9x32x32xbf16, #tpu.memory_space<vmem>>, vector<1x32x32xbf16>
    %22 = vector.shape_cast %21 : vector<1x32x32xbf16> to vector<32x32xbf16>
    %cst = arith.constant dense<0.000000e+00> : vector<2x32xf32>
    %23 = tpu.matmul %1, %22, %cst {dimension_numbers = #tpu.dot_dimension_numbers<[1], [0], [0], [1], [0, 0, 1, 1], [], []>} : vector<2x32xbf16>, vector<32x32xbf16>, vector<2x32xf32> -> vector<2x32xf32>
    %c1 = arith.constant 1 : index
    %c0_20 = arith.constant 0 : index
    %c0_21 = arith.constant 0 : index
    %24 = vector.load %arg8[%c1, %c0_20, %c0_21] : memref<9x32x32xbf16, #tpu.memory_space<vmem>>, vector<1x32x32xbf16>
    %25 = vector.shape_cast %24 : vector<1x32x32xbf16> to vector<32x32xbf16>
    %cst_22 = arith.constant dense<0.000000e+00> : vector<2x32xf32>
    %26 = tpu.matmul %3, %25, %cst_22 {dimension_numbers = #tpu.dot_dimension_numbers<[1], [0], [0], [1], [0, 0, 1, 1], [], []>} : vector<2x32xbf16>, vector<32x32xbf16>, vector<2x32xf32> -> vector<2x32xf32>
    %27 = arith.addf %23, %26 : vector<2x32xf32>
    %c2 = arith.constant 2 : index
    %c0_23 = arith.constant 0 : index
    %c0_24 = arith.constant 0 : index
    %28 = vector.load %arg8[%c2, %c0_23, %c0_24] : memref<9x32x32xbf16, #tpu.memory_space<vmem>>, vector<1x32x32xbf16>
    %29 = vector.shape_cast %28 : vector<1x32x32xbf16> to vector<32x32xbf16>
    %cst_25 = arith.constant dense<0.000000e+00> : vector<2x32xf32>
    %30 = tpu.matmul %14, %29, %cst_25 {dimension_numbers = #tpu.dot_dimension_numbers<[1], [0], [0], [1], [0, 0, 1, 1], [], []>} : vector<2x32xbf16>, vector<32x32xbf16>, vector<2x32xf32> -> vector<2x32xf32>
    %31 = arith.addf %27, %30 : vector<2x32xf32>
    %c3 = arith.constant 3 : index
    %c0_26 = arith.constant 0 : index
    %c0_27 = arith.constant 0 : index
    %32 = vector.load %arg8[%c3, %c0_26, %c0_27] : memref<9x32x32xbf16, #tpu.memory_space<vmem>>, vector<1x32x32xbf16>
    %33 = vector.shape_cast %32 : vector<1x32x32xbf16> to vector<32x32xbf16>
    %cst_28 = arith.constant dense<0.000000e+00> : vector<2x32xf32>
    %34 = tpu.matmul %5, %33, %cst_28 {dimension_numbers = #tpu.dot_dimension_numbers<[1], [0], [0], [1], [0, 0, 1, 1], [], []>} : vector<2x32xbf16>, vector<32x32xbf16>, vector<2x32xf32> -> vector<2x32xf32>
    %35 = arith.addf %31, %34 : vector<2x32xf32>
    %c4 = arith.constant 4 : index
    %c0_29 = arith.constant 0 : index
    %c0_30 = arith.constant 0 : index
    %36 = vector.load %arg8[%c4, %c0_29, %c0_30] : memref<9x32x32xbf16, #tpu.memory_space<vmem>>, vector<1x32x32xbf16>
    %37 = vector.shape_cast %36 : vector<1x32x32xbf16> to vector<32x32xbf16>
    %cst_31 = arith.constant dense<0.000000e+00> : vector<2x32xf32>
    %38 = tpu.matmul %7, %37, %cst_31 {dimension_numbers = #tpu.dot_dimension_numbers<[1], [0], [0], [1], [0, 0, 1, 1], [], []>} : vector<2x32xbf16>, vector<32x32xbf16>, vector<2x32xf32> -> vector<2x32xf32>
    %39 = arith.addf %35, %38 : vector<2x32xf32>
    %c5 = arith.constant 5 : index
    %c0_32 = arith.constant 0 : index
    %c0_33 = arith.constant 0 : index
    %40 = vector.load %arg8[%c5, %c0_32, %c0_33] : memref<9x32x32xbf16, #tpu.memory_space<vmem>>, vector<1x32x32xbf16>
    %41 = vector.shape_cast %40 : vector<1x32x32xbf16> to vector<32x32xbf16>
    %cst_34 = arith.constant dense<0.000000e+00> : vector<2x32xf32>
    %42 = tpu.matmul %17, %41, %cst_34 {dimension_numbers = #tpu.dot_dimension_numbers<[1], [0], [0], [1], [0, 0, 1, 1], [], []>} : vector<2x32xbf16>, vector<32x32xbf16>, vector<2x32xf32> -> vector<2x32xf32>
    %43 = arith.addf %39, %42 : vector<2x32xf32>
    %c6 = arith.constant 6 : index
    %c0_35 = arith.constant 0 : index
    %c0_36 = arith.constant 0 : index
    %44 = vector.load %arg8[%c6, %c0_35, %c0_36] : memref<9x32x32xbf16, #tpu.memory_space<vmem>>, vector<1x32x32xbf16>
    %45 = vector.shape_cast %44 : vector<1x32x32xbf16> to vector<32x32xbf16>
    %cst_37 = arith.constant dense<0.000000e+00> : vector<2x32xf32>
    %46 = tpu.matmul %9, %45, %cst_37 {dimension_numbers = #tpu.dot_dimension_numbers<[1], [0], [0], [1], [0, 0, 1, 1], [], []>} : vector<2x32xbf16>, vector<32x32xbf16>, vector<2x32xf32> -> vector<2x32xf32>
    %47 = arith.addf %43, %46 : vector<2x32xf32>
    %c7 = arith.constant 7 : index
    %c0_38 = arith.constant 0 : index
    %c0_39 = arith.constant 0 : index
    %48 = vector.load %arg8[%c7, %c0_38, %c0_39] : memref<9x32x32xbf16, #tpu.memory_space<vmem>>, vector<1x32x32xbf16>
    %49 = vector.shape_cast %48 : vector<1x32x32xbf16> to vector<32x32xbf16>
    %cst_40 = arith.constant dense<0.000000e+00> : vector<2x32xf32>
    %50 = tpu.matmul %11, %49, %cst_40 {dimension_numbers = #tpu.dot_dimension_numbers<[1], [0], [0], [1], [0, 0, 1, 1], [], []>} : vector<2x32xbf16>, vector<32x32xbf16>, vector<2x32xf32> -> vector<2x32xf32>
    %51 = arith.addf %47, %50 : vector<2x32xf32>
    %c8 = arith.constant 8 : index
    %c0_41 = arith.constant 0 : index
    %c0_42 = arith.constant 0 : index
    %52 = vector.load %arg8[%c8, %c0_41, %c0_42] : memref<9x32x32xbf16, #tpu.memory_space<vmem>>, vector<1x32x32xbf16>
    %53 = vector.shape_cast %52 : vector<1x32x32xbf16> to vector<32x32xbf16>
    %cst_43 = arith.constant dense<0.000000e+00> : vector<2x32xf32>
    %54 = tpu.matmul %20, %53, %cst_43 {dimension_numbers = #tpu.dot_dimension_numbers<[1], [0], [0], [1], [0, 0, 1, 1], [], []>} : vector<2x32xbf16>, vector<32x32xbf16>, vector<2x32xf32> -> vector<2x32xf32>
    %55 = arith.addf %51, %54 : vector<2x32xf32>
    %c0_44 = arith.constant 0 : index
    %c0_45 = arith.constant 0 : index
    %56 = vector.load %arg9[%c0_44, %c0_45] : memref<1x32xf32, #tpu.memory_space<vmem>>, vector<1x32xf32>
    %57 = vector.broadcast %56 : vector<1x32xf32> to vector<2x32xf32>
    %58 = arith.addf %55, %57 : vector<2x32xf32>
    %cst_46 = arith.constant 0.000000e+00 : f32
    %59 = vector.broadcast %cst_46 : f32 to vector<2x32xf32>
    %60 = arith.maximumf %58, %59 : vector<2x32xf32>
    %61 = arith.truncf %60 : vector<2x32xf32> to vector<2x32xbf16>
    %c0_47 = arith.constant 0 : index
    %c0_48 = arith.constant 0 : index
    %c0_49 = arith.constant 0 : index
    %62 = vector.load %arg10[%c0_47, %c0_48, %c0_49] : memref<1x2x32xbf16, #tpu.memory_space<vmem>>, vector<1x2x32xbf16>
    %63 = vector.shape_cast %62 : vector<1x2x32xbf16> to vector<2x32xbf16>
    %64 = vector.shape_cast %61 : vector<2x32xbf16> to vector<1x2x32xbf16>
    tpu.vector_store %arg10[%c0_47, %c0_48, %c0_49], %64 {strides = array<i32>} : memref<1x2x32xbf16, #tpu.memory_space<vmem>>, vector<1x2x32xbf16>,
    return
  }
  func.func @transform_0(%arg0: i32, %arg1: i32) -> (i32, i32, i32) {
    %c0_i32 = arith.constant 0 : i32
    %c0_i32_0 = arith.constant 0 : i32
    return %arg0, %arg1, %c0_i32 : i32, i32, i32
  }
  func.func @transform_1(%arg0: i32, %arg1: i32) -> (i32, i32, i32) {
    %c0_i32 = arith.constant 0 : i32
    %c0_i32_0 = arith.constant 0 : i32
    return %arg0, %arg1, %c0_i32 : i32, i32, i32
  }
  func.func @transform_2(%arg0: i32, %arg1: i32) -> (i32, i32, i32) {
    %c0_i32 = arith.constant 0 : i32
    %c0_i32_0 = arith.constant 0 : i32
    return %arg0, %arg1, %c0_i32 : i32, i32, i32
  }
  func.func @transform_3(%arg0: i32, %arg1: i32) -> (i32, i32, i32) {
    %c0_i32 = arith.constant 0 : i32
    %c0_i32_0 = arith.constant 0 : i32
    return %arg0, %arg1, %c0_i32 : i32, i32, i32
  }
  func.func @transform_4(%arg0: i32, %arg1: i32) -> (i32, i32, i32) {
    %c0_i32 = arith.constant 0 : i32
    %c0_i32_0 = arith.constant 0 : i32
    return %arg0, %arg1, %c0_i32 : i32, i32, i32
  }
  func.func @transform_5(%arg0: i32, %arg1: i32) -> (i32, i32, i32) {
    %c0_i32 = arith.constant 0 : i32
    %c0_i32_0 = arith.constant 0 : i32
    return %arg0, %arg1, %c0_i32 : i32, i32, i32
  }
  func.func @transform_6(%arg0: i32, %arg1: i32) -> (i32, i32, i32) {
    %c0_i32 = arith.constant 0 : i32
    %c0_i32_0 = arith.constant 0 : i32
    %c0_i32_1 = arith.constant 0 : i32
    %c0_i32_2 = arith.constant 0 : i32
    return %c0_i32, %c0_i32_0, %c0_i32_1 : i32, i32, i32
  }
  func.func @transform_7(%arg0: i32, %arg1: i32) -> (i32, i32) {
    %c0_i32 = arith.constant 0 : i32
    %c0_i32_0 = arith.constant 0 : i32
    %c0_i32_1 = arith.constant 0 : i32
    return %c0_i32, %c0_i32_0 : i32, i32
  }
  func.func @transform_8(%arg0: i32, %arg1: i32) -> (i32, i32, i32) {
    %c0_i32 = arith.constant 0 : i32
    %c0_i32_0 = arith.constant 0 : i32
    return %arg0, %arg1, %c0_i32 : i32, i32, i32
  }
}

module attributes {stable_mosaic.version = 11 : i64} {
  func.func @_stage_kernel(%arg0: i32, %arg1: i32, %arg2: memref<1x2x32xbf16, #tpu.memory_space<vmem>>, %arg3: memref<1x2x32xbf16, #tpu.memory_space<vmem>>, %arg4: memref<1x2x32xbf16, #tpu.memory_space<vmem>>, %arg5: memref<1x2x32xbf16, #tpu.memory_space<vmem>>, %arg6: memref<1x2x32xbf16, #tpu.memory_space<vmem>>, %arg7: memref<1x2x32xbf16, #tpu.memory_space<vmem>>, %arg8: memref<9x32x64xbf16, #tpu.memory_space<vmem>>, %arg9: memref<1x64xf32, #tpu.memory_space<vmem>>, %arg10: memref<1x2x64xbf16, #tpu.memory_space<vmem>>) attributes {dimension_semantics = [#tpu.dimension_semantics<parallel>, #tpu.dimension_semantics<parallel>], iteration_bounds = array<i64: 2, 1>, scalar_prefetch = 0 : i64, scratch_operands = 0 : i64, tpu.core_type = #tpu.core_type<tc>, window_params = [{transform_indices = @transform_0, window_bounds = array<i64: 1, 2, 32>}, {transform_indices = @transform_1, window_bounds = array<i64: 1, 2, 32>}, {transform_indices = @transform_2, window_bounds = array<i64: 1, 2, 32>}, {transform_indices = @transform_3, window_bounds = array<i64: 1, 2, 32>}, {transform_indices = @transform_4, window_bounds = array<i64: 1, 2, 32>}, {transform_indices = @transform_5, window_bounds = array<i64: 1, 2, 32>}, {pipeline_mode = #tpu.pipeline_mode<synchronous>, transform_indices = @transform_6, window_bounds = array<i64: 9, 32, 64>}, {pipeline_mode = #tpu.pipeline_mode<synchronous>, transform_indices = @transform_7, window_bounds = array<i64: 1, 64>}, {transform_indices = @transform_8, window_bounds = array<i64: 1, 2, 64>}]} {
    %c0 = arith.constant 0 : index
    %c0_0 = arith.constant 0 : index
    %c0_1 = arith.constant 0 : index
    %0 = vector.load %arg2[%c0, %c0_0, %c0_1] : memref<1x2x32xbf16, #tpu.memory_space<vmem>>, vector<1x2x32xbf16>
    %1 = vector.shape_cast %0 : vector<1x2x32xbf16> to vector<2x32xbf16>
    %c0_2 = arith.constant 0 : index
    %c0_3 = arith.constant 0 : index
    %c0_4 = arith.constant 0 : index
    %2 = vector.load %arg3[%c0_2, %c0_3, %c0_4] : memref<1x2x32xbf16, #tpu.memory_space<vmem>>, vector<1x2x32xbf16>
    %3 = vector.shape_cast %2 : vector<1x2x32xbf16> to vector<2x32xbf16>
    %c0_5 = arith.constant 0 : index
    %c0_6 = arith.constant 0 : index
    %c0_7 = arith.constant 0 : index
    %4 = vector.load %arg4[%c0_5, %c0_6, %c0_7] : memref<1x2x32xbf16, #tpu.memory_space<vmem>>, vector<1x2x32xbf16>
    %5 = vector.shape_cast %4 : vector<1x2x32xbf16> to vector<2x32xbf16>
    %c0_8 = arith.constant 0 : index
    %c0_9 = arith.constant 0 : index
    %c0_10 = arith.constant 0 : index
    %6 = vector.load %arg5[%c0_8, %c0_9, %c0_10] : memref<1x2x32xbf16, #tpu.memory_space<vmem>>, vector<1x2x32xbf16>
    %7 = vector.shape_cast %6 : vector<1x2x32xbf16> to vector<2x32xbf16>
    %c0_11 = arith.constant 0 : index
    %c0_12 = arith.constant 0 : index
    %c0_13 = arith.constant 0 : index
    %8 = vector.load %arg6[%c0_11, %c0_12, %c0_13] : memref<1x2x32xbf16, #tpu.memory_space<vmem>>, vector<1x2x32xbf16>
    %9 = vector.shape_cast %8 : vector<1x2x32xbf16> to vector<2x32xbf16>
    %c0_14 = arith.constant 0 : index
    %c0_15 = arith.constant 0 : index
    %c0_16 = arith.constant 0 : index
    %10 = vector.load %arg7[%c0_14, %c0_15, %c0_16] : memref<1x2x32xbf16, #tpu.memory_space<vmem>>, vector<1x2x32xbf16>
    %11 = vector.shape_cast %10 : vector<1x2x32xbf16> to vector<2x32xbf16>
    %12 = vector.extract_strided_slice %1 {offsets = [1, 0], sizes = [1, 32], strides = [1, 1]} : vector<2x32xbf16> to vector<1x32xbf16>
    %13 = vector.extract_strided_slice %1 {offsets = [0, 0], sizes = [1, 32], strides = [1, 1]} : vector<2x32xbf16> to vector<1x32xbf16>
    %14 = tpu.concatenate %12, %13 in 0 : vector<1x32xbf16>, vector<1x32xbf16> -> vector<2x32xbf16>
    %15 = vector.extract_strided_slice %5 {offsets = [1, 0], sizes = [1, 32], strides = [1, 1]} : vector<2x32xbf16> to vector<1x32xbf16>
    %16 = vector.extract_strided_slice %5 {offsets = [0, 0], sizes = [1, 32], strides = [1, 1]} : vector<2x32xbf16> to vector<1x32xbf16>
    %17 = tpu.concatenate %15, %16 in 0 : vector<1x32xbf16>, vector<1x32xbf16> -> vector<2x32xbf16>
    %18 = vector.extract_strided_slice %9 {offsets = [1, 0], sizes = [1, 32], strides = [1, 1]} : vector<2x32xbf16> to vector<1x32xbf16>
    %19 = vector.extract_strided_slice %9 {offsets = [0, 0], sizes = [1, 32], strides = [1, 1]} : vector<2x32xbf16> to vector<1x32xbf16>
    %20 = tpu.concatenate %18, %19 in 0 : vector<1x32xbf16>, vector<1x32xbf16> -> vector<2x32xbf16>
    %c0_17 = arith.constant 0 : index
    %c0_18 = arith.constant 0 : index
    %c0_19 = arith.constant 0 : index
    %21 = vector.load %arg8[%c0_17, %c0_18, %c0_19] : memref<9x32x64xbf16, #tpu.memory_space<vmem>>, vector<1x32x64xbf16>
    %22 = vector.shape_cast %21 : vector<1x32x64xbf16> to vector<32x64xbf16>
    %cst = arith.constant dense<0.000000e+00> : vector<2x64xf32>
    %23 = tpu.matmul %1, %22, %cst {dimension_numbers = #tpu.dot_dimension_numbers<[1], [0], [0], [1], [0, 0, 1, 1], [], []>} : vector<2x32xbf16>, vector<32x64xbf16>, vector<2x64xf32> -> vector<2x64xf32>
    %c1 = arith.constant 1 : index
    %c0_20 = arith.constant 0 : index
    %c0_21 = arith.constant 0 : index
    %24 = vector.load %arg8[%c1, %c0_20, %c0_21] : memref<9x32x64xbf16, #tpu.memory_space<vmem>>, vector<1x32x64xbf16>
    %25 = vector.shape_cast %24 : vector<1x32x64xbf16> to vector<32x64xbf16>
    %cst_22 = arith.constant dense<0.000000e+00> : vector<2x64xf32>
    %26 = tpu.matmul %3, %25, %cst_22 {dimension_numbers = #tpu.dot_dimension_numbers<[1], [0], [0], [1], [0, 0, 1, 1], [], []>} : vector<2x32xbf16>, vector<32x64xbf16>, vector<2x64xf32> -> vector<2x64xf32>
    %27 = arith.addf %23, %26 : vector<2x64xf32>
    %c2 = arith.constant 2 : index
    %c0_23 = arith.constant 0 : index
    %c0_24 = arith.constant 0 : index
    %28 = vector.load %arg8[%c2, %c0_23, %c0_24] : memref<9x32x64xbf16, #tpu.memory_space<vmem>>, vector<1x32x64xbf16>
    %29 = vector.shape_cast %28 : vector<1x32x64xbf16> to vector<32x64xbf16>
    %cst_25 = arith.constant dense<0.000000e+00> : vector<2x64xf32>
    %30 = tpu.matmul %14, %29, %cst_25 {dimension_numbers = #tpu.dot_dimension_numbers<[1], [0], [0], [1], [0, 0, 1, 1], [], []>} : vector<2x32xbf16>, vector<32x64xbf16>, vector<2x64xf32> -> vector<2x64xf32>
    %31 = arith.addf %27, %30 : vector<2x64xf32>
    %c3 = arith.constant 3 : index
    %c0_26 = arith.constant 0 : index
    %c0_27 = arith.constant 0 : index
    %32 = vector.load %arg8[%c3, %c0_26, %c0_27] : memref<9x32x64xbf16, #tpu.memory_space<vmem>>, vector<1x32x64xbf16>
    %33 = vector.shape_cast %32 : vector<1x32x64xbf16> to vector<32x64xbf16>
    %cst_28 = arith.constant dense<0.000000e+00> : vector<2x64xf32>
    %34 = tpu.matmul %5, %33, %cst_28 {dimension_numbers = #tpu.dot_dimension_numbers<[1], [0], [0], [1], [0, 0, 1, 1], [], []>} : vector<2x32xbf16>, vector<32x64xbf16>, vector<2x64xf32> -> vector<2x64xf32>
    %35 = arith.addf %31, %34 : vector<2x64xf32>
    %c4 = arith.constant 4 : index
    %c0_29 = arith.constant 0 : index
    %c0_30 = arith.constant 0 : index
    %36 = vector.load %arg8[%c4, %c0_29, %c0_30] : memref<9x32x64xbf16, #tpu.memory_space<vmem>>, vector<1x32x64xbf16>
    %37 = vector.shape_cast %36 : vector<1x32x64xbf16> to vector<32x64xbf16>
    %cst_31 = arith.constant dense<0.000000e+00> : vector<2x64xf32>
    %38 = tpu.matmul %7, %37, %cst_31 {dimension_numbers = #tpu.dot_dimension_numbers<[1], [0], [0], [1], [0, 0, 1, 1], [], []>} : vector<2x32xbf16>, vector<32x64xbf16>, vector<2x64xf32> -> vector<2x64xf32>
    %39 = arith.addf %35, %38 : vector<2x64xf32>
    %c5 = arith.constant 5 : index
    %c0_32 = arith.constant 0 : index
    %c0_33 = arith.constant 0 : index
    %40 = vector.load %arg8[%c5, %c0_32, %c0_33] : memref<9x32x64xbf16, #tpu.memory_space<vmem>>, vector<1x32x64xbf16>
    %41 = vector.shape_cast %40 : vector<1x32x64xbf16> to vector<32x64xbf16>
    %cst_34 = arith.constant dense<0.000000e+00> : vector<2x64xf32>
    %42 = tpu.matmul %17, %41, %cst_34 {dimension_numbers = #tpu.dot_dimension_numbers<[1], [0], [0], [1], [0, 0, 1, 1], [], []>} : vector<2x32xbf16>, vector<32x64xbf16>, vector<2x64xf32> -> vector<2x64xf32>
    %43 = arith.addf %39, %42 : vector<2x64xf32>
    %c6 = arith.constant 6 : index
    %c0_35 = arith.constant 0 : index
    %c0_36 = arith.constant 0 : index
    %44 = vector.load %arg8[%c6, %c0_35, %c0_36] : memref<9x32x64xbf16, #tpu.memory_space<vmem>>, vector<1x32x64xbf16>
    %45 = vector.shape_cast %44 : vector<1x32x64xbf16> to vector<32x64xbf16>
    %cst_37 = arith.constant dense<0.000000e+00> : vector<2x64xf32>
    %46 = tpu.matmul %9, %45, %cst_37 {dimension_numbers = #tpu.dot_dimension_numbers<[1], [0], [0], [1], [0, 0, 1, 1], [], []>} : vector<2x32xbf16>, vector<32x64xbf16>, vector<2x64xf32> -> vector<2x64xf32>
    %47 = arith.addf %43, %46 : vector<2x64xf32>
    %c7 = arith.constant 7 : index
    %c0_38 = arith.constant 0 : index
    %c0_39 = arith.constant 0 : index
    %48 = vector.load %arg8[%c7, %c0_38, %c0_39] : memref<9x32x64xbf16, #tpu.memory_space<vmem>>, vector<1x32x64xbf16>
    %49 = vector.shape_cast %48 : vector<1x32x64xbf16> to vector<32x64xbf16>
    %cst_40 = arith.constant dense<0.000000e+00> : vector<2x64xf32>
    %50 = tpu.matmul %11, %49, %cst_40 {dimension_numbers = #tpu.dot_dimension_numbers<[1], [0], [0], [1], [0, 0, 1, 1], [], []>} : vector<2x32xbf16>, vector<32x64xbf16>, vector<2x64xf32> -> vector<2x64xf32>
    %51 = arith.addf %47, %50 : vector<2x64xf32>
    %c8 = arith.constant 8 : index
    %c0_41 = arith.constant 0 : index
    %c0_42 = arith.constant 0 : index
    %52 = vector.load %arg8[%c8, %c0_41, %c0_42] : memref<9x32x64xbf16, #tpu.memory_space<vmem>>, vector<1x32x64xbf16>
    %53 = vector.shape_cast %52 : vector<1x32x64xbf16> to vector<32x64xbf16>
    %cst_43 = arith.constant dense<0.000000e+00> : vector<2x64xf32>
    %54 = tpu.matmul %20, %53, %cst_43 {dimension_numbers = #tpu.dot_dimension_numbers<[1], [0], [0], [1], [0, 0, 1, 1], [], []>} : vector<2x32xbf16>, vector<32x64xbf16>, vector<2x64xf32> -> vector<2x64xf32>
    %55 = arith.addf %51, %54 : vector<2x64xf32>
    %c0_44 = arith.constant 0 : index
    %c0_45 = arith.constant 0 : index
    %56 = vector.load %arg9[%c0_44, %c0_45] : memref<1x64xf32, #tpu.memory_space<vmem>>, vector<1x64xf32>
    %57 = vector.broadcast %56 : vector<1x64xf32> to vector<2x64xf32>
    %58 = arith.addf %55, %57 : vector<2x64xf32>
    %cst_46 = arith.constant 0.000000e+00 : f32
    %59 = vector.broadcast %cst_46 : f32 to vector<2x64xf32>
    %60 = arith.maximumf %58, %59 : vector<2x64xf32>
    %61 = arith.truncf %60 : vector<2x64xf32> to vector<2x64xbf16>
    %c0_47 = arith.constant 0 : index
    %c0_48 = arith.constant 0 : index
    %c0_49 = arith.constant 0 : index
    %62 = vector.load %arg10[%c0_47, %c0_48, %c0_49] : memref<1x2x64xbf16, #tpu.memory_space<vmem>>, vector<1x2x64xbf16>
    %63 = vector.shape_cast %62 : vector<1x2x64xbf16> to vector<2x64xbf16>
    %64 = vector.shape_cast %61 : vector<2x64xbf16> to vector<1x2x64xbf16>
    tpu.vector_store %arg10[%c0_47, %c0_48, %c0_49], %64 {strides = array<i32>} : memref<1x2x64xbf16, #tpu.memory_space<vmem>>, vector<1x2x64xbf16>,
    return
  }
  func.func @transform_0(%arg0: i32, %arg1: i32) -> (i32, i32, i32) {
    %c0_i32 = arith.constant 0 : i32
    %c0_i32_0 = arith.constant 0 : i32
    return %arg0, %arg1, %c0_i32 : i32, i32, i32
  }
  func.func @transform_1(%arg0: i32, %arg1: i32) -> (i32, i32, i32) {
    %c0_i32 = arith.constant 0 : i32
    %c0_i32_0 = arith.constant 0 : i32
    return %arg0, %arg1, %c0_i32 : i32, i32, i32
  }
  func.func @transform_2(%arg0: i32, %arg1: i32) -> (i32, i32, i32) {
    %c0_i32 = arith.constant 0 : i32
    %c0_i32_0 = arith.constant 0 : i32
    return %arg0, %arg1, %c0_i32 : i32, i32, i32
  }
  func.func @transform_3(%arg0: i32, %arg1: i32) -> (i32, i32, i32) {
    %c0_i32 = arith.constant 0 : i32
    %c0_i32_0 = arith.constant 0 : i32
    return %arg0, %arg1, %c0_i32 : i32, i32, i32
  }
  func.func @transform_4(%arg0: i32, %arg1: i32) -> (i32, i32, i32) {
    %c0_i32 = arith.constant 0 : i32
    %c0_i32_0 = arith.constant 0 : i32
    return %arg0, %arg1, %c0_i32 : i32, i32, i32
  }
  func.func @transform_5(%arg0: i32, %arg1: i32) -> (i32, i32, i32) {
    %c0_i32 = arith.constant 0 : i32
    %c0_i32_0 = arith.constant 0 : i32
    return %arg0, %arg1, %c0_i32 : i32, i32, i32
  }
  func.func @transform_6(%arg0: i32, %arg1: i32) -> (i32, i32, i32) {
    %c0_i32 = arith.constant 0 : i32
    %c0_i32_0 = arith.constant 0 : i32
    %c0_i32_1 = arith.constant 0 : i32
    %c0_i32_2 = arith.constant 0 : i32
    return %c0_i32, %c0_i32_0, %c0_i32_1 : i32, i32, i32
  }
  func.func @transform_7(%arg0: i32, %arg1: i32) -> (i32, i32) {
    %c0_i32 = arith.constant 0 : i32
    %c0_i32_0 = arith.constant 0 : i32
    %c0_i32_1 = arith.constant 0 : i32
    return %c0_i32, %c0_i32_0 : i32, i32
  }
  func.func @transform_8(%arg0: i32, %arg1: i32) -> (i32, i32, i32) {
    %c0_i32 = arith.constant 0 : i32
    %c0_i32_0 = arith.constant 0 : i32
    return %arg0, %arg1, %c0_i32 : i32, i32, i32
  }
}

</mosaic_0001>

<bundles_post_ra>
// kernel: paramount_forward.6
= control target key start
LH: loop header
LB: loop body
LE: loop exit
PB: predicated region body
PF: predicated region fallthrough
CT: control target
= control target key end

     0   :  { %s1681_s27 = smov 0   ;;  %s1683_s28 = smov 0   ;;  %s1832_s0 = inlined_call_operand.vmem [shape: bf16[2,20,8], index: 0, kind: input, shape index: {}]   ;;  %s1833_s1 = inlined_call_operand.vmem [shape: bf16[2,20,8], index: 1, kind: input, shape index: {}]   ;;  %s1834_s2 = inlined_call_operand.vmem [shape: bf16[2,20,8], index: 2, kind: input, shape index: {}]   ;;  %s1835_s3 = inlined_call_operand.vmem [shape: bf16[2,20,8], index: 3, kind: input, shape index: {}]   ;;  %s1836_s4 = inlined_call_operand.vmem [shape: bf16[2,20,8], index: 4, kind: input, shape index: {}]   ;;  %s1837_s5 = inlined_call_operand.vmem [shape: bf16[2,20,8], index: 5, kind: input, shape index: {}]   ;;  %s1838_s6 = inlined_call_operand.vmem [shape: bf16[9,8,16], index: 6, kind: input, shape index: {}]   ;;  %s1839_s7 = inlined_call_operand.vmem [shape: f32[1,16], index: 7, kind: input, shape index: {}]   ;;  %s1840_s8 = inlined_call_operand.vmem [shape: bf16[2,20,16], index: 8, kind: output, shape index: {}]  }
   0x1   :  { %s1685_s29 = smov 0  }
   0x2 LB: > { %s30_s30 = sadd.s32 1, %s1630_s28  ;;  %p1424_p0 = scmp.ge.s32.totalorder %s1634_s29, 1  ;;  %s1634_s29 = sphi %s1685_s29, %s18_s29   ;;  %s1630_s28 = sphi %s1683_s28, %s1844_s28   ;;  %s1626_s27 = sphi %s1681_s27, %s1843_s27  }
   0x3   : > { %p32_p1 = scmp.ge.s32.totalorder %s30_s30, 2  ;;  %p368_p2 = scmp.lt.s32.totalorder %s1634_s29, 3 }
   0x5   : > { %s1846_s30 = smov (%p32_p1, %s30_s30), 0  ;;  %p369_p3 = pnand %p1424_p0, %p368_p2 }
   0x6   : > { %v1441_v0 = vld [vmem:[%s1838_s6 + $0x4] sm:$0xf] (!%p369_p3)  ;;  %vm659_vm0 = vcmask (!%p369_p3), 1043456   ;;  %v641_v1 = vld [vmem:[%s1838_s6] sm:$0xf] (!%p369_p3)  ;;  %p456_p4 = scmp.lt.s32.totalorder (!%p369_p3), %s1626_s27, 1 }
   0x7   : > { %372 = sbr.rel (%p369_p3) target bundleno = 278 (0x116), region = 52  ;;  %1563 = vmatprep.subr.msk.bf16.mxu0 (!%p369_p3), %vm659_vm0, %v1441_v0  ;;  %v661_v2 = vsel (!%p369_p3), %vm659_vm0, %v1441_v0, 0  ;;  %1564 = vmatprep.subr.msk.bf16.mxu1 (!%p369_p3), %vm659_vm0, %v641_v1  ;;  %v716_v3 = vsel (!%p369_p3), %vm659_vm0, %v641_v1, 0  ;;  %v1448_v4 = vld [vmem:[%s1838_s6 + $0x8] sm:$0xf] (!%p369_p3)  ;;  %vm652_vm1 = vcmask (!%p369_p3), 64512  }
   0x8   : > { %1510 = vmatpush3.bf16.msra.mxu0 (!%p369_p3), %v661_v2  ;;  %1516 = vmatpush3.bf16.msra.mxu1 (!%p369_p3), %v716_v3  ;;  %v1451_v5 = vld [vmem:[%s1838_s6 + $0xc] sm:$0xf] (!%p369_p3)  ;;  %v775_v6 = vsel (!%p369_p3), %vm659_vm0, %v1448_v4, 0  ;;  %vm575_vm2 = vcmask (!%p369_p3), 1041408   ;;  %vm576_vm3 = vsmask.f32 (!%p369_p3), 1280 }
   0x9   : > { %1565 = vmatprep.subr.msk.bf16.mxu0 (!%p369_p3), %vm659_vm0, %v1448_v4  ;;  %1566 = vmatprep.subr.msk.bf16.mxu1 (!%p369_p3), %vm659_vm0, %v1451_v5  ;;  %v1454_v10 = vld [vmem:[%s1838_s6 + $0x10] sm:$0xf] (!%p369_p3)  ;;  %v835_v16 = vsel (!%p369_p3), %vm659_vm0, %v1451_v5, 0  ;;  %v1459_v18 = vld [vmem:[%s1838_s6 + $0x14] sm:$0xf] (!%p369_p3)  ;;  %vm1759_vm5 = vmand (!%p369_p3), %vm575_vm2, %vm576_vm3  ;;  %vm1241_vm6 = vcmask (!%p369_p3), 123904  }
   0xa   : > { %vm552_vm4 = vsmask.f32 (!%p369_p3), 7424  ;;  %v905_v38 = vsel (!%p369_p3), %vm659_vm0, %v1454_v10, 0  ;;  %v967_v46 = vsel (!%p369_p3), %vm659_vm0, %v1459_v18, 0  ;;  %v1462_v49 = vld [vmem:[%s1838_s6 + $0x18] sm:$0xf] (!%p369_p3) }
   0xb   : > { %v1465_v51 = vld [vmem:[%s1838_s6 + $0x1c] sm:$0xf] (!%p369_p3)  ;;  %v1027_v57 = vsel (!%p369_p3), %vm659_vm0, %v1462_v49, 0  ;;  %v1470_v0 = vld [vmem:[%s1838_s6 + $0x20] sm:$0xf] (!%p369_p3)  ;;  %vm1238_vm7 = vcmask (!%p369_p3), 125952  }
   0xc   : > { %v1097_v59 = vsel (!%p369_p3), %vm659_vm0, %v1465_v51, 0 }
   0xe   : > { %s1848_s27 = smov (!%p456_p4, %s1626_s27), 1 }
   0xf   : > { %s1717_s17 = smul.u32 12, %s1848_s27 }
  0x11   : > { %s473_s20 = scalar_lea.vmem %s1833_s1, %s1717_s17  ;;  %s463_s23 = scalar_lea.vmem %s1832_s0, %s1717_s17 }
  0x12   : > { %s483_s26 = scalar_lea.vmem %s1834_s2, %s1717_s17  ;;  %v1597_v7 = vld [vmem:[%s473_s20] sm:$0xff]   ;;  %v1598_v8 = vld [vmem:[%s473_s20 + $0x8] ss:$0 sps:$4 sm:$0x33]   ;;  %s1745_s14 = scalar_lea.vmem %s1835_s3, %s1717_s17 }
  0x13   : > { %v526_v9 = vld [vmem:[%s463_s23] sm:$0xf]  ;;  %v527_v11 = vld [vmem:[%s463_s23 + $0x4] sm:$0xf]  ;;  %1511 = vmatprep.mubr.msk.bf16.mxu0 %vm652_vm1, %v1597_v7  ;;  %s1752_s18 = scalar_lea.vmem %s1836_s4, %s1717_s17  ;;  %s1769_s21 = scalar_lea.vmem %s1837_s5, %s1717_s17  ;;  %v1159_v7 = vsel %vm659_vm0, %v1470_v0, 0 }
  0x14   : > { %v1434_v12 = vcombine.low %v526_v9, %v526_v9  ;;  %v532_v13 = vld [vmem:[%s483_s26] sm:$0xf]  ;;  %v1432_v14 = vcombine.low %v526_v9, %v527_v11  ;;  %v1601_v15 = vld [vmem:[%s463_s23 + $0x8] ss:$0 sps:$4 sm:$0x33]   ;;  %1512 = vmatmul.mubr.msk.bf16.vlgmr.msra.gmra.mrb[0].mxu0 %vm652_vm1, %v1598_v8  ;;  %s523_s13 = scalar_lea.vmem %s1840_s8, %s1717_s17 }
  0x15   : > { %v533_v17 = vld [vmem:[%s483_s26 + $0x4] sm:$0xf]  ;;  %v1604_v21 = vld [vmem:[%s483_s26 + $0x8] ss:$0 sps:$4 sm:$0x33]   ;;  %1522 = vmatpush3.bf16.msra.mxu0 %v775_v6  ;;  %v561_v24 = vshll.u32 %v1601_v15, 16  ;;  %v1437_v29 = vcombine.low %v532_v13, %v532_v13 }
  0x16   : > { %v571_v19 = vshll.u32 %v1434_v12, 16  ;;  %v1435_v20 = vcombine.low %v532_v13, %v533_v17  ;;  %v554_v22 = vshrl.u32 %v1432_v14, 16  ;;  %v556_v23 = vshll.u32 %v1432_v14, 16  ;;  %1517 = vmatprep.mubr.msk.bf16.mxu1 %vm652_vm1, %v1432_v14  ;;  %1567 = vmatprep.subr.msk.bf16.mxu0 %vm659_vm0, %v1454_v10  ;;  %v538_v34 = vld [vmem:[%s1752_s18] sm:$0xf] }
  0x17   : > { %v565_v25 = vshrl.u32 %v1601_v15, 16  ;;  %1518 = vmatmul.mubr.msk.bf16.vlgmr.msra.gmra.mrb[0].mxu1 %vm652_vm1, %v1601_v15  ;;  %v563_v28 = vrot.slane %v561_v24, 1  ;;  %v595_v33 = vshll.u32 %v1604_v21, 16  ;;  %v539_v37 = vld [vmem:[%s1752_s18 + $0x4] sm:$0xf]  ;;  %v605_v44 = vshll.u32 %v1437_v29, 16 }
  0x18   : > { %v558_v26 = vrot.slane %v556_v23, 1  ;;  %v573_v27 = vrot.slane %v571_v19, 7  ;;  %1528 = vmatpush3.bf16.msra.mxu1 %v835_v16  ;;  %1529 = vmatprep.mubr.msk.bf16.mxu1 %vm652_vm1, %v1435_v20  ;;  %v588_v31 = vshrl.u32 %v1435_v20, 16  ;;  %v590_v32 = vshll.u32 %v1435_v20, 16  ;;  %v1605_v39 = vld [vmem:[%s1745_s14] sm:$0xff]  }
  0x19   : > { %1568 = vmatprep.subr.msk.bf16.mxu1 %vm659_vm0, %v1459_v18  ;;  %v567_v36 = vor.u32 %v565_v25, %v563_v28  ;;  %v597_v41 = vrot.slane %v595_v33, 1  ;;  %v599_v45 = vshrl.u32 %v1604_v21, 16  ;;  %v1438_v48 = vcombine.low %v538_v34, %v539_v37  ;;  %v1609_v54 = vld [vmem:[%s1752_s18 + $0x8] ss:$0 sps:$4 sm:$0x33]   ;;  %v1610_v60 = vld [vmem:[%s1769_s21] sm:$0xff]  }
  0x1a   : > { %v559_v35 = vor.u32 %v558_v26, %v554_v22  ;;  %v592_v40 = vrot.slane %v590_v32, 1  ;;  %v607_v53 = vrot.slane %v605_v44, 7  ;;  %v1606_v56 = vld [vmem:[%s1745_s14 + $0x8] ss:$0 sps:$4 sm:$0x33]   ;;  %v626_v63 = vshll.u32 %v1609_v54, 16 }
  0x1b   : > { %v578_v43 = vsel %vm1759_vm5, %v567_v36, %v573_v27  ;;  %v601_v52 = vor.u32 %v599_v45, %v597_v41  ;;  %v621_v55 = vshll.u32 %v1438_v48, 16  ;;  %v619_v61 = vshrl.u32 %v1438_v48, 16  ;;  %v1611_v5 = vld [vmem:[%s1769_s21 + $0x8] ss:$0 sps:$4 sm:$0x33]  }
  0x1c   : > { %v564_v42 = vsel %vm552_vm4, %v559_v35, %v563_v28  ;;  %v593_v47 = vor.u32 %v592_v40, %v588_v31  ;;  %v1440_v1 = vcombine.low %v538_v34, %v538_v34  ;;  %v628_v3 = vrot.slane %v626_v63, 1 }
  0x1d   : > { %1523 = vmatprep.mubr.msk.bf16.mxu0 %vm652_vm1, %v564_v42  ;;  %v609_v58 = vsel %vm1759_vm5, %v601_v52, %v607_v53  ;;  %v623_v62 = vrot.slane %v621_v55, 1  ;;  %v630_v6 = vshrl.u32 %v1609_v54, 16 }
  0x1e   : > { %1524 = vmatmul.mubr.msk.bf16.vlgmr.msra.gmra.mrb[4].mxu0 %vm652_vm1, %v578_v43  ;;  %v598_v50 = vsel %vm552_vm4, %v593_v47, %v597_v41  ;;  %v636_v4 = vshll.u32 %v1440_v1, 16 }
  0x1f   : > { %1534 = vmatpush3.bf16.msra.mxu0 %v905_v38  ;;  %1530 = vmatmul.mubr.msk.bf16.vlgmr.msra.gmra.mrb[4].mxu1 %vm652_vm1, %v1604_v21  ;;  %v624_v2 = vor.u32 %v623_v62, %v619_v61  ;;  %v632_v9 = vor.u32 %v630_v6, %v628_v3 }
  0x20   : > { %1540 = vmatpush3.bf16.msra.mxu1 %v967_v46  ;;  %1535 = vmatprep.mubr.msk.bf16.mxu0 %vm652_vm1, %v1605_v39  ;;  %v638_v10 = vrot.slane %v636_v4, 7 }
  0x21   : > { %1569 = vmatprep.subr.msk.bf16.mxu0 %vm659_vm0, %v1462_v49  ;;  %1541 = vmatprep.mubr.msk.bf16.mxu1 %vm652_vm1, %v598_v50  ;;  %v629_v8 = vsel %vm552_vm4, %v624_v2, %v628_v3  ;;  %v1473_v2 = vld [vmem:[%s1839_s7] ss:$0 sm:$0xff] }
  0x22   : > { %1570 = vmatprep.subr.msk.bf16.mxu1 %vm659_vm0, %v1465_v51  ;;  %v640_v11 = vsel %vm1759_vm5, %v632_v9, %v638_v10 }
  0x26   : > { %1536 = vmatmul.mubr.msk.bf16.vlgmr.msra.gmra.mrb[8].mxu0 %vm652_vm1, %v1606_v56 }
  0x27   : > { %1546 = vmatpush3.bf16.msra.mxu0 %v1027_v57  ;;  %1542 = vmatmul.mubr.msk.bf16.vlgmr.msra.gmra.mrb[8].mxu1 %vm652_vm1, %v609_v58 }
  0x28   : > { %1552 = vmatpush3.bf16.msra.mxu1 %v1097_v59  ;;  %1547 = vmatprep.mubr.msk.bf16.mxu0 %vm652_vm1, %v1438_v48 }
  0x29   : > { %1571 = vmatprep.subr.msk.bf16.mxu0 %vm659_vm0, %v1470_v0  ;;  %1553 = vmatprep.mubr.msk.bf16.mxu1 %vm652_vm1, %v1610_v60 }
  0x2e   : > { %1548 = vmatmul.mubr.msk.bf16.vlgmr.msra.gmra.mrb[12].mxu0 %vm652_vm1, %v1609_v54 }
  0x2f   : > { %1558 = vmatpush3.bf16.msra.mxu0 %v1159_v7  ;;  %1554 = vmatmul.mubr.msk.bf16.vlgmr.msra.gmra.mrb[12].mxu1 %vm652_vm1, %v1611_v5 }
  0x30   : > { %1559 = vmatprep.mubr.msk.bf16.mxu0 %vm652_vm1, %v629_v8 }
  0x36   : > { %1560 = vmatmul.mubr.msk.bf16.vlgmr.msra.gmra.mrb[16].mxu0 %vm652_vm1, %v640_v11 }
  0xe7   : > { %v1513_v12 = vpop.f32.mrb[0].mxu0 }
  0xe8   : > { %v697_v13 = vpop.f32.mrb[1].mxu0 }
  0xe9   : > { %v1514_v15 = vpop.f32.mrb[2].mxu0 }
  0xea   : > { %v1519_v14 = vpop.f32.mrb[0].mxu1  ;;  %v700_v18 = vpop.f32.mrb[3].mxu0 }
  0xeb   : > { %v761_v16 = vadd.f32 %v1519_v14, %v1513_v12  ;;  %v752_v17 = vpop.f32.mrb[1].mxu1 }
  0xec   : > { %v753_v19 = vadd.f32 %v752_v17, %v697_v13  ;;  %v1520_v20 = vpop.f32.mrb[2].mxu1 }
  0xed   : > { %v755_v21 = vpop.f32.mrb[3].mxu1 }
  0xee   : > { %v756_v22 = vadd.f32 %v755_v21, %v700_v18 }
  0xf1   : > { %v1525_v23 = vpop.f32.mrb[4].mxu0 }
  0xf2   : > { %v827_v24 = vadd.f32 %v1525_v23, %v761_v16  ;;  %v811_v25 = vpop.f32.mrb[5].mxu0  ;;  %v1531_v26 = vpop.f32.mrb[4].mxu1 }
  0xf3   : > { %v825_v27 = vadd.f32 %v811_v25, %v753_v19  ;;  %v1526_v28 = vpop.f32.mrb[6].mxu0  ;;  %v871_v29 = vpop.f32.mrb[5].mxu1 }
  0xf4   : > { %v887_v30 = vadd.f32 %v1531_v26, %v827_v24  ;;  %v814_v31 = vpop.f32.mrb[7].mxu0  ;;  %v1532_v32 = vpop.f32.mrb[6].mxu1 }
  0xf5   : > { %v826_v33 = vadd.f32 %v814_v31, %v756_v22  ;;  %v885_v34 = vadd.f32 %v871_v29, %v825_v27  ;;  %v874_v35 = vpop.f32.mrb[7].mxu1 }
  0xf7   : > { %v886_v36 = vadd.f32 %v874_v35, %v826_v33 }
  0xf9   : > { %v1537_v37 = vpop.f32.mrb[8].mxu0 }
  0xfa   : > { %v957_v38 = vadd.f32 %v1537_v37, %v887_v30  ;;  %v941_v39 = vpop.f32.mrb[9].mxu0  ;;  %v1543_v40 = vpop.f32.mrb[8].mxu1 }
  0xfb   : > { %v955_v41 = vadd.f32 %v941_v39, %v885_v34  ;;  %v1538_v42 = vpop.f32.mrb[10].mxu0  ;;  %v1003_v43 = vpop.f32.mrb[9].mxu1 }
  0xfc   : > { %v1019_v44 = vadd.f32 %v1543_v40, %v957_v38  ;;  %v944_v45 = vpop.f32.mrb[11].mxu0  ;;  %v1544_v46 = vpop.f32.mrb[10].mxu1 }
  0xfd   : > { %v956_v47 = vadd.f32 %v944_v45, %v886_v36  ;;  %v1017_v48 = vadd.f32 %v1003_v43, %v955_v41  ;;  %v1006_v49 = vpop.f32.mrb[11].mxu1 }
  0xff   : > { %v1018_v50 = vadd.f32 %v1006_v49, %v956_v47 }
 0x101   : > { %v1549_v51 = vpop.f32.mrb[12].mxu0 }
 0x102   : > { %v1079_v52 = vadd.f32 %v1549_v51, %v1019_v44  ;;  %v1063_v53 = vpop.f32.mrb[13].mxu0  ;;  %v1555_v54 = vpop.f32.mrb[12].mxu1 }
 0x103   : > { %v1077_v55 = vadd.f32 %v1063_v53, %v1017_v48  ;;  %v1550_v56 = vpop.f32.mrb[14].mxu0  ;;  %v1133_v57 = vpop.f32.mrb[13].mxu1 }
 0x104   : > { %v1149_v58 = vadd.f32 %v1555_v54, %v1079_v52  ;;  %v1066_v59 = vpop.f32.mrb[15].mxu0  ;;  %v1556_v60 = vpop.f32.mrb[14].mxu1 }
 0x105   : > { %v1078_v61 = vadd.f32 %v1066_v59, %v1018_v50  ;;  %v1147_v62 = vadd.f32 %v1133_v57, %v1077_v55  ;;  %v1136_v63 = vpop.f32.mrb[15].mxu1 }
 0x107   : > { %v1148_v0 = vadd.f32 %v1136_v63, %v1078_v61 }
 0x109   : > { %v1561_v1 = vpop.f32.mrb[16].mxu0 }
 0x10a   : > { %v1211_v3 = vadd.f32 %v1561_v1, %v1149_v58  ;;  %v1195_v4 = vpop.f32.mrb[17].mxu0 }
 0x10b   : > { %v1209_v5 = vadd.f32 %v1195_v4, %v1147_v62  ;;  %v1562_v6 = vpop.f32.mrb[18].mxu0 }
 0x10c   : > { %v1221_v7 = vadd.f32 %v1473_v2, %v1211_v3  ;;  %v1198_v8 = vpop.f32.mrb[19].mxu0 }
 0x10d   : > { %v1219_v9 = vadd.f32 %v1473_v2, %v1209_v5  ;;  %v1210_v10 = vadd.f32 %v1198_v8, %v1148_v0 }
 0x10e   : > { %v1224_v11 = vmax.f32 %v1221_v7, 0.0 }
 0x10f   : > { %v1222_v12 = vmax.f32 %v1219_v9, 0.0  ;;  %v1220_v13 = vadd.f32 %v1473_v2, %v1210_v10 }
 0x110   : > { %v1481_v14 = vpack.c.bf16 %v1224_v11, %v1224_v11 }
 0x111   : > { %v1479_v15 = vpack.c.bf16 %v1222_v12, %v1222_v12  ;;  %v1223_v16 = vmax.f32 %v1220_v13, 0.0 }
 0x112   : > { %1242 = vst.msk [vmem:[%s523_s13 + $0x8] sm:$0x3] %vm1241_vm6, %v1481_v14 }
 0x113   : > { %1239 = vst.msk [vmem:[%s523_s13] sm:$0xf] %vm1238_vm7, %v1479_v15  ;;  %v1480_v17 = vpack.c.bf16 %v1223_v16, %v1223_v16 }
 0x115   : > { %1240 = vst.msk [vmem:[%s523_s13 + $0x4] sm:$0xf] %vm1238_vm7, %v1480_v17 }
 0x116 PF: > { %s18_s29 = sadd.s32 1, %s1634_s29   ;;  %s1843_s27 = smov %s1630_s28 }
 0x117   : > { %p15_p5 = scmp.ge.s32.totalorder %s18_s29, 4   ;;  %s1844_s28 = smov %s1846_s30 }
 0x119   :  { %17 = sbr.rel (!%p15_p5) target bundleno = 2 (0x2), region = 105 }

// kernel: paramount_forward.7
= control target key start
LH: loop header
LB: loop body
LE: loop exit
PB: predicated region body
PF: predicated region fallthrough
CT: control target
= control target key end

     0   :  { %s1393_s27 = smov 0   ;;  %s1395_s28 = smov 0   ;;  %s1526_s0 = inlined_call_operand.vmem [shape: bf16[2,6,16], index: 0, kind: input, shape index: {}]   ;;  %s1527_s1 = inlined_call_operand.vmem [shape: bf16[2,6,16], index: 1, kind: input, shape index: {}]   ;;  %s1528_s2 = inlined_call_operand.vmem [shape: bf16[2,6,16], index: 2, kind: input, shape index: {}]   ;;  %s1529_s3 = inlined_call_operand.vmem [shape: bf16[2,6,16], index: 3, kind: input, shape index: {}]   ;;  %s1530_s4 = inlined_call_operand.vmem [shape: bf16[2,6,16], index: 4, kind: input, shape index: {}]   ;;  %s1531_s5 = inlined_call_operand.vmem [shape: bf16[2,6,16], index: 5, kind: input, shape index: {}]   ;;  %s1532_s6 = inlined_call_operand.vmem [shape: bf16[9,16,32], index: 6, kind: input, shape index: {}]   ;;  %s1533_s7 = inlined_call_operand.vmem [shape: f32[1,32], index: 7, kind: input, shape index: {}]   ;;  %s1534_s8 = inlined_call_operand.vmem [shape: bf16[2,6,32], index: 8, kind: output, shape index: {}]  }
   0x1   :  { %s1397_s29 = smov 0  }
   0x2 LB: > { %s30_s30 = sadd.s32 1, %s1340_s28  ;;  %p1164_p0 = scmp.ge.s32.totalorder %s1344_s29, 1  ;;  %s1344_s29 = sphi %s1397_s29, %s18_s29   ;;  %s1340_s28 = sphi %s1395_s28, %s1538_s28   ;;  %s1336_s27 = sphi %s1393_s27, %s1537_s27  }
   0x3   : > { %p32_p1 = scmp.ge.s32.totalorder %s30_s30, 2  ;;  %p350_p2 = scmp.lt.s32.totalorder %s1344_s29, 3 }
   0x5   : > { %s1540_s30 = smov (%p32_p1, %s30_s30), 0  ;;  %p351_p3 = pnand %p1164_p0, %p350_p2 }
   0x6   : > { %v1310_v0 = vld [vmem:[%s1532_s6 + $0x8] sm:$0xff] (!%p351_p3)   ;;  %v1346_v1 = vmov (!%p351_p3), 0.0   ;;  %v1311_v2 = vld [vmem:[%s1532_s6] sm:$0xff] (!%p351_p3)   ;;  %vm1347_vm0 = vmmov (!%p351_p3), 0   ;;  %p423_p4 = scmp.lt.s32.totalorder (!%p351_p3), %s1336_s27, 1  ;;  %vm535_vm1 = vcmask (!%p351_p3), 130048  }
   0x7   : > { %354 = sbr.rel (%p351_p3) target bundleno = 273 (0x111), region = 52  ;;  %1230 = vmatprep.subr.bf16.mxu0 (!%p351_p3), %v1346_v1  ;;  %1236 = vmatprep.subr.bf16.mxu1 (!%p351_p3), %v1346_v1  ;;  %v1313_v3 = vld [vmem:[%s1532_s6 + $0x10] sm:$0xff] (!%p351_p3)   ;;  %v1314_v4 = vld [vmem:[%s1532_s6 + $0x18] sm:$0xff] (!%p351_p3)   ;;  %vm492_vm2 = vcmask (!%p351_p3), 1042432   ;;  %vm493_vm3 = vsmask.f32 (!%p351_p3), 2304 }
   0x8   : > { %1231 = vmatpush3.bf16.msra.mxu0 (!%p351_p3), %v1310_v0  ;;  %1232 = vmatprep.mubr.msk.bf16.mxu0 (!%p351_p3), %vm1347_vm0, %v1346_v1  ;;  %vm1453_vm4 = vmand (!%p351_p3), %vm492_vm2, %vm493_vm3  ;;  %v1317_v18 = vld [vmem:[%s1532_s6 + $0x28] sm:$0xff] (!%p351_p3)   ;;  %v1315_v20 = vld [vmem:[%s1532_s6 + $0x20] sm:$0xff] (!%p351_p3)   ;;  %vm1009_vm5 = vcmask (!%p351_p3), 256000  }
   0x9   : > { %1237 = vmatpush3.bf16.msra.mxu1 (!%p351_p3), %v1311_v2  ;;  %1238 = vmatprep.mubr.msk.bf16.mxu1 (!%p351_p3), %vm1347_vm0, %v1346_v1  ;;  %v1319_v26 = vld [vmem:[%s1532_s6 + $0x38] sm:$0xff] (!%p351_p3)   ;;  %v1318_v28 = vld [vmem:[%s1532_s6 + $0x30] sm:$0xff] (!%p351_p3)   ;;  %v1321_v34 = vld [vmem:[%s1532_s6 + $0x40] sm:$0xff] (!%p351_p3)  }
   0xa   : > { %1242 = vmatprep.subr.bf16.mxu0 (!%p351_p3), %v1346_v1  ;;  %1248 = vmatprep.subr.bf16.mxu1 (!%p351_p3), %v1346_v1 }
   0xe   : > { %s1542_s27 = smov (!%p423_p4, %s1336_s27), 1 }
   0xf   : > { %s1428_s15 = sshll.u32 %s1542_s27, 2 }
  0x10   : > { %s436_s20 = scalar_lea.vmem %s1527_s1, %s1428_s15  ;;  %s429_s23 = scalar_lea.vmem %s1526_s0, %s1428_s15 }
  0x11   : > { %v474_v5 = vld [vmem:[%s436_s20] sm:$0x7]  ;;  %s443_s26 = scalar_lea.vmem %s1528_s2, %s1428_s15  ;;  %s457_s14 = scalar_lea.vmem %s1530_s4, %s1428_s15 }
  0x12   : > { %v473_v6 = vld [vmem:[%s429_s23] sm:$0x7]  ;;  %1233 = vmatmul.mubr.msk.bf16.vlgmr.msra.gmra.mrb[0].mxu0 %vm535_vm1, %v474_v5  ;;  %s450_s18 = scalar_lea.vmem %s1529_s3, %s1428_s15  ;;  %s464_s25 = scalar_lea.vmem %s1531_s5, %s1428_s15 }
  0x13   : > { %v1172_v7 = vcombine.low %v473_v6, %v473_v6  ;;  %1239 = vmatmul.mubr.msk.bf16.vlgmr.msra.gmra.mrb[0].mxu1 %vm535_vm1, %v473_v6  ;;  %v475_v8 = vld [vmem:[%s443_s26] sm:$0x7]  ;;  %1243 = vmatpush3.bf16.msra.mxu0 %v1313_v3  ;;  %s471_s13 = scalar_lea.vmem %s1534_s8, %s1428_s15 }
  0x14   : > { %1249 = vmatpush3.bf16.msra.mxu1 %v1314_v4  ;;  %v1173_v9 = vcombine.low %v475_v8, %v475_v8  ;;  %1244 = vmatprep.mubr.msk.bf16.mxu0 %vm1347_vm0, %v1346_v1  ;;  %v477_v24 = vld [vmem:[%s457_s14] sm:$0x7] }
  0x15   : > { %v483_v10 = vshrl.u32 %v1172_v7, 16  ;;  %v485_v11 = vshll.u32 %v1172_v7, 16  ;;  %1254 = vmatprep.subr.bf16.mxu0 %v1346_v1  ;;  %1250 = vmatprep.mubr.msk.bf16.mxu1 %vm1347_vm0, %v1346_v1  ;;  %v476_v27 = vld [vmem:[%s450_s18] sm:$0x7]  ;;  %v1174_v29 = vcombine.low %v477_v24, %v477_v24 }
  0x16   : > { %v502_v12 = vshll.u32 %v1173_v9, 16  ;;  %1260 = vmatprep.subr.bf16.mxu1 %v1346_v1  ;;  %v500_v16 = vshrl.u32 %v1173_v9, 16  ;;  %v478_v31 = vld [vmem:[%s464_s25] sm:$0x7] }
  0x17   : > { %v487_v13 = vrot.slane %v485_v11, 1  ;;  %v490_v14 = vrot.slane %v485_v11, 6  ;;  %v516_v30 = vshll.u32 %v1174_v29, 16  ;;  %v514_v32 = vshrl.u32 %v1174_v29, 16 }
  0x18   : > { %v504_v17 = vrot.slane %v502_v12, 1  ;;  %v507_v23 = vrot.slane %v502_v12, 6 }
  0x19   : > { %v488_v19 = vor.u32 %v487_v13, %v483_v10  ;;  %v518_v33 = vrot.slane %v516_v30, 1  ;;  %v521_v36 = vrot.slane %v516_v30, 6 }
  0x1a   : > { %v505_v22 = vor.u32 %v504_v17, %v500_v16 }
  0x1b   : > { %v495_v21 = vsel %vm1453_vm4, %v488_v19, %v490_v14  ;;  %1251 = vmatmul.mubr.msk.bf16.vlgmr.msra.gmra.mrb[4].mxu1 %vm535_vm1, %v475_v8  ;;  %v519_v35 = vor.u32 %v518_v33, %v514_v32  ;;  %v1209_v14 = vld [vmem:[%s1533_s7] ss:$0 sm:$0xff] }
  0x1c   : > { %1245 = vmatmul.mubr.msk.bf16.vlgmr.msra.gmra.mrb[4].mxu0 %vm535_vm1, %v495_v21  ;;  %1261 = vmatpush3.bf16.msra.mxu1 %v1317_v18  ;;  %v509_v25 = vsel %vm1453_vm4, %v505_v22, %v507_v23 }
  0x1d   : > { %1255 = vmatpush3.bf16.msra.mxu0 %v1315_v20  ;;  %1256 = vmatprep.mubr.msk.bf16.mxu0 %vm1347_vm0, %v1346_v1  ;;  %v523_v37 = vsel %vm1453_vm4, %v519_v35, %v521_v36 }
  0x1e   : > { %1266 = vmatprep.subr.bf16.mxu0 %v1346_v1  ;;  %1262 = vmatprep.mubr.msk.bf16.mxu1 %vm1347_vm0, %v1346_v1 }
  0x1f   : > { %1272 = vmatprep.subr.bf16.mxu1 %v1346_v1 }
  0x23   : > { %1263 = vmatmul.mubr.msk.bf16.vlgmr.msra.gmra.mrb[8].mxu1 %vm535_vm1, %v509_v25 }
  0x24   : > { %1257 = vmatmul.mubr.msk.bf16.vlgmr.msra.gmra.mrb[8].mxu0 %vm535_vm1, %v476_v27  ;;  %1273 = vmatpush3.bf16.msra.mxu1 %v1319_v26 }
  0x25   : > { %1267 = vmatpush3.bf16.msra.mxu0 %v1318_v28  ;;  %1268 = vmatprep.mubr.msk.bf16.mxu0 %vm1347_vm0, %v1346_v1 }
  0x26   : > { %1278 = vmatprep.subr.bf16.mxu0 %v1346_v1  ;;  %1274 = vmatprep.mubr.msk.bf16.mxu1 %vm1347_vm0, %v1346_v1 }
  0x2b   : > { %1275 = vmatmul.mubr.msk.bf16.vlgmr.msra.gmra.mrb[12].mxu1 %vm535_vm1, %v478_v31 }
  0x2c   : > { %1269 = vmatmul.mubr.msk.bf16.vlgmr.msra.gmra.mrb[12].mxu0 %vm535_vm1, %v477_v24 }
  0x2d   : > { %1279 = vmatpush3.bf16.msra.mxu0 %v1321_v34  ;;  %1280 = vmatprep.mubr.msk.bf16.mxu0 %vm1347_vm0, %v1346_v1 }
  0x34   : > { %1281 = vmatmul.mubr.msk.bf16.vlgmr.msra.gmra.mrb[16].mxu0 %vm535_vm1, %v523_v37 }
  0xe5   : > { %v573_v38 = vpop.f32.mrb[0].mxu0 }
  0xe6   : > { %v622_v39 = vpop.f32.mrb[0].mxu1  ;;  %v1234_v40 = vpop.f32.mrb[1].mxu0 }
  0xe7   : > { %v623_v41 = vadd.f32 %v622_v39, %v573_v38  ;;  %v1240_v42 = vpop.f32.mrb[1].mxu1  ;;  %v576_v43 = vpop.f32.mrb[2].mxu0 }
  0xe8   : > { %v625_v44 = vpop.f32.mrb[2].mxu1  ;;  %v1235_v45 = vpop.f32.mrb[3].mxu0 }
  0xe9   : > { %v1241_v46 = vpop.f32.mrb[3].mxu1 }
  0xee   : > { %v727_v47 = vpop.f32.mrb[4].mxu1 }
  0xef   : > { %v674_v48 = vpop.f32.mrb[4].mxu0  ;;  %v1252_v49 = vpop.f32.mrb[5].mxu1 }
  0xf0   : > { %v680_v50 = vadd.f32 %v674_v48, %v623_v41  ;;  %v1246_v51 = vpop.f32.mrb[5].mxu0  ;;  %v730_v52 = vpop.f32.mrb[6].mxu1 }
  0xf1   : > { %v677_v53 = vpop.f32.mrb[6].mxu0  ;;  %v1253_v54 = vpop.f32.mrb[7].mxu1 }
  0xf2   : > { %v733_v55 = vadd.f32 %v727_v47, %v680_v50  ;;  %v1247_v56 = vpop.f32.mrb[7].mxu0 }
  0xf6   : > { %v833_v57 = vpop.f32.mrb[8].mxu1 }
  0xf7   : > { %v780_v58 = vpop.f32.mrb[8].mxu0  ;;  %v1264_v59 = vpop.f32.mrb[9].mxu1 }
  0xf8   : > { %v786_v60 = vadd.f32 %v780_v58, %v733_v55  ;;  %v1258_v61 = vpop.f32.mrb[9].mxu0  ;;  %v836_v62 = vpop.f32.mrb[10].mxu1 }
  0xf9   : > { %v783_v63 = vpop.f32.mrb[10].mxu0  ;;  %v1265_v0 = vpop.f32.mrb[11].mxu1 }
  0xfa   : > { %v839_v1 = vadd.f32 %v833_v57, %v786_v60  ;;  %v1259_v2 = vpop.f32.mrb[11].mxu0 }
  0xfe   : > { %v939_v3 = vpop.f32.mrb[12].mxu1 }
  0xff   : > { %v886_v4 = vpop.f32.mrb[12].mxu0  ;;  %v1276_v5 = vpop.f32.mrb[13].mxu1 }
 0x100   : > { %v892_v6 = vadd.f32 %v886_v4, %v839_v1  ;;  %v1270_v7 = vpop.f32.mrb[13].mxu0  ;;  %v942_v8 = vpop.f32.mrb[14].mxu1 }
 0x101   : > { %v889_v9 = vpop.f32.mrb[14].mxu0  ;;  %v1277_v10 = vpop.f32.mrb[15].mxu1 }
 0x102   : > { %v945_v11 = vadd.f32 %v939_v3, %v892_v6  ;;  %v1271_v12 = vpop.f32.mrb[15].mxu0 }
 0x107   : > { %v992_v13 = vpop.f32.mrb[16].mxu0 }
 0x108   : > { %v998_v15 = vadd.f32 %v992_v13, %v945_v11  ;;  %v1282_v16 = vpop.f32.mrb[17].mxu0 }
 0x109   : > { %v995_v17 = vpop.f32.mrb[18].mxu0 }
 0x10a   : > { %v1006_v18 = vadd.f32 %v1209_v14, %v998_v15  ;;  %v1283_v19 = vpop.f32.mrb[19].mxu0 }
 0x10c   : > { %v1007_v20 = vmax.f32 %v1006_v18, 0.0 }
 0x10e   : > { %v1008_v21 = vpack.c.bf16 %v1007_v20, %v1007_v20 }
 0x110   : > { %1010 = vst.msk [vmem:[%s471_s13] sm:$0x7] %vm1009_vm5, %v1008_v21 }
 0x111 PF: > { %s18_s29 = sadd.s32 1, %s1344_s29   ;;  %s1537_s27 = smov %s1340_s28 }
 0x112   : > { %p15_p5 = scmp.ge.s32.totalorder %s18_s29, 4   ;;  %s1538_s28 = smov %s1540_s30 }
 0x114   :  { %17 = sbr.rel (!%p15_p5) target bundleno = 2 (0x2), region = 105 }

// kernel: paramount_forward.5
= control target key start
LH: loop header
LB: loop body
LE: loop exit
PB: predicated region body
PF: predicated region fallthrough
CT: control target
= control target key end

     0   :  { %s2493_s27 = smov 0   ;;  %s2495_s28 = smov 0   ;;  %s2941_s0 = inlined_call_operand.vmem [shape: bf16[2,72,4], index: 0, kind: input, shape index: {}]   ;;  %s2942_s1 = inlined_call_operand.vmem [shape: bf16[2,72,4], index: 1, kind: input, shape index: {}]   ;;  %s2943_s2 = inlined_call_operand.vmem [shape: bf16[2,72,4], index: 2, kind: input, shape index: {}]   ;;  %s2944_s3 = inlined_call_operand.vmem [shape: bf16[2,72,4], index: 3, kind: input, shape index: {}]   ;;  %s2945_s4 = inlined_call_operand.vmem [shape: bf16[2,72,4], index: 4, kind: input, shape index: {}]   ;;  %s2946_s5 = inlined_call_operand.vmem [shape: bf16[2,72,4], index: 5, kind: input, shape index: {}]   ;;  %s2947_s6 = inlined_call_operand.vmem [shape: bf16[9,4,8], index: 6, kind: input, shape index: {}]   ;;  %s2948_s7 = inlined_call_operand.vmem [shape: f32[1,8], index: 7, kind: input, shape index: {}]   ;;  %s2949_s8 = inlined_call_operand.vmem [shape: bf16[2,72,8], index: 8, kind: output, shape index: {}]  }
   0x1   :  { %s2497_s29 = smov 0  }
   0x2 LB: > { %s30_s30 = sadd.s32 1, %s2440_s28  ;;  %p1993_p0 = scmp.ge.s32.totalorder %s2444_s29, 1  ;;  %s2444_s29 = sphi %s2497_s29, %s18_s29   ;;  %s2440_s28 = sphi %s2495_s28, %s2953_s28   ;;  %s2436_s27 = sphi %s2493_s27, %s2952_s27  }
   0x3   : > { %p32_p1 = scmp.ge.s32.totalorder %s30_s30, 2  ;;  %p368_p2 = scmp.lt.s32.totalorder %s2444_s29, 3 }
   0x5   : > { %s2955_s30 = smov (%p32_p1, %s30_s30), 0  ;;  %p369_p3 = pnand %p1993_p0, %p368_p2 }
   0x6   : > { %v2019_v0 = vld [vmem:[%s2947_s6 + $0x2] sm:$0x3] (!%p369_p3)  ;;  %vm836_vm0 = vcmask (!%p369_p3), 1041408   ;;  %p456_p4 = scmp.lt.s32.totalorder (!%p369_p3), %s2436_s27, 1  ;;  %v2446_v1 = vmov (!%p369_p3), 0.0   ;;  %vm2447_vm1 = vmmov (!%p369_p3), 0  }
   0x7   : > { %372 = sbr.rel (%p369_p3) target bundleno = 416 (0x1a0), region = 52  ;;  %2162 = vmatprep.subr.bf16.mxu0 (!%p369_p3), %v2446_v1  ;;  %2360 = vmatprep.subr.bf16.mxu1 (!%p369_p3), %v2446_v1  ;;  %v838_v2 = vsel (!%p369_p3), %vm836_vm0, %v2019_v0, 0  ;;  %v2035_v3 = vld [vmem:[%s2947_s6 + $0x4] sm:$0x3] (!%p369_p3)  ;;  %v794_v4 = vld [vmem:[%s2947_s6] sm:$0x3] (!%p369_p3) }
   0x8   : > { %2163 = vmatpush3.bf16.msra.mxu0 (!%p369_p3), %v838_v2  ;;  %2361 = vmatpush3.bf16.msra.mxu1 (!%p369_p3), %v838_v2  ;;  %vm820_vm2 = vcmask (!%p369_p3), 31744   ;;  %v1015_v6 = vsel (!%p369_p3), %vm836_vm0, %v2035_v3, 0  ;;  %v923_v8 = vsel (!%p369_p3), %vm836_vm0, %v794_v4, 0  ;;  %v2041_v16 = vld [vmem:[%s2947_s6 + $0x6] sm:$0x3] (!%p369_p3)  ;;  %vm650_vm5 = vcmask (!%p369_p3), 1043456  }
   0x9   : > { %2164 = vmatprep.mubr.msk.bf16.mxu0 (!%p369_p3), %vm2447_vm1, %v2446_v1  ;;  %2176 = vmatprep.mubr.msk.bf16.mxu1 (!%p369_p3), %vm2447_vm1, %v2446_v1  ;;  %v2047_v17 = vld [vmem:[%s2947_s6 + $0x8] sm:$0x3] (!%p369_p3)  ;;  %vm603_vm3 = vsmask.f32 (!%p369_p3), 7424  ;;  %v1111_v22 = vsel (!%p369_p3), %vm836_vm0, %v2041_v16, 0  ;;  %vm1802_vm7 = vcmask (!%p369_p3), 60416  }
   0xa   : > { %2206 = vmatprep.subr.bf16.mxu0 (!%p369_p3), %v2446_v1  ;;  %2184 = vmatprep.subr.bf16.mxu1 (!%p369_p3), %v2446_v1  ;;  %vm651_vm4 = vsmask.f32 (!%p369_p3), 3328  ;;  %v1235_v24 = vsel (!%p369_p3), %vm836_vm0, %v2047_v17, 0  ;;  %v2064_v61 = vld [vmem:[%s2947_s6 + $0xc] sm:$0x3] (!%p369_p3) }
   0xb   : > { %vm2676_vm6 = vmand (!%p369_p3), %vm650_vm5, %vm651_vm4 }
   0xe   : > { %s2957_s27 = smov (!%p456_p4, %s2436_s27), 1 }
   0xf   : > { %s2522_s11 = smul.u32 36, %s2957_s27 }
  0x11   : > { %s2535_s18 = scalar_lea.vmem %s2942_s1, %s2522_s11  ;;  %s2545_s21 = scalar_lea.vmem %s2941_s0, %s2522_s11 }
  0x12   : > { %v2389_v5 = vld [vmem:[%s2535_s18] sm:$0xff]   ;;  %v2390_v7 = vld [vmem:[%s2535_s18 + $0x18] sm:$0xff]   ;;  %v2391_v11 = vld [vmem:[%s2535_s18 + $0x8] sm:$0xff]   ;;  %s2573_s24 = scalar_lea.vmem %s2943_s2, %s2522_s11  ;;  %s2584_s10 = scalar_lea.vmem %s2944_s3, %s2522_s11 }
  0x13   : > { %2165 = vmatmul.mubr.msk.bf16.vlgmr.msra.gmra.mrb[0].mxu0 %vm820_vm2, %v2389_v5  ;;  %2177 = vmatmul.mubr.msk.bf16.vlgmr.msra.gmra.mrb[0].mxu1 %vm820_vm2, %v2390_v7  ;;  %v2552_v9 = vld [vmem:[%s2545_s21] sm:$0xf]  ;;  %v527_v10 = vld [vmem:[%s2545_s21 + $0x4] sm:$0xf]  ;;  %v2564_v14 = vld [vmem:[%s2545_s21 + $0x8] sm:$0xff]   ;;  %s2604_s16 = scalar_lea.vmem %s2945_s4, %s2522_s11  ;;  %s2650_s19 = scalar_lea.vmem %s2946_s5, %s2522_s11 }
  0x14   : > { %2207 = vmatpush3.bf16.msra.mxu0 %v1015_v6  ;;  %2185 = vmatpush3.bf16.msra.mxu1 %v923_v8  ;;  %v2392_v12 = vld [vmem:[%s2535_s18 + $0x20] ss:$0 sps:$4 sm:$0xff]   ;;  %v2001_v13 = vcombine.low %v2552_v9, %v527_v10  ;;  %v2393_v18 = vld [vmem:[%s2535_s18 + $0x10] sm:$0xff]   ;;  %v612_v19 = vshll.u32 %v2564_v14, 16  ;;  %v2610_v28 = vld [vmem:[%s2573_s24 + $0x18] sm:$0xff]   ;;  %v616_v33 = vshrl.u32 %v2564_v14, 16  ;;  %s2902_s14 = scalar_lea.vmem %s2949_s8, %s2522_s11 }
  0x15   : > { %2168 = vmatprep.mubr.msk.bf16.mxu0 %vm2447_vm1, %v2446_v1  ;;  %2180 = vmatprep.mubr.msk.bf16.mxu1 %vm2447_vm1, %v2446_v1  ;;  %v2593_v23 = vld [vmem:[%s2545_s21 + $0x10] sm:$0xff]   ;;  %v2615_v29 = vld [vmem:[%s2573_s24] sm:$0xf]  ;;  %v563_v35 = vld [vmem:[%s2604_s16 + $0x4] sm:$0xf]  ;;  %v701_v36 = vshll.u32 %v2610_v28, 16 }
  0x16   : > { %2228 = vmatprep.subr.bf16.mxu1 %v2446_v1  ;;  %2250 = vmatprep.subr.bf16.mxu0 %v2446_v1  ;;  %v607_v15 = vshll.u32 %v2001_v13, 16  ;;  %v605_v20 = vshrl.u32 %v2001_v13, 16  ;;  %v2598_v25 = vld [vmem:[%s2573_s24 + $0x10] sm:$0xff]   ;;  %v614_v26 = vrot.slane %v612_v19, 1  ;;  %v2618_v30 = vld [vmem:[%s2573_s24 + $0x20] ss:$0 sps:$4 sm:$0xff]   ;;  %v2012_v37 = vcombine.low %v2615_v29, %v2615_v29 }
  0x17   : > { %v693_v31 = vshll.u32 %v2598_v25, 16  ;;  %v697_v32 = vshrl.u32 %v2598_v25, 16  ;;  %v2625_v34 = vld [vmem:[%s2604_s16] sm:$0xf]  ;;  %v620_v38 = vshll.u32 %v2593_v23, 16  ;;  %v705_v40 = vshrl.u32 %v2610_v28, 16 }
  0x18   : > { %v609_v21 = vrot.slane %v607_v15, 1  ;;  %v709_v41 = vshll.u32 %v2618_v30, 16  ;;  %v703_v43 = vrot.slane %v701_v36, 1  ;;  %v2638_v44 = vld [vmem:[%s2604_s16 + $0x8] sm:$0xff]   ;;  %v713_v47 = vshrl.u32 %v2618_v30, 16  ;;  %v2643_v48 = vld [vmem:[%s2545_s21 + $0x18] sm:$0xff]  }
  0x19   : > { %v2632_v39 = vrot.slane %v693_v31, 1  ;;  %v755_v49 = vshll.u32 %v2638_v44, 16  ;;  %v719_v51 = vshll.u32 %v2012_v37, 16  ;;  %v622_v52 = vrot.slane %v620_v38, 1  ;;  %v2660_v55 = vld [vmem:[%s2604_s16 + $0x10] sm:$0xff]   ;;  %v2668_v60 = vld [vmem:[%s2604_s16 + $0x18] sm:$0xff]  }
  0x1a   : > { %v610_v27 = vor.u32 %v609_v21, %v605_v20  ;;  %v711_v46 = vrot.slane %v709_v41, 1  ;;  %v707_v50 = vor.u32 %v705_v40, %v703_v43  ;;  %v2654_v53 = vcombine.low %v2625_v34, %v563_v35  ;;  %v2398_v21 = vld [vmem:[%s2545_s21 + $0x20] ss:$0 sps:$4 sm:$0xff]  }
  0x1b   : > { %2169 = vmatmul.mubr.msk.bf16.gmra.mrb[4].mxu0 %vm820_vm2, %v2391_v11  ;;  %2181 = vmatmul.mubr.msk.bf16.gmra.mrb[4].mxu1 %vm820_vm2, %v2392_v12  ;;  %v699_v45 = vor.u32 %v697_v32, %v2632_v39  ;;  %v618_v57 = vor.u32 %v616_v33, %v614_v26  ;;  %v721_v59 = vrot.slane %v719_v51, 5  ;;  %v757_v0 = vrot.slane %v755_v49, 1  ;;  %v545_v51 = vld [vmem:[%s2573_s24 + $0x4] sm:$0xf] }
  0x1c   : > { %2172 = vmatprep.mubr.msk.bf16.mxu0 %vm2447_vm1, %v2446_v1  ;;  %2186 = vmatprep.mubr.msk.bf16.mxu1 %vm2447_vm1, %v2446_v1  ;;  %v615_v42 = vsel %vm603_vm3, %v610_v27, %v614_v26  ;;  %v715_v56 = vor.u32 %v713_v47, %v711_v46  ;;  %v2665_v58 = vsel %vm603_vm3, %v707_v50, %v711_v46  ;;  %v748_v62 = vshrl.u32 %v2654_v53, 16 }
  0x1d   : > { %v2657_v54 = vsel %vm603_vm3, %v699_v45, %v703_v43  ;;  %v750_v63 = vshll.u32 %v2654_v53, 16  ;;  %v759_v3 = vshrl.u32 %v2638_v44, 16  ;;  %v763_v4 = vshll.u32 %v2660_v55, 16 }
  0x1e   : > { %v2685_v2 = vsel %vm2676_vm6, %v715_v56, %v721_v59  ;;  %v624_v5 = vshrl.u32 %v2593_v23, 16  ;;  %v767_v7 = vshrl.u32 %v2660_v55, 16  ;;  %v771_v8 = vshll.u32 %v2668_v60, 16 }
  0x1f   : > { %v752_v6 = vrot.slane %v750_v63, 1  ;;  %v623_v10 = vsel %vm603_vm3, %v618_v57, %v622_v52  ;;  %v628_v11 = vshll.u32 %v2643_v48, 16  ;;  %v761_v12 = vor.u32 %v759_v3, %v757_v0  ;;  %v2406_v3 = vld [vmem:[%s2584_s10 + $0x10] sm:$0xff]  }
  0x20   : > { %v773_v15 = vrot.slane %v771_v8, 1  ;;  %v626_v19 = vor.u32 %v624_v5, %v622_v52  ;;  %v775_v26 = vshrl.u32 %v2668_v60, 16  ;;  %v632_v31 = vshrl.u32 %v2643_v48, 16  ;;  %v2058_v52 = vld [vmem:[%s2947_s6 + $0xa] sm:$0x3] }
  0x21   : > { %v630_v20 = vrot.slane %v628_v11, 1  ;;  %v636_v32 = vshll.u32 %v2398_v21, 16  ;;  %v2006_v36 = vcombine.low %v2552_v9, %v2552_v9  ;;  %v640_v46 = vshrl.u32 %v2398_v21, 16  ;;  %v2070_v11 = vld [vmem:[%s2947_s6 + $0xe] sm:$0x3] }
  0x22   : > { %v777_v33 = vor.u32 %v775_v26, %v773_v15  ;;  %v2007_v57 = vcombine.low %v2615_v29, %v545_v51  ;;  %v1336_v59 = vsel %vm836_vm0, %v2058_v52, 0  ;;  %v2402_v29 = vld [vmem:[%s2584_s10] sm:$0xff]   ;;  %v1432_v63 = vsel %vm836_vm0, %v2064_v61, 0 }
  0x23   : > { %2173 = vmatmul.mubr.msk.bf16.gmra.mrb[8].mxu0 %vm820_vm2, %v2393_v18  ;;  %2187 = vmatmul.mubr.msk.bf16.vlgmr.msra.gmra.mrb[8].mxu1 %vm820_vm2, %v2001_v13  ;;  %v765_v13 = vrot.slane %v763_v4, 1  ;;  %v634_v38 = vor.u32 %v632_v31, %v630_v20  ;;  %v638_v40 = vrot.slane %v636_v32, 1  ;;  %v646_v47 = vshll.u32 %v2006_v36, 16  ;;  %v2408_v4 = vld [vmem:[%s2584_s10 + $0x18] sm:$0xff]  }
  0x24   : > { %2208 = vmatprep.mubr.msk.bf16.mxu0 %vm2447_vm1, %v2446_v1  ;;  %2229 = vmatpush3.bf16.msra.mxu1 %v1111_v22 }
  0x25   : > { %2190 = vmatprep.mubr.msk.bf16.mxu1 %vm2447_vm1, %v2446_v1  ;;  %2272 = vmatprep.subr.bf16.mxu1 %v2446_v1  ;;  %v2695_v16 = vsel %vm603_vm3, %v761_v12, %v765_v13  ;;  %v769_v17 = vor.u32 %v767_v7, %v765_v13  ;;  %v639_v45 = vsel %vm603_vm3, %v634_v38, %v638_v40  ;;  %v648_v50 = vrot.slane %v646_v47, 5 }
  0x27   : > { %v2707_v22 = vsel %vm603_vm3, %v769_v17, %v773_v15  ;;  %v2081_v15 = vld [vmem:[%s2947_s6 + $0x10] sm:$0x3] }
  0x2b   : > { %2209 = vmatmul.mubr.msk.bf16.vlgmr.msra.gmra.mrb[12].mxu0 %vm820_vm2, %v615_v42  ;;  %2191 = vmatmul.mubr.msk.bf16.gmra.mrb[12].mxu1 %vm820_vm2, %v2564_v14  ;;  %v753_v14 = vor.u32 %v752_v6, %v748_v62  ;;  %v2018_v42 = vcombine.low %v2625_v34, %v2625_v34  ;;  %v642_v34 = vor.u32 %v640_v46, %v638_v40  ;;  %v2401_v62 = vld [vmem:[%s2573_s24 + $0x8] sm:$0xff]   ;;  %v678_v6 = vshrl.u32 %v2007_v57, 16 }
  0x2c   : > { %2251 = vmatpush3.bf16.msra.mxu0 %v1235_v24  ;;  %2194 = vmatprep.mubr.msk.bf16.mxu1 %vm2447_vm1, %v2446_v1  ;;  %v2712_v24 = vld [vmem:[%s2604_s16 + $0x20] ss:$0 sps:$4 sm:$0xff]   ;;  %v685_v5 = vshll.u32 %v2401_v62, 16  ;;  %v689_v13 = vshrl.u32 %v2401_v62, 16 }
  0x2d   : > { %2212 = vmatprep.mubr.msk.bf16.mxu0 %vm2447_vm1, %v2446_v1  ;;  %2294 = vmatprep.subr.bf16.mxu0 %v2446_v1  ;;  %v2699_v18 = vsel %vm603_vm3, %v753_v14, %v757_v0  ;;  %v779_v27 = vshll.u32 %v2712_v24, 16  ;;  %v783_v41 = vshrl.u32 %v2712_v24, 16  ;;  %v789_v43 = vshll.u32 %v2018_v42, 16  ;;  %v2404_v0 = vld [vmem:[%s2584_s10 + $0x8] sm:$0xff]  }
  0x2e   : > { %v653_v56 = vsel %vm2676_vm6, %v642_v34, %v648_v50  ;;  %v1556_v14 = vsel %vm836_vm0, %v2070_v11, 0 }
  0x2f   : > { %v781_v35 = vrot.slane %v779_v27, 1 }
  0x31   : > { %v2722_v37 = vsel %vm603_vm3, %v777_v33, %v781_v35  ;;  %v785_v9 = vor.u32 %v783_v41, %v781_v35 }
  0x33   : > { %2213 = vmatmul.mubr.msk.bf16.gmra.mrb[16].mxu0 %vm820_vm2, %v623_v10  ;;  %2195 = vmatmul.mubr.msk.bf16.gmra.mrb[16].mxu1 %vm820_vm2, %v2593_v23  ;;  %v631_v23 = vsel %vm603_vm3, %v626_v19, %v630_v20  ;;  %v2409_v10 = vld [vmem:[%s2584_s10 + $0x20] ss:$0 sps:$4 sm:$0xff]   ;;  %v1657_v19 = vsel %vm836_vm0, %v2081_v15, 0 }
  0x34   : > { %2216 = vmatprep.mubr.msk.bf16.mxu0 %vm2447_vm1, %v2446_v1  ;;  %2198 = vmatprep.mubr.msk.bf16.mxu1 %vm2447_vm1, %v2446_v1 }
  0x3b   : > { %2217 = vmatmul.mubr.msk.bf16.gmra.mrb[20].mxu0 %vm820_vm2, %v631_v23  ;;  %2199 = vmatmul.mubr.msk.bf16.gmra.mrb[20].mxu1 %vm820_vm2, %v2643_v48  ;;  %v791_v48 = vrot.slane %v789_v43, 5 }
  0x3c   : > { %2220 = vmatprep.mubr.msk.bf16.mxu0 %vm2447_vm1, %v2446_v1  ;;  %2202 = vmatprep.mubr.msk.bf16.mxu1 %vm2447_vm1, %v2446_v1 }
  0x3d   : > { %v2736_v49 = vsel %vm2676_vm6, %v785_v9, %v791_v48 }
  0x43   : > { %2221 = vmatmul.mubr.msk.bf16.gmra.mrb[24].mxu0 %vm820_vm2, %v639_v45  ;;  %2203 = vmatmul.mubr.msk.bf16.gmra.mrb[24].mxu1 %vm820_vm2, %v2398_v21 }
  0x44   : > { %2224 = vmatprep.mubr.msk.bf16.mxu0 %vm2447_vm1, %v2446_v1  ;;  %2230 = vmatprep.mubr.msk.bf16.mxu1 %vm2447_vm1, %v2446_v1 }
  0x4b   : > { %2225 = vmatmul.mubr.msk.bf16.gmra.mrb[28].mxu0 %vm820_vm2, %v653_v56  ;;  %2231 = vmatmul.mubr.msk.bf16.vlgmr.msra.gmra.mrb[28].mxu1 %vm820_vm2, %v2007_v57 }
  0x4c   : > { %2252 = vmatprep.mubr.msk.bf16.mxu0 %vm2447_vm1, %v2446_v1  ;;  %2273 = vmatpush3.bf16.msra.mxu1 %v1336_v59 }
  0x4d   : > { %2234 = vmatprep.mubr.msk.bf16.mxu1 %vm2447_vm1, %v2446_v1  ;;  %2316 = vmatprep.subr.bf16.mxu1 %v2446_v1 }
  0x53   : > { %2253 = vmatmul.mubr.msk.bf16.vlgmr.msra.gmra.mrb[32].mxu0 %vm820_vm2, %v2402_v29  ;;  %2235 = vmatmul.mubr.msk.bf16.gmra.mrb[32].mxu1 %vm820_vm2, %v2401_v62 }
  0x54   : > { %2295 = vmatpush3.bf16.msra.mxu0 %v1432_v63  ;;  %2238 = vmatprep.mubr.msk.bf16.mxu1 %vm2447_vm1, %v2446_v1 }
  0x55   : > { %2256 = vmatprep.mubr.msk.bf16.mxu0 %vm2447_vm1, %v2446_v1  ;;  %2338 = vmatprep.subr.bf16.mxu0 %v2446_v1 }
  0x5b   : > { %2257 = vmatmul.mubr.msk.bf16.gmra.mrb[36].mxu0 %vm820_vm2, %v2404_v0  ;;  %2239 = vmatmul.mubr.msk.bf16.gmra.mrb[36].mxu1 %vm820_vm2, %v2598_v25  ;;  %v680_v25 = vshll.u32 %v2007_v57, 16 }
  0x5c   : > { %2260 = vmatprep.mubr.msk.bf16.mxu0 %vm2447_vm1, %v2446_v1  ;;  %2242 = vmatprep.mubr.msk.bf16.mxu1 %vm2447_vm1, %v2446_v1 }
  0x5d   : > { %v682_v7 = vrot.slane %v680_v25, 1 }
  0x5f   : > { %v683_v8 = vor.u32 %v682_v7, %v678_v6 }
  0x63   : > { %2261 = vmatmul.mubr.msk.bf16.gmra.mrb[40].mxu0 %vm820_vm2, %v2406_v3  ;;  %2243 = vmatmul.mubr.msk.bf16.gmra.mrb[40].mxu1 %vm820_vm2, %v2610_v28  ;;  %v687_v28 = vrot.slane %v685_v5, 1 }
  0x64   : > { %2264 = vmatprep.mubr.msk.bf16.mxu0 %vm2447_vm1, %v2446_v1  ;;  %2246 = vmatprep.mubr.msk.bf16.mxu1 %vm2447_vm1, %v2446_v1 }
  0x65   : > { %v688_v12 = vsel %vm603_vm3, %v683_v8, %v687_v28 }
  0x6b   : > { %2265 = vmatmul.mubr.msk.bf16.gmra.mrb[44].mxu0 %vm820_vm2, %v2408_v4  ;;  %2247 = vmatmul.mubr.msk.bf16.gmra.mrb[44].mxu1 %vm820_vm2, %v2618_v30  ;;  %v691_v30 = vor.u32 %v689_v13, %v687_v28 }
  0x6c   : > { %2268 = vmatprep.mubr.msk.bf16.mxu0 %vm2447_vm1, %v2446_v1  ;;  %2274 = vmatprep.mubr.msk.bf16.mxu1 %vm2447_vm1, %v2446_v1 }
  0x6d   : > { %v696_v17 = vsel %vm603_vm3, %v691_v30, %v2632_v39  ;;  %v2416_v39 = vld [vmem:[%s2650_s19] sm:$0xff]  }
  0x73   : > { %2269 = vmatmul.mubr.msk.bf16.gmra.mrb[48].mxu0 %vm820_vm2, %v2409_v10  ;;  %2275 = vmatmul.mubr.msk.bf16.vlgmr.msra.gmra.mrb[48].mxu1 %vm820_vm2, %v688_v12 }
  0x74   : > { %2296 = vmatprep.mubr.msk.bf16.mxu0 %vm2447_vm1, %v2446_v1  ;;  %2317 = vmatpush3.bf16.msra.mxu1 %v1556_v14 }
  0x75   : > { %2278 = vmatprep.mubr.msk.bf16.mxu1 %vm2447_vm1, %v2446_v1 }
  0x7b   : > { %2297 = vmatmul.mubr.msk.bf16.vlgmr.msra.gmra.mrb[52].mxu0 %vm820_vm2, %v2654_v53  ;;  %2279 = vmatmul.mubr.msk.bf16.gmra.mrb[52].mxu1 %vm820_vm2, %v696_v17  ;;  %v2418_v53 = vld [vmem:[%s2650_s19 + $0x10] sm:$0xff]  }
  0x7c   : > { %2339 = vmatpush3.bf16.msra.mxu0 %v1657_v19  ;;  %2282 = vmatprep.mubr.msk.bf16.mxu1 %vm2447_vm1, %v2446_v1 }
  0x7d   : > { %2300 = vmatprep.mubr.msk.bf16.mxu0 %vm2447_vm1, %v2446_v1 }
  0x83   : > { %2301 = vmatmul.mubr.msk.bf16.gmra.mrb[56].mxu0 %vm820_vm2, %v2638_v44  ;;  %2283 = vmatmul.mubr.msk.bf16.gmra.mrb[56].mxu1 %vm820_vm2, %v2657_v54  ;;  %v2417_v44 = vld [vmem:[%s2650_s19 + $0x8] sm:$0xff]   ;;  %v2419_v54 = vld [vmem:[%s2650_s19 + $0x18] sm:$0xff]  }
  0x84   : > { %2304 = vmatprep.mubr.msk.bf16.mxu0 %vm2447_vm1, %v2446_v1  ;;  %2286 = vmatprep.mubr.msk.bf16.mxu1 %vm2447_vm1, %v2446_v1 }
  0x8b   : > { %2305 = vmatmul.mubr.msk.bf16.gmra.mrb[60].mxu0 %vm820_vm2, %v2660_v55  ;;  %2287 = vmatmul.mubr.msk.bf16.gmra.mrb[60].mxu1 %vm820_vm2, %v2665_v58  ;;  %v2420_v55 = vld [vmem:[%s2650_s19 + $0x20] ss:$0 sps:$4 sm:$0xff]  }
  0x8c   : > { %2308 = vmatprep.mubr.msk.bf16.mxu0 %vm2447_vm1, %v2446_v1  ;;  %2290 = vmatprep.mubr.msk.bf16.mxu1 %vm2447_vm1, %v2446_v1 }
  0x93   : > { %2309 = vmatmul.mubr.msk.bf16.gmra.mrb[64].mxu0 %vm820_vm2, %v2668_v60  ;;  %2291 = vmatmul.mubr.msk.bf16.gmra.mrb[64].mxu1 %vm820_vm2, %v2685_v2 }
  0x94   : > { %2312 = vmatprep.mubr.msk.bf16.mxu0 %vm2447_vm1, %v2446_v1  ;;  %2318 = vmatprep.mubr.msk.bf16.mxu1 %vm2447_vm1, %v2446_v1 }
  0x9b   : > { %2313 = vmatmul.mubr.msk.bf16.gmra.mrb[68].mxu0 %vm820_vm2, %v2712_v24  ;;  %2319 = vmatmul.mubr.msk.bf16.vlgmr.msra.gmra.mrb[68].mxu1 %vm820_vm2, %v2416_v39 }
  0x9c   : > { %2340 = vmatprep.mubr.msk.bf16.mxu0 %vm2447_vm1, %v2446_v1  ;;  %2322 = vmatprep.mubr.msk.bf16.mxu1 %vm2447_vm1, %v2446_v1 }
  0xa3   : > { %2341 = vmatmul.mubr.msk.bf16.vlgmr.msra.gmra.mrb[72].mxu0 %vm820_vm2, %v2699_v18  ;;  %2323 = vmatmul.mubr.msk.bf16.gmra.mrb[72].mxu1 %vm820_vm2, %v2417_v44 }
  0xa4   : > { %2344 = vmatprep.mubr.msk.bf16.mxu0 %vm2447_vm1, %v2446_v1  ;;  %2326 = vmatprep.mubr.msk.bf16.mxu1 %vm2447_vm1, %v2446_v1 }
  0xab   : > { %2345 = vmatmul.mubr.msk.bf16.gmra.mrb[76].mxu0 %vm820_vm2, %v2695_v16  ;;  %2327 = vmatmul.mubr.msk.bf16.gmra.mrb[76].mxu1 %vm820_vm2, %v2418_v53 }
  0xac   : > { %2348 = vmatprep.mubr.msk.bf16.mxu0 %vm2447_vm1, %v2446_v1  ;;  %2330 = vmatprep.mubr.msk.bf16.mxu1 %vm2447_vm1, %v2446_v1 }
  0xb3   : > { %2349 = vmatmul.mubr.msk.bf16.gmra.mrb[80].mxu0 %vm820_vm2, %v2707_v22  ;;  %2331 = vmatmul.mubr.msk.bf16.gmra.mrb[80].mxu1 %vm820_vm2, %v2419_v54 }
  0xb4   : > { %2352 = vmatprep.mubr.msk.bf16.mxu0 %vm2447_vm1, %v2446_v1  ;;  %2334 = vmatprep.mubr.msk.bf16.mxu1 %vm2447_vm1, %v2446_v1 }
  0xbb   : > { %2353 = vmatmul.mubr.msk.bf16.gmra.mrb[84].mxu0 %vm820_vm2, %v2722_v37  ;;  %2335 = vmatmul.mubr.msk.bf16.gmra.mrb[84].mxu1 %vm820_vm2, %v2420_v55 }
  0xbc   : > { %2356 = vmatprep.mubr.msk.bf16.mxu0 %vm2447_vm1, %v2446_v1 }
  0xc3   : > { %2357 = vmatmul.mubr.msk.bf16.gmra.mrb[88].mxu0 %vm820_vm2, %v2736_v49 }
  0xe6   : > { %v874_v58 = vpop.f32.mrb[0].mxu0  ;;  %v898_v2 = vpop.f32.mrb[0].mxu1 }
  0xe7   : > { %v2166_v60 = vpop.f32.mrb[1].mxu0  ;;  %v2178_v18 = vpop.f32.mrb[1].mxu1 }
  0xe8   : > { %v877_v16 = vpop.f32.mrb[2].mxu0  ;;  %v901_v21 = vpop.f32.mrb[2].mxu1 }
  0xe9   : > { %v2167_v20 = vpop.f32.mrb[3].mxu0  ;;  %v2179_v22 = vpop.f32.mrb[3].mxu1 }
  0xee   : > { %v882_v24 = vpop.f32.mrb[4].mxu0  ;;  %v906_v27 = vpop.f32.mrb[4].mxu1 }
  0xef   : > { %v2170_v26 = vpop.f32.mrb[5].mxu0  ;;  %v2182_v31 = vpop.f32.mrb[5].mxu1 }
  0xf0   : > { %v885_v23 = vpop.f32.mrb[6].mxu0  ;;  %v909_v33 = vpop.f32.mrb[6].mxu1 }
  0xf1   : > { %v2171_v32 = vpop.f32.mrb[7].mxu0  ;;  %v2183_v35 = vpop.f32.mrb[7].mxu1 }
  0xf6   : > { %v890_v1 = vpop.f32.mrb[8].mxu0  ;;  %v959_v36 = vpop.f32.mrb[8].mxu1 }
  0xf7   : > { %v2174_v37 = vpop.f32.mrb[9].mxu0  ;;  %v960_v38 = vadd.f32 %v959_v36, %v874_v58  ;;  %v2188_v40 = vpop.f32.mrb[9].mxu1 }
  0xf8   : > { %v893_v41 = vpop.f32.mrb[10].mxu0  ;;  %v962_v42 = vpop.f32.mrb[10].mxu1 }
  0xf9   : > { %v2175_v9 = vpop.f32.mrb[11].mxu0  ;;  %v963_v43 = vadd.f32 %v962_v42, %v877_v16  ;;  %v2189_v45 = vpop.f32.mrb[11].mxu1 }
  0xfe   : > { %v1051_v46 = vpop.f32.mrb[12].mxu0  ;;  %v967_v47 = vpop.f32.mrb[12].mxu1 }
  0xff   : > { %v1089_v48 = vadd.f32 %v1051_v46, %v960_v38  ;;  %v2210_v49 = vpop.f32.mrb[13].mxu0  ;;  %v968_v34 = vadd.f32 %v967_v47, %v882_v24  ;;  %v2192_v50 = vpop.f32.mrb[13].mxu1 }
 0x100   : > { %v1054_v51 = vpop.f32.mrb[14].mxu0  ;;  %v970_v52 = vpop.f32.mrb[14].mxu1 }
 0x101   : > { %v1090_v56 = vadd.f32 %v1054_v51, %v963_v43  ;;  %v2211_v57 = vpop.f32.mrb[15].mxu0  ;;  %v971_v59 = vadd.f32 %v970_v52, %v885_v23  ;;  %v2193_v61 = vpop.f32.mrb[15].mxu1 }
 0x106   : > { %v1059_v29 = vpop.f32.mrb[16].mxu0  ;;  %v975_v62 = vpop.f32.mrb[16].mxu1 }
 0x107   : > { %v1091_v63 = vadd.f32 %v1059_v29, %v968_v34  ;;  %v2214_v0 = vpop.f32.mrb[17].mxu0  ;;  %v976_v3 = vadd.f32 %v975_v62, %v890_v1  ;;  %v2196_v25 = vpop.f32.mrb[17].mxu1 }
 0x108   : > { %v1062_v4 = vpop.f32.mrb[18].mxu0  ;;  %v978_v5 = vpop.f32.mrb[18].mxu1 }
 0x109   : > { %v1092_v6 = vadd.f32 %v1062_v4, %v971_v59  ;;  %v2215_v7 = vpop.f32.mrb[19].mxu0  ;;  %v979_v28 = vadd.f32 %v978_v5, %v893_v41  ;;  %v2197_v8 = vpop.f32.mrb[19].mxu1 }
 0x10e   : > { %v1067_v10 = vpop.f32.mrb[20].mxu0  ;;  %v983_v11 = vpop.f32.mrb[20].mxu1 }
 0x10f   : > { %v1093_v12 = vadd.f32 %v1067_v10, %v976_v3  ;;  %v2218_v13 = vpop.f32.mrb[21].mxu0  ;;  %v984_v14 = vadd.f32 %v983_v11, %v898_v2  ;;  %v2200_v30 = vpop.f32.mrb[21].mxu1 }
 0x110   : > { %v1070_v15 = vpop.f32.mrb[22].mxu0  ;;  %v986_v17 = vpop.f32.mrb[22].mxu1 }
 0x111   : > { %v1094_v19 = vadd.f32 %v1070_v15, %v979_v28  ;;  %v2219_v39 = vpop.f32.mrb[23].mxu0  ;;  %v987_v44 = vadd.f32 %v986_v17, %v901_v21  ;;  %v2201_v53 = vpop.f32.mrb[23].mxu1 }
 0x116   : > { %v1075_v54 = vpop.f32.mrb[24].mxu0  ;;  %v991_v55 = vpop.f32.mrb[24].mxu1 }
 0x117   : > { %v1095_v58 = vadd.f32 %v1075_v54, %v984_v14  ;;  %v2222_v60 = vpop.f32.mrb[25].mxu0  ;;  %v992_v16 = vadd.f32 %v991_v55, %v906_v27  ;;  %v2204_v20 = vpop.f32.mrb[25].mxu1 }
 0x118   : > { %v1078_v18 = vpop.f32.mrb[26].mxu0  ;;  %v994_v26 = vpop.f32.mrb[26].mxu1 }
 0x119   : > { %v1096_v22 = vadd.f32 %v1078_v18, %v987_v44  ;;  %v2223_v24 = vpop.f32.mrb[27].mxu0  ;;  %v2205_v23 = vpop.f32.mrb[27].mxu1 }
 0x11e   : > { %v1083_v31 = vpop.f32.mrb[28].mxu0  ;;  %v1147_v32 = vpop.f32.mrb[28].mxu1 }
 0x11f   : > { %v1097_v2 = vadd.f32 %v1083_v31, %v992_v16  ;;  %v2226_v33 = vpop.f32.mrb[29].mxu0  ;;  %v1185_v35 = vadd.f32 %v1147_v32, %v1089_v48  ;;  %v2232_v1 = vpop.f32.mrb[29].mxu1 }
 0x120   : > { %v1086_v36 = vpop.f32.mrb[30].mxu0  ;;  %v1150_v21 = vpop.f32.mrb[30].mxu1 }
 0x121   : > { %v2227_v37 = vpop.f32.mrb[31].mxu0  ;;  %v1186_v38 = vadd.f32 %v1150_v21, %v1090_v56  ;;  %v2233_v40 = vpop.f32.mrb[31].mxu1 }
 0x126   : > { %v1271_v41 = vpop.f32.mrb[32].mxu0  ;;  %v1155_v42 = vpop.f32.mrb[32].mxu1 }
 0x127   : > { %v1309_v27 = vadd.f32 %v1271_v41, %v1185_v35  ;;  %v2254_v9 = vpop.f32.mrb[33].mxu0  ;;  %v1187_v43 = vadd.f32 %v1155_v42, %v1091_v63  ;;  %v2236_v45 = vpop.f32.mrb[33].mxu1 }
 0x128   : > { %v1274_v46 = vpop.f32.mrb[34].mxu0  ;;  %v1158_v47 = vpop.f32.mrb[34].mxu1 }
 0x129   : > { %v1310_v49 = vadd.f32 %v1274_v46, %v1186_v38  ;;  %v2255_v34 = vpop.f32.mrb[35].mxu0  ;;  %v1188_v50 = vadd.f32 %v1158_v47, %v1092_v6  ;;  %v2237_v51 = vpop.f32.mrb[35].mxu1 }
 0x12e   : > { %v1279_v52 = vpop.f32.mrb[36].mxu0  ;;  %v1163_v48 = vpop.f32.mrb[36].mxu1 }
 0x12f   : > { %v1311_v57 = vadd.f32 %v1279_v52, %v1187_v43  ;;  %v2258_v59 = vpop.f32.mrb[37].mxu0  ;;  %v1189_v61 = vadd.f32 %v1163_v48, %v1093_v12  ;;  %v2240_v29 = vpop.f32.mrb[37].mxu1 }
 0x130   : > { %v1282_v56 = vpop.f32.mrb[38].mxu0  ;;  %v1166_v62 = vpop.f32.mrb[38].mxu1 }
 0x131   : > { %v1312_v0 = vadd.f32 %v1282_v56, %v1188_v50  ;;  %v2259_v3 = vpop.f32.mrb[39].mxu0  ;;  %v1190_v25 = vadd.f32 %v1166_v62, %v1094_v19  ;;  %v2241_v4 = vpop.f32.mrb[39].mxu1 }
 0x136   : > { %v1287_v63 = vpop.f32.mrb[40].mxu0  ;;  %v1171_v5 = vpop.f32.mrb[40].mxu1 }
 0x137   : > { %v1313_v7 = vadd.f32 %v1287_v63, %v1189_v61  ;;  %v2262_v28 = vpop.f32.mrb[41].mxu0  ;;  %v1191_v8 = vadd.f32 %v1171_v5, %v1095_v58  ;;  %v2244_v10 = vpop.f32.mrb[41].mxu1 }
 0x138   : > { %v1290_v6 = vpop.f32.mrb[42].mxu0  ;;  %v1174_v11 = vpop.f32.mrb[42].mxu1 }
 0x139   : > { %v1314_v13 = vadd.f32 %v1290_v6, %v1190_v25  ;;  %v2263_v14 = vpop.f32.mrb[43].mxu0  ;;  %v1192_v30 = vadd.f32 %v1174_v11, %v1096_v22  ;;  %v2245_v15 = vpop.f32.mrb[43].mxu1 }
 0x13e   : > { %v1295_v12 = vpop.f32.mrb[44].mxu0  ;;  %v1179_v17 = vpop.f32.mrb[44].mxu1 }
 0x13f   : > { %v1315_v39 = vadd.f32 %v1295_v12, %v1191_v8  ;;  %v2266_v44 = vpop.f32.mrb[45].mxu0  ;;  %v1193_v53 = vadd.f32 %v1179_v17, %v1097_v2  ;;  %v2248_v19 = vpop.f32.mrb[45].mxu1 }
 0x140   : > { %v1298_v54 = vpop.f32.mrb[46].mxu0  ;;  %v1182_v16 = vpop.f32.mrb[46].mxu1 }
 0x141   : > { %v1316_v55 = vadd.f32 %v1298_v54, %v1192_v30  ;;  %v2267_v60 = vpop.f32.mrb[47].mxu0  ;;  %v2249_v18 = vpop.f32.mrb[47].mxu1 }
 0x146   : > { %v1303_v20 = vpop.f32.mrb[48].mxu0  ;;  %v1372_v24 = vpop.f32.mrb[48].mxu1 }
 0x147   : > { %v1317_v58 = vadd.f32 %v1303_v20, %v1193_v53  ;;  %v2270_v26 = vpop.f32.mrb[49].mxu0  ;;  %v1410_v23 = vadd.f32 %v1372_v24, %v1309_v27  ;;  %v2276_v31 = vpop.f32.mrb[49].mxu1 }
 0x148   : > { %v1306_v32 = vpop.f32.mrb[50].mxu0  ;;  %v1375_v22 = vpop.f32.mrb[50].mxu1 }
 0x149   : > { %v2271_v33 = vpop.f32.mrb[51].mxu0  ;;  %v1411_v35 = vadd.f32 %v1375_v22, %v1310_v49  ;;  %v2277_v1 = vpop.f32.mrb[51].mxu1  ;;  %v2894_v32 = vld [vmem:[%s2948_s7] ss:$0 sm:$0xff] }
 0x14e   : > { %v1468_v36 = vpop.f32.mrb[52].mxu0  ;;  %v1380_v21 = vpop.f32.mrb[52].mxu1 }
 0x14f   : > { %v1506_v2 = vadd.f32 %v1468_v36, %v1410_v23  ;;  %v2298_v37 = vpop.f32.mrb[53].mxu0  ;;  %v1412_v38 = vadd.f32 %v1380_v21, %v1311_v57  ;;  %v2280_v40 = vpop.f32.mrb[53].mxu1 }
 0x150   : > { %v1471_v41 = vpop.f32.mrb[54].mxu0  ;;  %v1383_v42 = vpop.f32.mrb[54].mxu1 }
 0x151   : > { %v1507_v9 = vadd.f32 %v1471_v41, %v1411_v35  ;;  %v2299_v43 = vpop.f32.mrb[55].mxu0  ;;  %v1413_v45 = vadd.f32 %v1383_v42, %v1312_v0  ;;  %v2281_v46 = vpop.f32.mrb[55].mxu1 }
 0x156   : > { %v1476_v47 = vpop.f32.mrb[56].mxu0  ;;  %v1388_v27 = vpop.f32.mrb[56].mxu1 }
 0x157   : > { %v1508_v34 = vadd.f32 %v1476_v47, %v1412_v38  ;;  %v2302_v50 = vpop.f32.mrb[57].mxu0  ;;  %v1414_v51 = vadd.f32 %v1388_v27, %v1313_v7  ;;  %v2284_v52 = vpop.f32.mrb[57].mxu1 }
 0x158   : > { %v1479_v49 = vpop.f32.mrb[58].mxu0  ;;  %v1391_v48 = vpop.f32.mrb[58].mxu1 }
 0x159   : > { %v1509_v59 = vadd.f32 %v1479_v49, %v1413_v45  ;;  %v2303_v61 = vpop.f32.mrb[59].mxu0  ;;  %v1415_v29 = vadd.f32 %v1391_v48, %v1314_v13  ;;  %v2285_v56 = vpop.f32.mrb[59].mxu1 }
 0x15e   : > { %v1484_v57 = vpop.f32.mrb[60].mxu0  ;;  %v1396_v62 = vpop.f32.mrb[60].mxu1 }
 0x15f   : > { %v1510_v3 = vadd.f32 %v1484_v57, %v1414_v51  ;;  %v2306_v25 = vpop.f32.mrb[61].mxu0  ;;  %v1416_v4 = vadd.f32 %v1396_v62, %v1315_v39  ;;  %v2288_v63 = vpop.f32.mrb[61].mxu1 }
 0x160   : > { %v1487_v0 = vpop.f32.mrb[62].mxu0  ;;  %v1399_v5 = vpop.f32.mrb[62].mxu1 }
 0x161   : > { %v1511_v28 = vadd.f32 %v1487_v0, %v1415_v29  ;;  %v2307_v8 = vpop.f32.mrb[63].mxu0  ;;  %v1417_v10 = vadd.f32 %v1399_v5, %v1316_v55  ;;  %v2289_v6 = vpop.f32.mrb[63].mxu1 }
 0x166   : > { %v1492_v7 = vpop.f32.mrb[64].mxu0  ;;  %v1404_v11 = vpop.f32.mrb[64].mxu1 }
 0x167   : > { %v2885_v14 = vadd.f32 %v1492_v7, %v1416_v4  ;;  %v2310_v30 = vpop.f32.mrb[65].mxu0  ;;  %v1418_v15 = vadd.f32 %v1404_v11, %v1317_v58  ;;  %v2292_v12 = vpop.f32.mrb[65].mxu1 }
 0x168   : > { %v1495_v13 = vpop.f32.mrb[66].mxu0  ;;  %v1407_v53 = vpop.f32.mrb[66].mxu1 }
 0x169   : > { %v2887_v17 = vadd.f32 %v1495_v13, %v1417_v10  ;;  %v2311_v44 = vpop.f32.mrb[67].mxu0  ;;  %v2293_v39 = vpop.f32.mrb[67].mxu1 }
 0x16e   : > { %v1500_v54 = vpop.f32.mrb[68].mxu0  ;;  %v1592_v60 = vpop.f32.mrb[68].mxu1 }
 0x16f   : > { %v2889_v19 = vadd.f32 %v1500_v54, %v1418_v15  ;;  %v2314_v16 = vpop.f32.mrb[69].mxu0  ;;  %v1630_v55 = vadd.f32 %v1592_v60, %v1506_v2  ;;  %v2320_v18 = vpop.f32.mrb[69].mxu1 }
 0x170   : > { %v1503_v20 = vpop.f32.mrb[70].mxu0  ;;  %v1595_v24 = vpop.f32.mrb[70].mxu1 }
 0x171   : > { %v2315_v26 = vpop.f32.mrb[71].mxu0  ;;  %v1631_v23 = vadd.f32 %v1595_v24, %v1507_v9  ;;  %v2321_v31 = vpop.f32.mrb[71].mxu1 }
 0x176   : > { %v1693_v58 = vpop.f32.mrb[72].mxu0  ;;  %v1600_v22 = vpop.f32.mrb[72].mxu1 }
 0x177   : > { %v1731_v33 = vadd.f32 %v1693_v58, %v1630_v55  ;;  %v2342_v35 = vpop.f32.mrb[73].mxu0  ;;  %v1632_v1 = vadd.f32 %v1600_v22, %v1508_v34  ;;  %v2324_v36 = vpop.f32.mrb[73].mxu1 }
 0x178   : > { %v1696_v21 = vpop.f32.mrb[74].mxu0  ;;  %v1603_v37 = vpop.f32.mrb[74].mxu1 }
 0x179   : > { %v1747_v2 = vadd.f32 %v2894_v32, %v1731_v33  ;;  %v1732_v38 = vadd.f32 %v1696_v21, %v1631_v23  ;;  %v2343_v40 = vpop.f32.mrb[75].mxu0  ;;  %v1633_v41 = vadd.f32 %v1603_v37, %v1509_v59  ;;  %v2325_v42 = vpop.f32.mrb[75].mxu1 }
 0x17b   : > { %v1756_v9 = vmax.f32 %v1747_v2, 0.0  ;;  %v1748_v43 = vadd.f32 %v2894_v32, %v1732_v38 }
 0x17d   : > { %v2099_v45 = vpack.c.bf16 %v1756_v9, %v1756_v9  ;;  %v1757_v46 = vmax.f32 %v1748_v43, 0.0 }
 0x17e   : > { %v1701_v47 = vpop.f32.mrb[76].mxu0  ;;  %v1608_v34 = vpop.f32.mrb[76].mxu1 }
 0x17f   : > { %1803 = vst.msk [vmem:[%s2902_s14] sm:$0xf] %vm1802_vm7, %v2099_v45  ;;  %v2100_v27 = vpack.c.bf16 %v1757_v46, %v1757_v46  ;;  %v1733_v50 = vadd.f32 %v1701_v47, %v1632_v1  ;;  %v2346_v51 = vpop.f32.mrb[77].mxu0  ;;  %v1634_v52 = vadd.f32 %v1608_v34, %v1510_v3  ;;  %v2328_v49 = vpop.f32.mrb[77].mxu1 }
 0x180   : > { %v1704_v48 = vpop.f32.mrb[78].mxu0  ;;  %v1611_v61 = vpop.f32.mrb[78].mxu1 }
 0x181   : > { %1804 = vst.msk [vmem:[%s2902_s14 + $0x4] sm:$0xf] %vm1802_vm7, %v2100_v27  ;;  %v1749_v59 = vadd.f32 %v2894_v32, %v1733_v50  ;;  %v1734_v29 = vadd.f32 %v1704_v48, %v1633_v41  ;;  %v2347_v56 = vpop.f32.mrb[79].mxu0  ;;  %v1635_v57 = vadd.f32 %v1611_v61, %v1511_v28  ;;  %v2329_v62 = vpop.f32.mrb[79].mxu1 }
 0x183   : > { %v1758_v25 = vmax.f32 %v1749_v59, 0.0  ;;  %v1750_v4 = vadd.f32 %v2894_v32, %v1734_v29 }
 0x185   : > { %v2101_v63 = vpack.c.bf16 %v1758_v25, %v1758_v25  ;;  %v1759_v0 = vmax.f32 %v1750_v4, 0.0 }
 0x186   : > { %v1709_v5 = vpop.f32.mrb[80].mxu0  ;;  %v1616_v8 = vpop.f32.mrb[80].mxu1 }
 0x187   : > { %1805 = vst.msk [vmem:[%s2902_s14 + $0x8] sm:$0xf] %vm1802_vm7, %v2101_v63  ;;  %v2102_v3 = vpack.c.bf16 %v1759_v0, %v1759_v0  ;;  %v1735_v10 = vadd.f32 %v1709_v5, %v1634_v52  ;;  %v2350_v6 = vpop.f32.mrb[81].mxu0  ;;  %v1636_v7 = vadd.f32 %v1616_v8, %v2885_v14  ;;  %v2332_v11 = vpop.f32.mrb[81].mxu1 }
 0x188   : > { %v1712_v30 = vpop.f32.mrb[82].mxu0  ;;  %v1619_v15 = vpop.f32.mrb[82].mxu1 }
 0x189   : > { %1806 = vst.msk [vmem:[%s2902_s14 + $0xc] sm:$0xf] %vm1802_vm7, %v2102_v3  ;;  %v1751_v28 = vadd.f32 %v2894_v32, %v1735_v10  ;;  %v1736_v13 = vadd.f32 %v1712_v30, %v1635_v57  ;;  %v2351_v12 = vpop.f32.mrb[83].mxu0  ;;  %v1637_v44 = vadd.f32 %v1619_v15, %v2887_v17  ;;  %v2333_v53 = vpop.f32.mrb[83].mxu1 }
 0x18b   : > { %v1760_v39 = vmax.f32 %v1751_v28, 0.0  ;;  %v1752_v54 = vadd.f32 %v2894_v32, %v1736_v13 }
 0x18d   : > { %v2103_v60 = vpack.c.bf16 %v1760_v39, %v1760_v39  ;;  %v1761_v16 = vmax.f32 %v1752_v54, 0.0 }
 0x18e   : > { %v1717_v55 = vpop.f32.mrb[84].mxu0  ;;  %v1624_v18 = vpop.f32.mrb[84].mxu1 }
 0x18f   : > { %1807 = vst.msk [vmem:[%s2902_s14 + $0x10] sm:$0xf] %vm1802_vm7, %v2103_v60  ;;  %v2104_v14 = vpack.c.bf16 %v1761_v16, %v1761_v16  ;;  %v1737_v20 = vadd.f32 %v1717_v55, %v1636_v7  ;;  %v2354_v24 = vpop.f32.mrb[85].mxu0  ;;  %v1638_v26 = vadd.f32 %v1624_v18, %v2889_v19  ;;  %v2336_v31 = vpop.f32.mrb[85].mxu1 }
 0x190   : > { %v1720_v23 = vpop.f32.mrb[86].mxu0  ;;  %v1627_v33 = vpop.f32.mrb[86].mxu1 }
 0x191   : > { %1808 = vst.msk [vmem:[%s2902_s14 + $0x14] sm:$0xf] %vm1802_vm7, %v2104_v14  ;;  %v1753_v17 = vadd.f32 %v2894_v32, %v1737_v20  ;;  %v1738_v58 = vadd.f32 %v1720_v23, %v1637_v44  ;;  %v2355_v22 = vpop.f32.mrb[87].mxu0  ;;  %v2337_v35 = vpop.f32.mrb[87].mxu1 }
 0x193   : > { %v1762_v1 = vmax.f32 %v1753_v17, 0.0  ;;  %v1754_v36 = vadd.f32 %v2894_v32, %v1738_v58 }
 0x195   : > { %v2105_v21 = vpack.c.bf16 %v1762_v1, %v1762_v1  ;;  %v1763_v2 = vmax.f32 %v1754_v36, 0.0 }
 0x196   : > { %v1725_v37 = vpop.f32.mrb[88].mxu0 }
 0x197   : > { %1809 = vst.msk [vmem:[%s2902_s14 + $0x18] sm:$0xf] %vm1802_vm7, %v2105_v21  ;;  %v2106_v19 = vpack.c.bf16 %v1763_v2, %v1763_v2  ;;  %v1739_v38 = vadd.f32 %v1725_v37, %v1638_v26  ;;  %v2358_v40 = vpop.f32.mrb[89].mxu0 }
 0x198   : > { %v1728_v41 = vpop.f32.mrb[90].mxu0 }
 0x199   : > { %1810 = vst.msk [vmem:[%s2902_s14 + $0x1c] sm:$0xf] %vm1802_vm7, %v2106_v19  ;;  %v1755_v42 = vadd.f32 %v2894_v32, %v1739_v38  ;;  %v2359_v9 = vpop.f32.mrb[91].mxu0 }
 0x19b   : > { %v1764_v43 = vmax.f32 %v1755_v42, 0.0 }
 0x19d   : > { %v2107_v45 = vpack.c.bf16 %v1764_v43, %v1764_v43 }
 0x19f   : > { %1811 = vst.msk [vmem:[%s2902_s14 + $0x20] sm:$0xf] %vm1802_vm7, %v2107_v45 }
 0x1a0 PF: > { %s18_s29 = sadd.s32 1, %s2444_s29   ;;  %s2952_s27 = smov %s2440_s28 }
 0x1a1   : > { %p15_p5 = scmp.ge.s32.totalorder %s18_s29, 4   ;;  %s2953_s28 = smov %s2955_s30 }
 0x1a3   :  { %17 = sbr.rel (!%p15_p5) target bundleno = 2 (0x2), region = 105 }

// kernel: paramount_forward.8
= control target key start
LH: loop header
LB: loop body
LE: loop exit
PB: predicated region body
PF: predicated region fallthrough
CT: control target
= control target key end

     0   :  { %s1498_s27 = smov 0   ;;  %s1500_s28 = smov 0   ;;  %s1675_s0 = inlined_call_operand.vmem [shape: bf16[2,2,32], index: 0, kind: input, shape index: {}]   ;;  %s1676_s1 = inlined_call_operand.vmem [shape: bf16[2,2,32], index: 1, kind: input, shape index: {}]   ;;  %s1677_s2 = inlined_call_operand.vmem [shape: bf16[2,2,32], index: 2, kind: input, shape index: {}]   ;;  %s1678_s3 = inlined_call_operand.vmem [shape: bf16[2,2,32], index: 3, kind: input, shape index: {}]   ;;  %s1679_s4 = inlined_call_operand.vmem [shape: bf16[2,2,32], index: 4, kind: input, shape index: {}]   ;;  %s1680_s5 = inlined_call_operand.vmem [shape: bf16[2,2,32], index: 5, kind: input, shape index: {}]   ;;  %s1681_s6 = inlined_call_operand.vmem [shape: bf16[9,32,32], index: 6, kind: input, shape index: {}]   ;;  %s1682_s7 = inlined_call_operand.vmem [shape: f32[1,32], index: 7, kind: input, shape index: {}]   ;;  %s1683_s8 = inlined_call_operand.vmem [shape: bf16[2,2,32], index: 8, kind: output, shape index: {}]  }
   0x1   :  { %s1502_s29 = smov 0  }
   0x2 LB: > { %s30_s30 = sadd.s32 1, %s1444_s28  ;;  %p1219_p0 = scmp.ge.s32.totalorder %s1448_s29, 1  ;;  %s1448_s29 = sphi %s1502_s29, %s18_s29   ;;  %s1444_s28 = sphi %s1500_s28, %s1687_s28   ;;  %s1440_s27 = sphi %s1498_s27, %s1686_s27  }
   0x3   : > { %p32_p1 = scmp.ge.s32.totalorder %s30_s30, 2  ;;  %p344_p2 = scmp.lt.s32.totalorder %s1448_s29, 3 }
   0x5   : > { %s1689_s30 = smov (%p32_p1, %s30_s30), 0  ;;  %p345_p3 = pnand %p1219_p0, %p344_p2 }
   0x6   : > { %v1408_v0 = vld [vmem:[%s1681_s6 + $0x10] sm:$0xff] (!%p345_p3)   ;;  %v1450_v1 = vmov (!%p345_p3), 0.0   ;;  %v1409_v2 = vld [vmem:[%s1681_s6] sm:$0xff] (!%p345_p3)   ;;  %v463_v3 = vlaneseq (!%p345_p3)  ;;  %v1410_v4 = vld [vmem:[%s1681_s6 + $0x18] sm:$0xff] (!%p345_p3)   ;;  %vm1451_vm0 = vmmov (!%p345_p3), 0   ;;  %p410_p4 = scmp.lt.s32.totalorder (!%p345_p3), %s1440_s27, 1 }
   0x7   : > { %348 = sbr.rel (%p345_p3) target bundleno = 270 (0x10e), region = 52  ;;  %1309 = vmatprep.subr.bf16.mxu0 (!%p345_p3), %v1450_v1  ;;  %1317 = vmatprep.subr.bf16.mxu1 (!%p345_p3), %v1450_v1  ;;  %v1411_v5 = vld [vmem:[%s1681_s6 + $0x8] sm:$0xff] (!%p345_p3)   ;;  %v1452_v6 = vmov (!%p345_p3), 1966171168   ;;  %v1412_v9 = vld [vmem:[%s1681_s6 + $0x20] sm:$0xff] (!%p345_p3)   ;;  %vm552_vm1 = vcmask (!%p345_p3), 261120  }
   0x8   : > { %1310 = vmatpush3.bf16.msra.mxu0 (!%p345_p3), %v1408_v0  ;;  %1313 = vmatprep.mubr.msk.bf16.mxu0 (!%p345_p3), %vm1451_vm0, %v1450_v1  ;;  %v461_v7 = vunpack.c.l.s4 (!%p345_p3), %v1452_v6  ;;  %v464_v8 = vshrl.u32 (!%p345_p3), %v463_v3, 7  ;;  %v1413_v10 = vld [vmem:[%s1681_s6 + $0x30] sm:$0xff] (!%p345_p3)   ;;  %v1414_v15 = vld [vmem:[%s1681_s6 + $0x28] sm:$0xff] (!%p345_p3)   ;;  %v1415_v16 = vld [vmem:[%s1681_s6 + $0x38] sm:$0xff] (!%p345_p3)   ;;  %vm481_vm2 = vcmask (!%p345_p3), 1040384   ;;  %vm1088_vm5 = vcmask (!%p345_p3), 253952  }
   0x9   : > { %1318 = vmatpush3.bf16.msra.mxu1 (!%p345_p3), %v1409_v2  ;;  %1311 = vmatprep.subr.bf16.mxu0 (!%p345_p3), %v1450_v1  ;;  %vm482_vm3 = vsmask.f32 (!%p345_p3), 256  ;;  %v1416_v24 = vld [vmem:[%s1681_s6 + $0x40] sm:$0xff] (!%p345_p3)   ;;  %v1417_v26 = vld [vmem:[%s1681_s6 + $0x50] sm:$0xff] (!%p345_p3)   ;;  %v1418_v28 = vld [vmem:[%s1681_s6 + $0x48] sm:$0xff] (!%p345_p3)  }
   0xa   : > { %1319 = vmatprep.subr.bf16.mxu1 (!%p345_p3), %v1450_v1  ;;  %1321 = vmatprep.mubr.msk.bf16.mxu1 (!%p345_p3), %vm1451_vm0, %v1450_v1  ;;  %v462_v13 = vunpack.c.0.s8 (!%p345_p3), %v461_v7  ;;  %vm1577_vm4 = vmand (!%p345_p3), %vm481_vm2, %vm482_vm3  ;;  %v1419_v29 = vld [vmem:[%s1681_s6 + $0x58] sm:$0xff] (!%p345_p3)   ;;  %v1420_v33 = vld [vmem:[%s1681_s6 + $0x60] sm:$0xff] (!%p345_p3)  }
   0xb   : > { %v1421_v35 = vld [vmem:[%s1681_s6 + $0x70] sm:$0xff] (!%p345_p3)   ;;  %v1422_v37 = vld [vmem:[%s1681_s6 + $0x68] sm:$0xff] (!%p345_p3)   ;;  %v1423_v38 = vld [vmem:[%s1681_s6 + $0x78] sm:$0xff] (!%p345_p3)  }
   0xc   : > { %1312 = vmatpush3.bf16.msra.mxu0 (!%p345_p3), %v1410_v4  ;;  %v1559_v14 = vsub.s32 (!%p345_p3), %v462_v13, %v464_v8  ;;  %v1424_v41 = vld [vmem:[%s1681_s6 + $0x80] sm:$0xff] (!%p345_p3)   ;;  %v1425_v43 = vld [vmem:[%s1681_s6 + $0x88] sm:$0xff] (!%p345_p3)  }
   0xd   : > { %1320 = vmatpush3.bf16.msra.mxu1 (!%p345_p3), %v1411_v5  ;;  %1325 = vmatprep.subr.bf16.mxu0 (!%p345_p3), %v1450_v1 }
   0xe   : > { %s1691_s27 = smov (!%p410_p4, %s1440_s27), 1  ;;  %1333 = vmatprep.subr.bf16.mxu1 %v1450_v1 }
   0xf   : > { %s421_s21 = scalar_lea.vmem %s1676_s1, %s1691_s27  ;;  %s415_s24 = scalar_lea.vmem %s1675_s0, %s1691_s27 }
  0x10   : > { %v454_v11 = vld [vmem:[%s421_s21] sm:$0x1]  ;;  %s427_s11 = scalar_lea.vmem %s1677_s2, %s1691_s27  ;;  %s433_s26 = scalar_lea.vmem %s1678_s3, %s1691_s27 }
  0x11   : > { %v453_v12 = vld [vmem:[%s415_s24] sm:$0x1]  ;;  %1314 = vmatmul.mubr.msk.bf16.vlgmr.msra.gmra.mrb[0].mxu0 %vm552_vm1, %v454_v11  ;;  %s445_s22 = scalar_lea.vmem %s1680_s5, %s1691_s27  ;;  %s451_s13 = scalar_lea.vmem %s1683_s8, %s1691_s27 }
  0x12   : > { %1322 = vmatmul.mubr.msk.bf16.vlgmr.msra.gmra.mrb[0].mxu1 %vm552_vm1, %v453_v12  ;;  %1326 = vmatpush3.bf16.msra.mxu0 %v1412_v9  ;;  %v455_v17 = vld [vmem:[%s427_s11] sm:$0x1]  ;;  %v466_v18 = vrot.slane %v453_v12, %v1559_v14  ;;  %s439_s11 = scalar_lea.vmem %s1679_s4, %s1691_s27 }
  0x13   : > { %1334 = vmatpush3.bf16.msra.mxu1 %v1413_v10  ;;  %1327 = vmatprep.subr.bf16.mxu0 %v1450_v1  ;;  %v492_v19 = vrot.slane %v455_v17, %v1559_v14  ;;  %v456_v32 = vld [vmem:[%s433_s26] sm:$0x1] }
  0x14   : > { %1335 = vmatprep.subr.bf16.mxu1 %v1450_v1  ;;  %1329 = vmatprep.mubr.msk.bf16.mxu0 %vm1451_vm0, %v1450_v1  ;;  %v473_v20 = vrot.slane %v466_v18, %v1559_v14  ;;  %v457_v36 = vld [vmem:[%s439_s11] sm:$0x1] }
  0x15   : > { %1337 = vmatprep.mubr.msk.bf16.mxu1 %vm1451_vm0, %v1450_v1  ;;  %v499_v25 = vrot.slane %v492_v19, %v1559_v14  ;;  %v515_v39 = vrot.slane %v457_v36, %v1559_v14  ;;  %v458_v42 = vld [vmem:[%s445_s22] sm:$0x1] }
  0x16   : > { %1328 = vmatpush3.bf16.msra.mxu0 %v1414_v15  ;;  %v475_v22 = vshrl.u32 %v473_v20, 16  ;;  %v478_v23 = vshll.u32 %v473_v20, 16 }
  0x17   : > { %1336 = vmatpush3.bf16.msra.mxu1 %v1415_v16  ;;  %1341 = vmatprep.subr.bf16.mxu0 %v1450_v1  ;;  %v501_v30 = vshrl.u32 %v499_v25, 16  ;;  %v504_v31 = vshll.u32 %v499_v25, 16  ;;  %v522_v40 = vrot.slane %v515_v39, %v1559_v14 }
  0x18   : > { %1349 = vmatprep.subr.bf16.mxu1 %v1450_v1  ;;  %v484_v27 = vsel %vm1577_vm4, %v475_v22, %v478_v23  ;;  %v1279_v23 = vld [vmem:[%s1682_s7] ss:$0 sm:$0xff] }
  0x19   : > { %1330 = vmatmul.mubr.msk.bf16.vlgmr.msra.gmra.mrb[4].mxu0 %vm552_vm1, %v484_v27  ;;  %v507_v34 = vsel %vm1577_vm4, %v501_v30, %v504_v31  ;;  %v524_v44 = vshrl.u32 %v522_v40, 16  ;;  %v527_v45 = vshll.u32 %v522_v40, 16 }
  0x1a   : > { %1338 = vmatmul.mubr.msk.bf16.vlgmr.msra.gmra.mrb[4].mxu1 %vm552_vm1, %v455_v17  ;;  %1342 = vmatpush3.bf16.msra.mxu0 %v1416_v24 }
  0x1b   : > { %1350 = vmatpush3.bf16.msra.mxu1 %v1417_v26  ;;  %1343 = vmatprep.subr.bf16.mxu0 %v1450_v1  ;;  %v530_v46 = vsel %vm1577_vm4, %v524_v44, %v527_v45 }
  0x1c   : > { %1351 = vmatprep.subr.bf16.mxu1 %v1450_v1  ;;  %1345 = vmatprep.mubr.msk.bf16.mxu0 %vm1451_vm0, %v1450_v1 }
  0x1d   : > { %1353 = vmatprep.mubr.msk.bf16.mxu1 %vm1451_vm0, %v1450_v1 }
  0x1e   : > { %1344 = vmatpush3.bf16.msra.mxu0 %v1418_v28 }
  0x1f   : > { %1352 = vmatpush3.bf16.msra.mxu1 %v1419_v29  ;;  %1357 = vmatprep.subr.bf16.mxu0 %v1450_v1 }
  0x20   : > { %1365 = vmatprep.subr.bf16.mxu1 %v1450_v1 }
  0x21   : > { %1346 = vmatmul.mubr.msk.bf16.vlgmr.msra.gmra.mrb[8].mxu0 %vm552_vm1, %v456_v32 }
  0x22   : > { %1354 = vmatmul.mubr.msk.bf16.vlgmr.msra.gmra.mrb[8].mxu1 %vm552_vm1, %v507_v34  ;;  %1358 = vmatpush3.bf16.msra.mxu0 %v1420_v33 }
  0x23   : > { %1366 = vmatpush3.bf16.msra.mxu1 %v1421_v35  ;;  %1359 = vmatprep.subr.bf16.mxu0 %v1450_v1 }
  0x24   : > { %1367 = vmatprep.subr.bf16.mxu1 %v1450_v1  ;;  %1361 = vmatprep.mubr.msk.bf16.mxu0 %vm1451_vm0, %v1450_v1 }
  0x25   : > { %1369 = vmatprep.mubr.msk.bf16.mxu1 %vm1451_vm0, %v1450_v1 }
  0x26   : > { %1360 = vmatpush3.bf16.msra.mxu0 %v1422_v37 }
  0x27   : > { %1368 = vmatpush3.bf16.msra.mxu1 %v1423_v38  ;;  %1373 = vmatprep.subr.bf16.mxu0 %v1450_v1 }
  0x29   : > { %1362 = vmatmul.mubr.msk.bf16.vlgmr.msra.gmra.mrb[12].mxu0 %vm552_vm1, %v457_v36 }
  0x2a   : > { %1370 = vmatmul.mubr.msk.bf16.vlgmr.msra.gmra.mrb[12].mxu1 %vm552_vm1, %v458_v42  ;;  %1374 = vmatpush3.bf16.msra.mxu0 %v1424_v41 }
  0x2b   : > { %1377 = vmatprep.mubr.msk.bf16.mxu0 %vm1451_vm0, %v1450_v1  ;;  %1375 = vmatprep.subr.bf16.mxu0 %v1450_v1 }
  0x2e   : > { %1376 = vmatpush3.bf16.msra.mxu0 %v1425_v43 }
  0x31   : > { %1378 = vmatmul.mubr.msk.bf16.vlgmr.msra.gmra.mrb[16].mxu0 %vm552_vm1, %v530_v46 }
  0xe4   : > { %v590_v47 = vpop.f32.mrb[0].mxu0 }
  0xe5   : > { %v1315_v48 = vpop.f32.mrb[1].mxu0  ;;  %v645_v49 = vpop.f32.mrb[0].mxu1 }
  0xe6   : > { %v646_v50 = vadd.f32 %v645_v49, %v590_v47  ;;  %v593_v51 = vpop.f32.mrb[2].mxu0  ;;  %v1323_v52 = vpop.f32.mrb[1].mxu1 }
  0xe7   : > { %v1316_v53 = vpop.f32.mrb[3].mxu0  ;;  %v648_v54 = vpop.f32.mrb[2].mxu1 }
  0xe8   : > { %v1324_v55 = vpop.f32.mrb[3].mxu1 }
  0xec   : > { %v705_v56 = vpop.f32.mrb[4].mxu0 }
  0xed   : > { %v766_v57 = vpop.f32.mrb[4].mxu1  ;;  %v711_v58 = vadd.f32 %v705_v56, %v646_v50  ;;  %v1331_v59 = vpop.f32.mrb[5].mxu0 }
  0xee   : > { %v1339_v60 = vpop.f32.mrb[5].mxu1  ;;  %v708_v61 = vpop.f32.mrb[6].mxu0 }
  0xef   : > { %v769_v62 = vpop.f32.mrb[6].mxu1  ;;  %v772_v63 = vadd.f32 %v766_v57, %v711_v58  ;;  %v1332_v0 = vpop.f32.mrb[7].mxu0 }
  0xf0   : > { %v1340_v1 = vpop.f32.mrb[7].mxu1 }
  0xf4   : > { %v827_v2 = vpop.f32.mrb[8].mxu0 }
  0xf5   : > { %v888_v3 = vpop.f32.mrb[8].mxu1  ;;  %v833_v4 = vadd.f32 %v827_v2, %v772_v63  ;;  %v1347_v5 = vpop.f32.mrb[9].mxu0 }
  0xf6   : > { %v1355_v6 = vpop.f32.mrb[9].mxu1  ;;  %v830_v7 = vpop.f32.mrb[10].mxu0 }
  0xf7   : > { %v891_v8 = vpop.f32.mrb[10].mxu1  ;;  %v894_v9 = vadd.f32 %v888_v3, %v833_v4  ;;  %v1348_v10 = vpop.f32.mrb[11].mxu0 }
  0xf8   : > { %v1356_v11 = vpop.f32.mrb[11].mxu1 }
  0xfc   : > { %v949_v12 = vpop.f32.mrb[12].mxu0 }
  0xfd   : > { %v1010_v13 = vpop.f32.mrb[12].mxu1  ;;  %v955_v14 = vadd.f32 %v949_v12, %v894_v9  ;;  %v1363_v15 = vpop.f32.mrb[13].mxu0 }
  0xfe   : > { %v1371_v16 = vpop.f32.mrb[13].mxu1  ;;  %v952_v17 = vpop.f32.mrb[14].mxu0 }
  0xff   : > { %v1013_v18 = vpop.f32.mrb[14].mxu1  ;;  %v1016_v19 = vadd.f32 %v1010_v13, %v955_v14  ;;  %v1364_v20 = vpop.f32.mrb[15].mxu0 }
 0x100   : > { %v1372_v21 = vpop.f32.mrb[15].mxu1 }
 0x104   : > { %v1071_v22 = vpop.f32.mrb[16].mxu0 }
 0x105   : > { %v1077_v24 = vadd.f32 %v1071_v22, %v1016_v19  ;;  %v1379_v25 = vpop.f32.mrb[17].mxu0 }
 0x106   : > { %v1074_v26 = vpop.f32.mrb[18].mxu0 }
 0x107   : > { %v1085_v27 = vadd.f32 %v1279_v23, %v1077_v24  ;;  %v1380_v28 = vpop.f32.mrb[19].mxu0 }
 0x109   : > { %v1086_v29 = vmax.f32 %v1085_v27, 0.0 }
 0x10b   : > { %v1087_v30 = vpack.c.bf16 %v1086_v29, %v1086_v29 }
 0x10d   : > { %1089 = vst.msk [vmem:[%s451_s13] sm:$0x1] %vm1088_vm5, %v1087_v30 }
 0x10e PF: > { %s18_s29 = sadd.s32 1, %s1448_s29   ;;  %s1686_s27 = smov %s1444_s28 }
 0x10f   : > { %p15_p5 = scmp.ge.s32.totalorder %s18_s29, 4   ;;  %s1687_s28 = smov %s1689_s30 }
 0x111   :  { %17 = sbr.rel (!%p15_p5) target bundleno = 2 (0x2), region = 105 }

// kernel: paramount_forward.9
= control target key start
LH: loop header
LB: loop body
LE: loop exit
PB: predicated region body
PF: predicated region fallthrough
CT: control target
= control target key end

     0   :  { %s1498_s27 = smov 0   ;;  %s1500_s28 = smov 0   ;;  %s1675_s0 = inlined_call_operand.vmem [shape: bf16[2,2,32], index: 0, kind: input, shape index: {}]   ;;  %s1676_s1 = inlined_call_operand.vmem [shape: bf16[2,2,32], index: 1, kind: input, shape index: {}]   ;;  %s1677_s2 = inlined_call_operand.vmem [shape: bf16[2,2,32], index: 2, kind: input, shape index: {}]   ;;  %s1678_s3 = inlined_call_operand.vmem [shape: bf16[2,2,32], index: 3, kind: input, shape index: {}]   ;;  %s1679_s4 = inlined_call_operand.vmem [shape: bf16[2,2,32], index: 4, kind: input, shape index: {}]   ;;  %s1680_s5 = inlined_call_operand.vmem [shape: bf16[2,2,32], index: 5, kind: input, shape index: {}]   ;;  %s1681_s6 = inlined_call_operand.vmem [shape: bf16[9,32,64], index: 6, kind: input, shape index: {}]   ;;  %s1682_s7 = inlined_call_operand.vmem [shape: f32[1,64], index: 7, kind: input, shape index: {}]   ;;  %s1683_s8 = inlined_call_operand.vmem [shape: bf16[2,2,64], index: 8, kind: output, shape index: {}]  }
   0x1   :  { %s1502_s29 = smov 0  }
   0x2 LB: > { %s30_s30 = sadd.s32 1, %s1444_s28  ;;  %p1219_p0 = scmp.ge.s32.totalorder %s1448_s29, 1  ;;  %s1448_s29 = sphi %s1502_s29, %s18_s29   ;;  %s1444_s28 = sphi %s1500_s28, %s1687_s28   ;;  %s1440_s27 = sphi %s1498_s27, %s1686_s27  }
   0x3   : > { %p32_p1 = scmp.ge.s32.totalorder %s30_s30, 2  ;;  %p344_p2 = scmp.lt.s32.totalorder %s1448_s29, 3 }
   0x5   : > { %s1689_s30 = smov (%p32_p1, %s30_s30), 0  ;;  %p345_p3 = pnand %p1219_p0, %p344_p2 }
   0x6   : > { %v1408_v0 = vld [vmem:[%s1681_s6 + $0x10] sm:$0xff] (!%p345_p3)   ;;  %v1450_v1 = vmov (!%p345_p3), 0.0   ;;  %v1409_v2 = vld [vmem:[%s1681_s6] sm:$0xff] (!%p345_p3)   ;;  %v463_v3 = vlaneseq (!%p345_p3)  ;;  %v1410_v4 = vld [vmem:[%s1681_s6 + $0x18] sm:$0xff] (!%p345_p3)   ;;  %vm1451_vm0 = vmmov (!%p345_p3), 0   ;;  %p410_p4 = scmp.lt.s32.totalorder (!%p345_p3), %s1440_s27, 1 }
   0x7   : > { %348 = sbr.rel (%p345_p3) target bundleno = 270 (0x10e), region = 52  ;;  %1309 = vmatprep.subr.bf16.mxu0 (!%p345_p3), %v1450_v1  ;;  %1317 = vmatprep.subr.bf16.mxu1 (!%p345_p3), %v1450_v1  ;;  %v1411_v5 = vld [vmem:[%s1681_s6 + $0x8] sm:$0xff] (!%p345_p3)   ;;  %v1452_v6 = vmov (!%p345_p3), 1966171168   ;;  %v1412_v9 = vld [vmem:[%s1681_s6 + $0x20] sm:$0xff] (!%p345_p3)   ;;  %vm552_vm1 = vcmask (!%p345_p3), 261120  }
   0x8   : > { %1310 = vmatpush3.bf16.msra.mxu0 (!%p345_p3), %v1408_v0  ;;  %1313 = vmatprep.mubr.msk.bf16.mxu0 (!%p345_p3), %vm1451_vm0, %v1450_v1  ;;  %v461_v7 = vunpack.c.l.s4 (!%p345_p3), %v1452_v6  ;;  %v464_v8 = vshrl.u32 (!%p345_p3), %v463_v3, 7  ;;  %v1413_v10 = vld [vmem:[%s1681_s6 + $0x30] sm:$0xff] (!%p345_p3)   ;;  %v1414_v15 = vld [vmem:[%s1681_s6 + $0x28] sm:$0xff] (!%p345_p3)   ;;  %v1415_v16 = vld [vmem:[%s1681_s6 + $0x38] sm:$0xff] (!%p345_p3)   ;;  %vm481_vm2 = vcmask (!%p345_p3), 1040384   ;;  %vm1088_vm5 = vcmask (!%p345_p3), 516096  }
   0x9   : > { %1318 = vmatpush3.bf16.msra.mxu1 (!%p345_p3), %v1409_v2  ;;  %1311 = vmatprep.subr.bf16.mxu0 (!%p345_p3), %v1450_v1  ;;  %vm482_vm3 = vsmask.f32 (!%p345_p3), 256  ;;  %v1416_v24 = vld [vmem:[%s1681_s6 + $0x40] sm:$0xff] (!%p345_p3)   ;;  %v1417_v26 = vld [vmem:[%s1681_s6 + $0x50] sm:$0xff] (!%p345_p3)   ;;  %v1418_v28 = vld [vmem:[%s1681_s6 + $0x48] sm:$0xff] (!%p345_p3)  }
   0xa   : > { %1319 = vmatprep.subr.bf16.mxu1 (!%p345_p3), %v1450_v1  ;;  %1321 = vmatprep.mubr.msk.bf16.mxu1 (!%p345_p3), %vm1451_vm0, %v1450_v1  ;;  %v462_v13 = vunpack.c.0.s8 (!%p345_p3), %v461_v7  ;;  %vm1577_vm4 = vmand (!%p345_p3), %vm481_vm2, %vm482_vm3  ;;  %v1419_v29 = vld [vmem:[%s1681_s6 + $0x58] sm:$0xff] (!%p345_p3)   ;;  %v1420_v33 = vld [vmem:[%s1681_s6 + $0x60] sm:$0xff] (!%p345_p3)  }
   0xb   : > { %v1421_v35 = vld [vmem:[%s1681_s6 + $0x70] sm:$0xff] (!%p345_p3)   ;;  %v1422_v37 = vld [vmem:[%s1681_s6 + $0x68] sm:$0xff] (!%p345_p3)   ;;  %v1423_v38 = vld [vmem:[%s1681_s6 + $0x78] sm:$0xff] (!%p345_p3)  }
   0xc   : > { %1312 = vmatpush3.bf16.msra.mxu0 (!%p345_p3), %v1410_v4  ;;  %v1559_v14 = vsub.s32 (!%p345_p3), %v462_v13, %v464_v8  ;;  %v1424_v41 = vld [vmem:[%s1681_s6 + $0x80] sm:$0xff] (!%p345_p3)   ;;  %v1425_v43 = vld [vmem:[%s1681_s6 + $0x88] sm:$0xff] (!%p345_p3)  }
   0xd   : > { %1320 = vmatpush3.bf16.msra.mxu1 (!%p345_p3), %v1411_v5  ;;  %1325 = vmatprep.subr.bf16.mxu0 (!%p345_p3), %v1450_v1 }
   0xe   : > { %s1691_s27 = smov (!%p410_p4, %s1440_s27), 1  ;;  %1333 = vmatprep.subr.bf16.mxu1 %v1450_v1 }
   0xf   : > { %s421_s21 = scalar_lea.vmem %s1676_s1, %s1691_s27  ;;  %s415_s24 = scalar_lea.vmem %s1675_s0, %s1691_s27 }
  0x10   : > { %v454_v11 = vld [vmem:[%s421_s21] sm:$0x1]  ;;  %s427_s11 = scalar_lea.vmem %s1677_s2, %s1691_s27  ;;  %s433_s26 = scalar_lea.vmem %s1678_s3, %s1691_s27 }
  0x11   : > { %v453_v12 = vld [vmem:[%s415_s24] sm:$0x1]  ;;  %1314 = vmatmul.mubr.msk.bf16.vlgmr.msra.gmra.mrb[0].mxu0 %vm552_vm1, %v454_v11  ;;  %s445_s22 = scalar_lea.vmem %s1680_s5, %s1691_s27  ;;  %s451_s13 = scalar_lea.vmem %s1683_s8, %s1691_s27 }
  0x12   : > { %1322 = vmatmul.mubr.msk.bf16.vlgmr.msra.gmra.mrb[0].mxu1 %vm552_vm1, %v453_v12  ;;  %1326 = vmatpush3.bf16.msra.mxu0 %v1412_v9  ;;  %v455_v17 = vld [vmem:[%s427_s11] sm:$0x1]  ;;  %v466_v18 = vrot.slane %v453_v12, %v1559_v14  ;;  %s439_s11 = scalar_lea.vmem %s1679_s4, %s1691_s27 }
  0x13   : > { %1334 = vmatpush3.bf16.msra.mxu1 %v1413_v10  ;;  %1327 = vmatprep.subr.bf16.mxu0 %v1450_v1  ;;  %v492_v19 = vrot.slane %v455_v17, %v1559_v14  ;;  %v456_v32 = vld [vmem:[%s433_s26] sm:$0x1] }
  0x14   : > { %1335 = vmatprep.subr.bf16.mxu1 %v1450_v1  ;;  %1329 = vmatprep.mubr.msk.bf16.mxu0 %vm1451_vm0, %v1450_v1  ;;  %v473_v20 = vrot.slane %v466_v18, %v1559_v14  ;;  %v457_v36 = vld [vmem:[%s439_s11] sm:$0x1] }
  0x15   : > { %1337 = vmatprep.mubr.msk.bf16.mxu1 %vm1451_vm0, %v1450_v1  ;;  %v499_v25 = vrot.slane %v492_v19, %v1559_v14  ;;  %v515_v39 = vrot.slane %v457_v36, %v1559_v14  ;;  %v458_v42 = vld [vmem:[%s445_s22] sm:$0x1] }
  0x16   : > { %1328 = vmatpush3.bf16.msra.mxu0 %v1414_v15  ;;  %v475_v22 = vshrl.u32 %v473_v20, 16  ;;  %v478_v23 = vshll.u32 %v473_v20, 16 }
  0x17   : > { %1336 = vmatpush3.bf16.msra.mxu1 %v1415_v16  ;;  %1341 = vmatprep.subr.bf16.mxu0 %v1450_v1  ;;  %v501_v30 = vshrl.u32 %v499_v25, 16  ;;  %v504_v31 = vshll.u32 %v499_v25, 16  ;;  %v522_v40 = vrot.slane %v515_v39, %v1559_v14 }
  0x18   : > { %1349 = vmatprep.subr.bf16.mxu1 %v1450_v1  ;;  %v484_v27 = vsel %vm1577_vm4, %v475_v22, %v478_v23  ;;  %v1279_v23 = vld [vmem:[%s1682_s7] ss:$0 sm:$0xff] }
  0x19   : > { %1330 = vmatmul.mubr.msk.bf16.vlgmr.msra.gmra.mrb[4].mxu0 %vm552_vm1, %v484_v27  ;;  %v507_v34 = vsel %vm1577_vm4, %v501_v30, %v504_v31  ;;  %v524_v44 = vshrl.u32 %v522_v40, 16  ;;  %v527_v45 = vshll.u32 %v522_v40, 16 }
  0x1a   : > { %1338 = vmatmul.mubr.msk.bf16.vlgmr.msra.gmra.mrb[4].mxu1 %vm552_vm1, %v455_v17  ;;  %1342 = vmatpush3.bf16.msra.mxu0 %v1416_v24 }
  0x1b   : > { %1350 = vmatpush3.bf16.msra.mxu1 %v1417_v26  ;;  %1343 = vmatprep.subr.bf16.mxu0 %v1450_v1  ;;  %v530_v46 = vsel %vm1577_vm4, %v524_v44, %v527_v45 }
  0x1c   : > { %1351 = vmatprep.subr.bf16.mxu1 %v1450_v1  ;;  %1345 = vmatprep.mubr.msk.bf16.mxu0 %vm1451_vm0, %v1450_v1 }
  0x1d   : > { %1353 = vmatprep.mubr.msk.bf16.mxu1 %vm1451_vm0, %v1450_v1 }
  0x1e   : > { %1344 = vmatpush3.bf16.msra.mxu0 %v1418_v28 }
  0x1f   : > { %1352 = vmatpush3.bf16.msra.mxu1 %v1419_v29  ;;  %1357 = vmatprep.subr.bf16.mxu0 %v1450_v1 }
  0x20   : > { %1365 = vmatprep.subr.bf16.mxu1 %v1450_v1 }
  0x21   : > { %1346 = vmatmul.mubr.msk.bf16.vlgmr.msra.gmra.mrb[8].mxu0 %vm552_vm1, %v456_v32 }
  0x22   : > { %1354 = vmatmul.mubr.msk.bf16.vlgmr.msra.gmra.mrb[8].mxu1 %vm552_vm1, %v507_v34  ;;  %1358 = vmatpush3.bf16.msra.mxu0 %v1420_v33 }
  0x23   : > { %1366 = vmatpush3.bf16.msra.mxu1 %v1421_v35  ;;  %1359 = vmatprep.subr.bf16.mxu0 %v1450_v1 }
  0x24   : > { %1367 = vmatprep.subr.bf16.mxu1 %v1450_v1  ;;  %1361 = vmatprep.mubr.msk.bf16.mxu0 %vm1451_vm0, %v1450_v1 }
  0x25   : > { %1369 = vmatprep.mubr.msk.bf16.mxu1 %vm1451_vm0, %v1450_v1 }
  0x26   : > { %1360 = vmatpush3.bf16.msra.mxu0 %v1422_v37 }
  0x27   : > { %1368 = vmatpush3.bf16.msra.mxu1 %v1423_v38  ;;  %1373 = vmatprep.subr.bf16.mxu0 %v1450_v1 }
  0x29   : > { %1362 = vmatmul.mubr.msk.bf16.vlgmr.msra.gmra.mrb[12].mxu0 %vm552_vm1, %v457_v36 }
  0x2a   : > { %1370 = vmatmul.mubr.msk.bf16.vlgmr.msra.gmra.mrb[12].mxu1 %vm552_vm1, %v458_v42  ;;  %1374 = vmatpush3.bf16.msra.mxu0 %v1424_v41 }
  0x2b   : > { %1377 = vmatprep.mubr.msk.bf16.mxu0 %vm1451_vm0, %v1450_v1  ;;  %1375 = vmatprep.subr.bf16.mxu0 %v1450_v1 }
  0x2e   : > { %1376 = vmatpush3.bf16.msra.mxu0 %v1425_v43 }
  0x31   : > { %1378 = vmatmul.mubr.msk.bf16.vlgmr.msra.gmra.mrb[16].mxu0 %vm552_vm1, %v530_v46 }
  0xe4   : > { %v590_v47 = vpop.f32.mrb[0].mxu0 }
  0xe5   : > { %v1315_v48 = vpop.f32.mrb[1].mxu0  ;;  %v645_v49 = vpop.f32.mrb[0].mxu1 }
  0xe6   : > { %v646_v50 = vadd.f32 %v645_v49, %v590_v47  ;;  %v593_v51 = vpop.f32.mrb[2].mxu0  ;;  %v1323_v52 = vpop.f32.mrb[1].mxu1 }
  0xe7   : > { %v1316_v53 = vpop.f32.mrb[3].mxu0  ;;  %v648_v54 = vpop.f32.mrb[2].mxu1 }
  0xe8   : > { %v1324_v55 = vpop.f32.mrb[3].mxu1 }
  0xec   : > { %v705_v56 = vpop.f32.mrb[4].mxu0 }
  0xed   : > { %v766_v57 = vpop.f32.mrb[4].mxu1  ;;  %v711_v58 = vadd.f32 %v705_v56, %v646_v50  ;;  %v1331_v59 = vpop.f32.mrb[5].mxu0 }
  0xee   : > { %v1339_v60 = vpop.f32.mrb[5].mxu1  ;;  %v708_v61 = vpop.f32.mrb[6].mxu0 }
  0xef   : > { %v769_v62 = vpop.f32.mrb[6].mxu1  ;;  %v772_v63 = vadd.f32 %v766_v57, %v711_v58  ;;  %v1332_v0 = vpop.f32.mrb[7].mxu0 }
  0xf0   : > { %v1340_v1 = vpop.f32.mrb[7].mxu1 }
  0xf4   : > { %v827_v2 = vpop.f32.mrb[8].mxu0 }
  0xf5   : > { %v888_v3 = vpop.f32.mrb[8].mxu1  ;;  %v833_v4 = vadd.f32 %v827_v2, %v772_v63  ;;  %v1347_v5 = vpop.f32.mrb[9].mxu0 }
  0xf6   : > { %v1355_v6 = vpop.f32.mrb[9].mxu1  ;;  %v830_v7 = vpop.f32.mrb[10].mxu0 }
  0xf7   : > { %v891_v8 = vpop.f32.mrb[10].mxu1  ;;  %v894_v9 = vadd.f32 %v888_v3, %v833_v4  ;;  %v1348_v10 = vpop.f32.mrb[11].mxu0 }
  0xf8   : > { %v1356_v11 = vpop.f32.mrb[11].mxu1 }
  0xfc   : > { %v949_v12 = vpop.f32.mrb[12].mxu0 }
  0xfd   : > { %v1010_v13 = vpop.f32.mrb[12].mxu1  ;;  %v955_v14 = vadd.f32 %v949_v12, %v894_v9  ;;  %v1363_v15 = vpop.f32.mrb[13].mxu0 }
  0xfe   : > { %v1371_v16 = vpop.f32.mrb[13].mxu1  ;;  %v952_v17 = vpop.f32.mrb[14].mxu0 }
  0xff   : > { %v1013_v18 = vpop.f32.mrb[14].mxu1  ;;  %v1016_v19 = vadd.f32 %v1010_v13, %v955_v14  ;;  %v1364_v20 = vpop.f32.mrb[15].mxu0 }
 0x100   : > { %v1372_v21 = vpop.f32.mrb[15].mxu1 }
 0x104   : > { %v1071_v22 = vpop.f32.mrb[16].mxu0 }
 0x105   : > { %v1077_v24 = vadd.f32 %v1071_v22, %v1016_v19  ;;  %v1379_v25 = vpop.f32.mrb[17].mxu0 }
 0x106   : > { %v1074_v26 = vpop.f32.mrb[18].mxu0 }
 0x107   : > { %v1085_v27 = vadd.f32 %v1279_v23, %v1077_v24  ;;  %v1380_v28 = vpop.f32.mrb[19].mxu0 }
 0x109   : > { %v1086_v29 = vmax.f32 %v1085_v27, 0.0 }
 0x10b   : > { %v1087_v30 = vpack.c.bf16 %v1086_v29, %v1086_v29 }
 0x10d   : > { %1089 = vst.msk [vmem:[%s451_s13] sm:$0x1] %vm1088_vm5, %v1087_v30 }
 0x10e PF: > { %s18_s29 = sadd.s32 1, %s1448_s29   ;;  %s1686_s27 = smov %s1444_s28 }
 0x10f   : > { %p15_p5 = scmp.ge.s32.totalorder %s18_s29, 4   ;;  %s1687_s28 = smov %s1689_s30 }
 0x111   :  { %17 = sbr.rel (!%p15_p5) target bundleno = 2 (0x2), region = 105 }

</bundles_post_ra>
